<compile_context>
chip_gen: v5e
topology: v5e:2x2
jax: 0.10.0
libtpu: 0.0.40
codegen_flags: <defaults>
</compile_context>

<pallas_src>
import math

import numpy as np
import jax
import jax.numpy as jnp
from jax.experimental import pallas as pl
from jax.experimental.pallas import tpu as pltpu

# ----------------------------- configuration --------------------------------
D_MODEL = 128   # d_model (small but lane-aligned; real model: 512)
NHEAD   = 4     # nhead -> head_dim = 32
DFF     = 256   # dim_feedforward (real model: 2048)
SEQ     = 64    # L (24*24 = 576 in the real model)
BATCH   = 2     # B
EPS     = 1e-5  # nn.LayerNorm default eps

assert D_MODEL % NHEAD == 0
assert D_MODEL % 128 == 0   # lane-aligned per-batch column block of (L, B*E)


# ------------------------------- kernel -------------------------------------
def _layernorm(x, g, b):
    """LayerNorm over the last axis (two-pass / centered variance)."""
    mu = jnp.mean(x, axis=-1, keepdims=True)
    c = x - mu
    var = jnp.mean(c * c, axis=-1, keepdims=True)
    return c * jax.lax.rsqrt(var + EPS) * g + b


def decoder_layer_kernel(
    x_ref,                  # (L, E) f32 : one batch element (lane-dense block)
    bqkv_ref,               # (3H, L, hd) f32 : fused pos/bias term, head-major
    n1g_ref, n1b_ref,       # norm1
    wqkv_ref,               # (3H, E, hd) bf16 : [Wq*scale | Wk | Wv], head-major
    wo_ref, bo_ref,         # out_proj: (E, E) bf16, (1, E)
    sag_ref, sab_ref,       # self_attn_norm
    n2g_ref, n2b_ref,       # norm2
    w1_ref, b1_ref,         # ffn linear1: (E, F) bf16, (1, F)
    w2_ref, b2_ref,         # ffn linear2: (F, E) bf16, (1, E)
    out_ref,                # (L, E) f32
):
    L, E = x_ref.shape
    H = NHEAD
    hd = E // H

    x = x_ref[...]

    # --- vis2 = norm1(vis) ----------------------------------------------------
    vis2 = _layernorm(x, n1g_ref[...], n1b_ref[...])

    # --- head-major fused q|k|v projection (contraction over E, MXU-friendly);
    #     pos projections, biases and the 1/sqrt(hd) scale are pre-folded. -----
    vis2_b = jnp.broadcast_to(vis2.astype(jnp.bfloat16), (3 * H, L, E))
    qkv = jnp.einsum("gle,ged->gld", vis2_b, wqkv_ref[...],
                     preferred_element_type=jnp.float32) + bqkv_ref[...]
    qkv = qkv.astype(jnp.bfloat16)            # (3H, L, hd), bf16 for the MXU
    qh = qkv[:H]                              # (H, L, hd)  free leading slices
    kh = qkv[H:2 * H]
    vh = qkv[2 * H:]

    # --- attention; softmax normalisation deferred to the (H, L, hd) output ---
    s = jnp.einsum("hld,hmd->hlm", qh, kh,
                   preferred_element_type=jnp.float32)            # (H, L, L)
    s = s - jnp.max(s, axis=-1, keepdims=True)
    p = jnp.exp(s)
    denom = jnp.sum(p, axis=-1, keepdims=True)                    # (H, L, 1)
    o = jnp.einsum("hlm,hmd->hld", p.astype(jnp.bfloat16), vh,
                   preferred_element_type=jnp.float32)            # (H, L, hd)
    o = o / denom                            # exact normalisation, O(H*L*hd)

    # --- merge heads (single relayout) + one full-contraction out_proj --------
    o_m = jnp.concatenate([o[h] for h in range(H)], axis=-1)      # (L, E) f32
    attn = jnp.dot(o_m.astype(jnp.bfloat16), wo_ref[...],
                   preferred_element_type=jnp.float32) + bo_ref[...]

    # --- self_attn_norm + residual (dropout1 == identity in eval) -------------
    attn = _layernorm(attn, sag_ref[...], sab_ref[...])
    x = x + attn

    # --- FFN block (ffn dropout / dropout2 == identity in eval) ---------------
    y = _layernorm(x, n2g_ref[...], n2b_ref[...])
    y = jnp.dot(y.astype(jnp.bfloat16), w1_ref[...],
                preferred_element_type=jnp.float32) + b1_ref[...]
    y = jnp.maximum(y, 0.0)
    y = jnp.dot(y.astype(jnp.bfloat16), w2_ref[...],
                preferred_element_type=jnp.float32) + b2_ref[...]

    out_ref[...] = (x + y).astype(out_ref.dtype)


# ------------------------------- wrapper -------------------------------------
def transformer_decoder_layer(vis, vis_pos, params):
    """vis: (L, B, E) float32;  vis_pos: (L, 1, E) float32 — PyTorch layout."""
    L, B, E = vis.shape
    H = NHEAD
    hd = E // H
    scale = 1.0 / math.sqrt(hd)

    pos = vis_pos[:, 0, :]                                        # (L, E)

    # Fused QKV weight, columns ordered (qkv, head, dim); scale folded into Q;
    # then relaid head-major (3H, E, hd) once, in the wrapper.
    w_qkv = jnp.concatenate(
        [params["wq"] * scale, params["wk"], params["wv"]], axis=1)     # (E, 3E)
    w_qkv3 = w_qkv.reshape(E, 3 * H, hd).transpose(1, 0, 2).astype(jnp.bfloat16)

    # Batch-invariant bias: pos projections + biases, f32, head-major.
    b_qkv = jnp.concatenate(
        [(pos @ params["wq"] + params["bq"]) * scale,
         pos @ params["wk"] + params["bk"],
         jnp.broadcast_to(params["bv"], (L, E))], axis=1)               # (L, 3E)
    b_qkv3 = b_qkv.reshape(L, 3 * H, hd).transpose(1, 0, 2)             # (3H, L, hd)

    flat = [
        b_qkv3,
        params["n1_g"], params["n1_b"],
        w_qkv3,
        params["wo"].astype(jnp.bfloat16), params["bo"],
        params["sa_g"], params["sa_b"],
        params["n2_g"], params["n2_b"],
        params["w1"].astype(jnp.bfloat16), params["bf1"],
        params["w2"].astype(jnp.bfloat16), params["bf2"],
    ]

    # Native (L, B, E) layout viewed as (L, B*E): batch b is the lane-aligned
    # column block [b*E, (b+1)*E)  ->  no (L,B,E)<->(B,L,E) HBM transposes.
    x2d = vis.reshape(L, B * E)

    const_spec = lambda a: pl.BlockSpec(a.shape, lambda i: (0,) * a.ndim)
    # TODO(synk): at real size single-buffer these resident constants
    #             (pipeline_mode=pl.Buffered(1)) to save VMEM on v7x.
    in_specs = (
        [pl.BlockSpec((L, E), lambda i: (0, i))]      # per-batch column block
        + [const_spec(a) for a in flat]               # weights resident
    )

    out2d = pl.pallas_call(
        decoder_layer_kernel,
        out_shape=jax.ShapeDtypeStruct((L, B * E), jnp.float32),
        grid_spec=pltpu.PrefetchScalarGridSpec(
            num_scalar_prefetch=0,
            grid=(B,),
            in_specs=in_specs,
            out_specs=pl.BlockSpec((L, E), lambda i: (0, i)),
        ),
        compiler_params=pltpu.CompilerParams(
            dimension_semantics=("parallel",),
            vmem_limit_bytes=16 << 20,   # plenty at toy size; raise at real size
        ),
    )(x2d, *flat)

    return out2d.reshape(L, B, E)


# ----------------------------- param init ------------------------------------
def init_params(key):
    E, F = D_MODEL, DFF
    ks = jax.random.split(key, 20)
    w = lambda k, shape: 0.02 * jax.random.normal(k, shape, jnp.float32)
    return {
        "n1_g": 1.0 + w(ks[0], (1, E)), "n1_b": w(ks[1], (1, E)),
        "sa_g": 1.0 + w(ks[2], (1, E)), "sa_b": w(ks[3], (1, E)),
        "n2_g": 1.0 + w(ks[4], (1, E)), "n2_b": w(ks[5], (1, E)),
        # attention in_proj split into q/k/v, stored as (in, out) = W^T
        "wq": w(ks[6],  (E, E)), "wk": w(ks[7],  (E, E)), "wv": w(ks[8], (E, E)),
        "bq": w(ks[9],  (1, E)), "bk": w(ks[10], (1, E)), "bv": w(ks[11], (1, E)),
        # attention out_proj
        "wo": w(ks[12], (E, E)), "bo": w(ks[13], (1, E)),
        # FFN
        "w1": w(ks[14], (E, F)), "bf1": w(ks[15], (1, F)),
        "w2": w(ks[16], (F, E)), "bf2": w(ks[17], (1, E)),
    }


# --------------------------- pure-JAX reference -------------------------------
def reference(vis, vis_pos, p):
    x   = jnp.transpose(vis, (1, 0, 2))       # (B, L, E)
    pos = vis_pos[:, 0, :]                    # (L, E)

    def ln(t, g, b):
        mu  = t.mean(-1, keepdims=True)
        var = ((t - mu) ** 2).mean(-1, keepdims=True)
        return (t - mu) / jnp.sqrt(var + EPS) * g + b

    vis2 = ln(x, p["n1_g"], p["n1_b"])
    qk   = vis2 + pos
    q = qk @ p["wq"] + p["bq"]
    k = qk @ p["wk"] + p["bk"]
    v = vis2 @ p["wv"] + p["bv"]
    B, L, E = q.shape
    hd = E // NHEAD
    qh = q.reshape(B, L, NHEAD, hd)
    kh = k.reshape(B, L, NHEAD, hd)
    vh = v.reshape(B, L, NHEAD, hd)
    s  = jnp.einsum("blhd,bmhd->bhlm", qh, kh) / math.sqrt(hd)
    pw = jax.nn.softmax(s, axis=-1)
    o  = jnp.einsum("bhlm,bmhd->blhd", pw, vh).reshape(B, L, E)
    attn = o @ p["wo"] + p["bo"]
    attn = ln(attn, p["sa_g"], p["sa_b"])
    x = x + attn
    y = ln(x, p["n2_g"], p["n2_b"])
    y = jnp.maximum(y @ p["w1"] + p["bf1"], 0.0) @ p["w2"] + p["bf2"]
    return jnp.transpose(x + y, (1, 0, 2))    # (L, B, E)


# --------------------------------- main ---------------------------------------
if __name__ == "__main__":
    key = jax.random.PRNGKey(0)
    k_in, k_pos, k_par = jax.random.split(key, 3)

    vis     = jax.random.normal(k_in,  (SEQ, BATCH, D_MODEL), jnp.float32)
    vis_pos = jax.random.normal(k_pos, (SEQ, 1,     D_MODEL), jnp.float32)
    params  = init_params(k_par)

    out = jax.block_until_ready(transformer_decoder_layer(vis, vis_pos, params))
    ref = jax.block_until_ready(reference(vis, vis_pos, params))

    assert out.shape == (SEQ, BATCH, D_MODEL)
    # bf16 MXU operands vs. an f32 reference (error amplified by self_attn_norm).
    np.testing.assert_allclose(np.asarray(out), np.asarray(ref),
                               rtol=3e-2, atol=3e-2)

    print("KERNEL_OK")
</pallas_src>

<mosaic_0001>
module attributes {stable_mosaic.version = 11 : i64} {
  func.func @decoder_layer_kernel(%arg0: i32, %arg1: memref<64x128xf32, #tpu.memory_space<vmem>>, %arg2: memref<12x64x32xf32, #tpu.memory_space<vmem>>, %arg3: memref<1x128xf32, #tpu.memory_space<vmem>>, %arg4: memref<1x128xf32, #tpu.memory_space<vmem>>, %arg5: memref<12x128x32xbf16, #tpu.memory_space<vmem>>, %arg6: memref<128x128xbf16, #tpu.memory_space<vmem>>, %arg7: memref<1x128xf32, #tpu.memory_space<vmem>>, %arg8: memref<1x128xf32, #tpu.memory_space<vmem>>, %arg9: memref<1x128xf32, #tpu.memory_space<vmem>>, %arg10: memref<1x128xf32, #tpu.memory_space<vmem>>, %arg11: memref<1x128xf32, #tpu.memory_space<vmem>>, %arg12: memref<128x256xbf16, #tpu.memory_space<vmem>>, %arg13: memref<1x256xf32, #tpu.memory_space<vmem>>, %arg14: memref<256x128xbf16, #tpu.memory_space<vmem>>, %arg15: memref<1x128xf32, #tpu.memory_space<vmem>>, %arg16: memref<64x128xf32, #tpu.memory_space<vmem>>) attributes {dimension_semantics = [#tpu.dimension_semantics<parallel>], iteration_bounds = array<i64: 2>, scalar_prefetch = 0 : i64, scratch_operands = 0 : i64, tpu.core_type = #tpu.core_type<tc>, window_params = [{transform_indices = @transform_0, window_bounds = array<i64: 64, 128>}, {pipeline_mode = #tpu.pipeline_mode<synchronous>, transform_indices = @transform_1, window_bounds = array<i64: 12, 64, 32>}, {pipeline_mode = #tpu.pipeline_mode<synchronous>, transform_indices = @transform_2, window_bounds = array<i64: 1, 128>}, {pipeline_mode = #tpu.pipeline_mode<synchronous>, transform_indices = @transform_3, window_bounds = array<i64: 1, 128>}, {pipeline_mode = #tpu.pipeline_mode<synchronous>, transform_indices = @transform_4, window_bounds = array<i64: 12, 128, 32>}, {pipeline_mode = #tpu.pipeline_mode<synchronous>, transform_indices = @transform_5, window_bounds = array<i64: 128, 128>}, {pipeline_mode = #tpu.pipeline_mode<synchronous>, transform_indices = @transform_6, window_bounds = array<i64: 1, 128>}, {pipeline_mode = #tpu.pipeline_mode<synchronous>, transform_indices = @transform_7, window_bounds = array<i64: 1, 128>}, {pipeline_mode = #tpu.pipeline_mode<synchronous>, transform_indices = @transform_8, window_bounds = array<i64: 1, 128>}, {pipeline_mode = #tpu.pipeline_mode<synchronous>, transform_indices = @transform_9, window_bounds = array<i64: 1, 128>}, {pipeline_mode = #tpu.pipeline_mode<synchronous>, transform_indices = @transform_10, window_bounds = array<i64: 1, 128>}, {pipeline_mode = #tpu.pipeline_mode<synchronous>, transform_indices = @transform_11, window_bounds = array<i64: 128, 256>}, {pipeline_mode = #tpu.pipeline_mode<synchronous>, transform_indices = @transform_12, window_bounds = array<i64: 1, 256>}, {pipeline_mode = #tpu.pipeline_mode<synchronous>, transform_indices = @transform_13, window_bounds = array<i64: 256, 128>}, {pipeline_mode = #tpu.pipeline_mode<synchronous>, transform_indices = @transform_14, window_bounds = array<i64: 1, 128>}, {transform_indices = @transform_15, window_bounds = array<i64: 64, 128>}]} {
    %c0 = arith.constant 0 : index
    %c0_0 = arith.constant 0 : index
    %0 = vector.load %arg1[%c0, %c0_0] : memref<64x128xf32, #tpu.memory_space<vmem>>, vector<64x128xf32>
    %c0_1 = arith.constant 0 : index
    %c0_2 = arith.constant 0 : index
    %1 = vector.load %arg3[%c0_1, %c0_2] : memref<1x128xf32, #tpu.memory_space<vmem>>, vector<1x128xf32>
    %c0_3 = arith.constant 0 : index
    %c0_4 = arith.constant 0 : index
    %2 = vector.load %arg4[%c0_3, %c0_4] : memref<1x128xf32, #tpu.memory_space<vmem>>, vector<1x128xf32>
    %cst = arith.constant dense<0.000000e+00> : vector<64xf32>
    %3 = vector.multi_reduction <add>, %0, %cst [1] : vector<64x128xf32> to vector<64xf32>
    %4 = vector.shape_cast %3 : vector<64xf32> to vector<64x1xf32>
    %cst_5 = arith.constant 1.280000e+02 : f32
    %5 = vector.broadcast %cst_5 : f32 to vector<64x1xf32>
    %6 = arith.divf %4, %5 : vector<64x1xf32>
    %7 = vector.broadcast %6 : vector<64x1xf32> to vector<64x128xf32>
    %8 = arith.subf %0, %7 : vector<64x128xf32>
    %9 = arith.mulf %8, %8 : vector<64x128xf32>
    %cst_6 = arith.constant dense<0.000000e+00> : vector<64xf32>
    %10 = vector.multi_reduction <add>, %9, %cst_6 [1] : vector<64x128xf32> to vector<64xf32>
    %11 = vector.shape_cast %10 : vector<64xf32> to vector<64x1xf32>
    %cst_7 = arith.constant 1.280000e+02 : f32
    %12 = vector.broadcast %cst_7 : f32 to vector<64x1xf32>
    %13 = arith.divf %11, %12 : vector<64x1xf32>
    %cst_8 = arith.constant 9.99999974E-6 : f32
    %14 = vector.broadcast %cst_8 : f32 to vector<64x1xf32>
    %15 = arith.addf %13, %14 : vector<64x1xf32>
    %16 = math.rsqrt %15 : vector<64x1xf32>
    %17 = vector.broadcast %16 : vector<64x1xf32> to vector<64x128xf32>
    %18 = arith.mulf %8, %17 : vector<64x128xf32>
    %19 = vector.broadcast %1 : vector<1x128xf32> to vector<64x128xf32>
    %20 = arith.mulf %18, %19 : vector<64x128xf32>
    %21 = vector.broadcast %2 : vector<1x128xf32> to vector<64x128xf32>
    %22 = arith.addf %20, %21 : vector<64x128xf32>
    %23 = arith.truncf %22 : vector<64x128xf32> to vector<64x128xbf16>
    %24 = vector.shape_cast %23 : vector<64x128xbf16> to vector<1x64x128xbf16>
    %25 = vector.broadcast %24 : vector<1x64x128xbf16> to vector<12x64x128xbf16>
    %c0_9 = arith.constant 0 : index
    %c0_10 = arith.constant 0 : index
    %c0_11 = arith.constant 0 : index
    %26 = vector.load %arg5[%c0_9, %c0_10, %c0_11] : memref<12x128x32xbf16, #tpu.memory_space<vmem>>, vector<12x128x32xbf16>
    "tpu.trace_start"() <{level = 10 : i32, message = "gle,ged->gld"}> : () -> ()
    %cst_12 = arith.constant dense<0.000000e+00> : vector<12x64x32xf32>
    %27 = tpu.matmul %25, %26, %cst_12 {dimension_numbers = #tpu.dot_dimension_numbers<[2], [1], [1], [2], [0, 0, 0, 1, 1, 2], [0], [0]>} : vector<12x64x128xbf16>, vector<12x128x32xbf16>, vector<12x64x32xf32> -> vector<12x64x32xf32>
    "tpu.trace_stop"() : () -> ()
    %c0_13 = arith.constant 0 : index
    %c0_14 = arith.constant 0 : index
    %c0_15 = arith.constant 0 : index
    %28 = vector.load %arg2[%c0_13, %c0_14, %c0_15] : memref<12x64x32xf32, #tpu.memory_space<vmem>>, vector<12x64x32xf32>
    %29 = arith.addf %27, %28 : vector<12x64x32xf32>
    %30 = arith.truncf %29 : vector<12x64x32xf32> to vector<12x64x32xbf16>
    %31 = vector.extract_strided_slice %30 {offsets = [0, 0, 0], sizes = [4, 64, 32], strides = [1, 1, 1]} : vector<12x64x32xbf16> to vector<4x64x32xbf16>
    %32 = vector.extract_strided_slice %30 {offsets = [4, 0, 0], sizes = [4, 64, 32], strides = [1, 1, 1]} : vector<12x64x32xbf16> to vector<4x64x32xbf16>
    %33 = vector.extract_strided_slice %30 {offsets = [8, 0, 0], sizes = [4, 64, 32], strides = [1, 1, 1]} : vector<12x64x32xbf16> to vector<4x64x32xbf16>
    "tpu.trace_start"() <{level = 10 : i32, message = "hld,hmd->hlm"}> : () -> ()
    %cst_16 = arith.constant dense<0.000000e+00> : vector<4x64x64xf32>
    %34 = tpu.matmul %31, %32, %cst_16 {dimension_numbers = #tpu.dot_dimension_numbers<[2], [2], [1], [1], [0, 0, 0, 1, 1, 1], [0], [0]>} : vector<4x64x32xbf16>, vector<4x64x32xbf16>, vector<4x64x64xf32> -> vector<4x64x64xf32>
    "tpu.trace_stop"() : () -> ()
    %cst_17 = arith.constant dense<0xFF800000> : vector<4x64xf32>
    %35 = vector.multi_reduction <maximumf>, %34, %cst_17 [2] : vector<4x64x64xf32> to vector<4x64xf32>
    %36 = vector.shape_cast %35 : vector<4x64xf32> to vector<4x64x1xf32>
    %37 = vector.broadcast %36 : vector<4x64x1xf32> to vector<4x64x64xf32>
    %38 = arith.subf %34, %37 : vector<4x64x64xf32>
    %39 = math.exp %38 : vector<4x64x64xf32>
    %cst_18 = arith.constant dense<0.000000e+00> : vector<4x64xf32>
    %40 = vector.multi_reduction <add>, %39, %cst_18 [2] : vector<4x64x64xf32> to vector<4x64xf32>
    %41 = vector.shape_cast %40 : vector<4x64xf32> to vector<4x64x1xf32>
    %42 = arith.truncf %39 : vector<4x64x64xf32> to vector<4x64x64xbf16>
    "tpu.trace_start"() <{level = 10 : i32, message = "hlm,hmd->hld"}> : () -> ()
    %cst_19 = arith.constant dense<0.000000e+00> : vector<4x64x32xf32>
    %43 = tpu.matmul %42, %33, %cst_19 {dimension_numbers = #tpu.dot_dimension_numbers<[2], [1], [1], [2], [0, 0, 0, 1, 1, 2], [0], [0]>} : vector<4x64x64xbf16>, vector<4x64x32xbf16>, vector<4x64x32xf32> -> vector<4x64x32xf32>
    "tpu.trace_stop"() : () -> ()
    %44 = vector.broadcast %41 : vector<4x64x1xf32> to vector<4x64x32xf32>
    %45 = arith.divf %43, %44 : vector<4x64x32xf32>
    %46 = vector.extract_strided_slice %45 {offsets = [0, 0, 0], sizes = [1, 64, 32], strides = [1, 1, 1]} : vector<4x64x32xf32> to vector<1x64x32xf32>
    %47 = vector.shape_cast %46 : vector<1x64x32xf32> to vector<64x32xf32>
    %48 = vector.extract_strided_slice %45 {offsets = [1, 0, 0], sizes = [1, 64, 32], strides = [1, 1, 1]} : vector<4x64x32xf32> to vector<1x64x32xf32>
    %49 = vector.shape_cast %48 : vector<1x64x32xf32> to vector<64x32xf32>
    %50 = vector.extract_strided_slice %45 {offsets = [2, 0, 0], sizes = [1, 64, 32], strides = [1, 1, 1]} : vector<4x64x32xf32> to vector<1x64x32xf32>
    %51 = vector.shape_cast %50 : vector<1x64x32xf32> to vector<64x32xf32>
    %52 = vector.extract_strided_slice %45 {offsets = [3, 0, 0], sizes = [1, 64, 32], strides = [1, 1, 1]} : vector<4x64x32xf32> to vector<1x64x32xf32>
    %53 = vector.shape_cast %52 : vector<1x64x32xf32> to vector<64x32xf32>
    %54 = tpu.concatenate %47, %49, %51, %53 in 1 : vector<64x32xf32>, vector<64x32xf32>, vector<64x32xf32>, vector<64x32xf32> -> vector<64x128xf32>
    %55 = arith.truncf %54 : vector<64x128xf32> to vector<64x128xbf16>
    %c0_20 = arith.constant 0 : index
    %c0_21 = arith.constant 0 : index
    %56 = vector.load %arg6[%c0_20, %c0_21] : memref<128x128xbf16, #tpu.memory_space<vmem>>, vector<128x128xbf16>
    %cst_22 = arith.constant dense<0.000000e+00> : vector<64x128xf32>
    %57 = tpu.matmul %55, %56, %cst_22 {dimension_numbers = #tpu.dot_dimension_numbers<[1], [0], [0], [1], [0, 0, 1, 1], [], []>} : vector<64x128xbf16>, vector<128x128xbf16>, vector<64x128xf32> -> vector<64x128xf32>
    %c0_23 = arith.constant 0 : index
    %c0_24 = arith.constant 0 : index
    %58 = vector.load %arg7[%c0_23, %c0_24] : memref<1x128xf32, #tpu.memory_space<vmem>>, vector<1x128xf32>
    %59 = vector.broadcast %58 : vector<1x128xf32> to vector<64x128xf32>
    %60 = arith.addf %57, %59 : vector<64x128xf32>
    %c0_25 = arith.constant 0 : index
    %c0_26 = arith.constant 0 : index
    %61 = vector.load %arg8[%c0_25, %c0_26] : memref<1x128xf32, #tpu.memory_space<vmem>>, vector<1x128xf32>
    %c0_27 = arith.constant 0 : index
    %c0_28 = arith.constant 0 : index
    %62 = vector.load %arg9[%c0_27, %c0_28] : memref<1x128xf32, #tpu.memory_space<vmem>>, vector<1x128xf32>
    %cst_29 = arith.constant dense<0.000000e+00> : vector<64xf32>
    %63 = vector.multi_reduction <add>, %60, %cst_29 [1] : vector<64x128xf32> to vector<64xf32>
    %64 = vector.shape_cast %63 : vector<64xf32> to vector<64x1xf32>
    %cst_30 = arith.constant 1.280000e+02 : f32
    %65 = vector.broadcast %cst_30 : f32 to vector<64x1xf32>
    %66 = arith.divf %64, %65 : vector<64x1xf32>
    %67 = vector.broadcast %66 : vector<64x1xf32> to vector<64x128xf32>
    %68 = arith.subf %60, %67 : vector<64x128xf32>
    %69 = arith.mulf %68, %68 : vector<64x128xf32>
    %cst_31 = arith.constant dense<0.000000e+00> : vector<64xf32>
    %70 = vector.multi_reduction <add>, %69, %cst_31 [1] : vector<64x128xf32> to vector<64xf32>
    %71 = vector.shape_cast %70 : vector<64xf32> to vector<64x1xf32>
    %cst_32 = arith.constant 1.280000e+02 : f32
    %72 = vector.broadcast %cst_32 : f32 to vector<64x1xf32>
    %73 = arith.divf %71, %72 : vector<64x1xf32>
    %cst_33 = arith.constant 9.99999974E-6 : f32
    %74 = vector.broadcast %cst_33 : f32 to vector<64x1xf32>
    %75 = arith.addf %73, %74 : vector<64x1xf32>
    %76 = math.rsqrt %75 : vector<64x1xf32>
    %77 = vector.broadcast %76 : vector<64x1xf32> to vector<64x128xf32>
    %78 = arith.mulf %68, %77 : vector<64x128xf32>
    %79 = vector.broadcast %61 : vector<1x128xf32> to vector<64x128xf32>
    %80 = arith.mulf %78, %79 : vector<64x128xf32>
    %81 = vector.broadcast %62 : vector<1x128xf32> to vector<64x128xf32>
    %82 = arith.addf %80, %81 : vector<64x128xf32>
    %83 = arith.addf %0, %82 : vector<64x128xf32>
    %c0_34 = arith.constant 0 : index
    %c0_35 = arith.constant 0 : index
    %84 = vector.load %arg10[%c0_34, %c0_35] : memref<1x128xf32, #tpu.memory_space<vmem>>, vector<1x128xf32>
    %c0_36 = arith.constant 0 : index
    %c0_37 = arith.constant 0 : index
    %85 = vector.load %arg11[%c0_36, %c0_37] : memref<1x128xf32, #tpu.memory_space<vmem>>, vector<1x128xf32>
    %cst_38 = arith.constant dense<0.000000e+00> : vector<64xf32>
    %86 = vector.multi_reduction <add>, %83, %cst_38 [1] : vector<64x128xf32> to vector<64xf32>
    %87 = vector.shape_cast %86 : vector<64xf32> to vector<64x1xf32>
    %cst_39 = arith.constant 1.280000e+02 : f32
    %88 = vector.broadcast %cst_39 : f32 to vector<64x1xf32>
    %89 = arith.divf %87, %88 : vector<64x1xf32>
    %90 = vector.broadcast %89 : vector<64x1xf32> to vector<64x128xf32>
    %91 = arith.subf %83, %90 : vector<64x128xf32>
    %92 = arith.mulf %91, %91 : vector<64x128xf32>
    %cst_40 = arith.constant dense<0.000000e+00> : vector<64xf32>
    %93 = vector.multi_reduction <add>, %92, %cst_40 [1] : vector<64x128xf32> to vector<64xf32>
    %94 = vector.shape_cast %93 : vector<64xf32> to vector<64x1xf32>
    %cst_41 = arith.constant 1.280000e+02 : f32
    %95 = vector.broadcast %cst_41 : f32 to vector<64x1xf32>
    %96 = arith.divf %94, %95 : vector<64x1xf32>
    %cst_42 = arith.constant 9.99999974E-6 : f32
    %97 = vector.broadcast %cst_42 : f32 to vector<64x1xf32>
    %98 = arith.addf %96, %97 : vector<64x1xf32>
    %99 = math.rsqrt %98 : vector<64x1xf32>
    %100 = vector.broadcast %99 : vector<64x1xf32> to vector<64x128xf32>
    %101 = arith.mulf %91, %100 : vector<64x128xf32>
    %102 = vector.broadcast %84 : vector<1x128xf32> to vector<64x128xf32>
    %103 = arith.mulf %101, %102 : vector<64x128xf32>
    %104 = vector.broadcast %85 : vector<1x128xf32> to vector<64x128xf32>
    %105 = arith.addf %103, %104 : vector<64x128xf32>
    %106 = arith.truncf %105 : vector<64x128xf32> to vector<64x128xbf16>
    %c0_43 = arith.constant 0 : index
    %c0_44 = arith.constant 0 : index
    %107 = vector.load %arg12[%c0_43, %c0_44] : memref<128x256xbf16, #tpu.memory_space<vmem>>, vector<128x256xbf16>
    %cst_45 = arith.constant dense<0.000000e+00> : vector<64x256xf32>
    %108 = tpu.matmul %106, %107, %cst_45 {dimension_numbers = #tpu.dot_dimension_numbers<[1], [0], [0], [1], [0, 0, 1, 1], [], []>} : vector<64x128xbf16>, vector<128x256xbf16>, vector<64x256xf32> -> vector<64x256xf32>
    %c0_46 = arith.constant 0 : index
    %c0_47 = arith.constant 0 : index
    %109 = vector.load %arg13[%c0_46, %c0_47] : memref<1x256xf32, #tpu.memory_space<vmem>>, vector<1x256xf32>
    %110 = vector.broadcast %109 : vector<1x256xf32> to vector<64x256xf32>
    %111 = arith.addf %108, %110 : vector<64x256xf32>
    %cst_48 = arith.constant 0.000000e+00 : f32
    %112 = vector.broadcast %cst_48 : f32 to vector<64x256xf32>
    %113 = arith.maximumf %111, %112 : vector<64x256xf32>
    %114 = arith.truncf %113 : vector<64x256xf32> to vector<64x256xbf16>
    %c0_49 = arith.constant 0 : index
    %c0_50 = arith.constant 0 : index
    %115 = vector.load %arg14[%c0_49, %c0_50] : memref<256x128xbf16, #tpu.memory_space<vmem>>, vector<256x128xbf16>
    %cst_51 = arith.constant dense<0.000000e+00> : vector<64x128xf32>
    %116 = tpu.matmul %114, %115, %cst_51 {dimension_numbers = #tpu.dot_dimension_numbers<[1], [0], [0], [1], [0, 0, 1, 1], [], []>} : vector<64x256xbf16>, vector<256x128xbf16>, vector<64x128xf32> -> vector<64x128xf32>
    %c0_52 = arith.constant 0 : index
    %c0_53 = arith.constant 0 : index
    %117 = vector.load %arg15[%c0_52, %c0_53] : memref<1x128xf32, #tpu.memory_space<vmem>>, vector<1x128xf32>
    %118 = vector.broadcast %117 : vector<1x128xf32> to vector<64x128xf32>
    %119 = arith.addf %116, %118 : vector<64x128xf32>
    %120 = arith.addf %83, %119 : vector<64x128xf32>
    %c0_54 = arith.constant 0 : index
    %c0_55 = arith.constant 0 : index
    %121 = vector.load %arg16[%c0_54, %c0_55] : memref<64x128xf32, #tpu.memory_space<vmem>>, vector<64x128xf32>
    tpu.vector_store %arg16[%c0_54, %c0_55], %120 {strides = array<i32>} : memref<64x128xf32, #tpu.memory_space<vmem>>, vector<64x128xf32>,
    return
  }
  func.func @transform_0(%arg0: i32) -> (i32, i32) {
    %c0_i32 = arith.constant 0 : i32
    %c0_i32_0 = arith.constant 0 : i32
    return %c0_i32, %arg0 : i32, i32
  }
  func.func @transform_1(%arg0: i32) -> (i32, i32, i32) {
    %c0_i32 = arith.constant 0 : i32
    %c0_i32_0 = arith.constant 0 : i32
    %c0_i32_1 = arith.constant 0 : i32
    %c0_i32_2 = arith.constant 0 : i32
    return %c0_i32, %c0_i32_0, %c0_i32_1 : i32, i32, i32
  }
  func.func @transform_2(%arg0: i32) -> (i32, i32) {
    %c0_i32 = arith.constant 0 : i32
    %c0_i32_0 = arith.constant 0 : i32
    %c0_i32_1 = arith.constant 0 : i32
    return %c0_i32, %c0_i32_0 : i32, i32
  }
  func.func @transform_3(%arg0: i32) -> (i32, i32) {
    %c0_i32 = arith.constant 0 : i32
    %c0_i32_0 = arith.constant 0 : i32
    %c0_i32_1 = arith.constant 0 : i32
    return %c0_i32, %c0_i32_0 : i32, i32
  }
  func.func @transform_4(%arg0: i32) -> (i32, i32, i32) {
    %c0_i32 = arith.constant 0 : i32
    %c0_i32_0 = arith.constant 0 : i32
    %c0_i32_1 = arith.constant 0 : i32
    %c0_i32_2 = arith.constant 0 : i32
    return %c0_i32, %c0_i32_0, %c0_i32_1 : i32, i32, i32
  }
  func.func @transform_5(%arg0: i32) -> (i32, i32) {
    %c0_i32 = arith.constant 0 : i32
    %c0_i32_0 = arith.constant 0 : i32
    %c0_i32_1 = arith.constant 0 : i32
    return %c0_i32, %c0_i32_0 : i32, i32
  }
  func.func @transform_6(%arg0: i32) -> (i32, i32) {
    %c0_i32 = arith.constant 0 : i32
    %c0_i32_0 = arith.constant 0 : i32
    %c0_i32_1 = arith.constant 0 : i32
    return %c0_i32, %c0_i32_0 : i32, i32
  }
  func.func @transform_7(%arg0: i32) -> (i32, i32) {
    %c0_i32 = arith.constant 0 : i32
    %c0_i32_0 = arith.constant 0 : i32
    %c0_i32_1 = arith.constant 0 : i32
    return %c0_i32, %c0_i32_0 : i32, i32
  }
  func.func @transform_8(%arg0: i32) -> (i32, i32) {
    %c0_i32 = arith.constant 0 : i32
    %c0_i32_0 = arith.constant 0 : i32
    %c0_i32_1 = arith.constant 0 : i32
    return %c0_i32, %c0_i32_0 : i32, i32
  }
  func.func @transform_9(%arg0: i32) -> (i32, i32) {
    %c0_i32 = arith.constant 0 : i32
    %c0_i32_0 = arith.constant 0 : i32
    %c0_i32_1 = arith.constant 0 : i32
    return %c0_i32, %c0_i32_0 : i32, i32
  }
  func.func @transform_10(%arg0: i32) -> (i32, i32) {
    %c0_i32 = arith.constant 0 : i32
    %c0_i32_0 = arith.constant 0 : i32
    %c0_i32_1 = arith.constant 0 : i32
    return %c0_i32, %c0_i32_0 : i32, i32
  }
  func.func @transform_11(%arg0: i32) -> (i32, i32) {
    %c0_i32 = arith.constant 0 : i32
    %c0_i32_0 = arith.constant 0 : i32
    %c0_i32_1 = arith.constant 0 : i32
    return %c0_i32, %c0_i32_0 : i32, i32
  }
  func.func @transform_12(%arg0: i32) -> (i32, i32) {
    %c0_i32 = arith.constant 0 : i32
    %c0_i32_0 = arith.constant 0 : i32
    %c0_i32_1 = arith.constant 0 : i32
    return %c0_i32, %c0_i32_0 : i32, i32
  }
  func.func @transform_13(%arg0: i32) -> (i32, i32) {
    %c0_i32 = arith.constant 0 : i32
    %c0_i32_0 = arith.constant 0 : i32
    %c0_i32_1 = arith.constant 0 : i32
    return %c0_i32, %c0_i32_0 : i32, i32
  }
  func.func @transform_14(%arg0: i32) -> (i32, i32) {
    %c0_i32 = arith.constant 0 : i32
    %c0_i32_0 = arith.constant 0 : i32
    %c0_i32_1 = arith.constant 0 : i32
    return %c0_i32, %c0_i32_0 : i32, i32
  }
  func.func @transform_15(%arg0: i32) -> (i32, i32) {
    %c0_i32 = arith.constant 0 : i32
    %c0_i32_0 = arith.constant 0 : i32
    return %c0_i32, %arg0 : i32, i32
  }
}

</mosaic_0001>

<bundles_post_ra>
// kernel: tpu_custom_call.1
= control target key start
LH: loop header
LB: loop body
LE: loop exit
PB: predicated region body
PF: predicated region fallthrough
CT: control target
= control target key end

     0   :  { %s8389_s0 = inlined_call_operand.vmem [shape: f32[64,256], index: 0, kind: input, shape index: {}]   ;;  %s8390_s1 = inlined_call_operand.vmem [shape: f32[12,64,32], index: 1, kind: input, shape index: {}]   ;;  %s8391_s2 = inlined_call_operand.vmem [shape: f32[1,128], index: 2, kind: input, shape index: {}]   ;;  %s8392_s3 = inlined_call_operand.vmem [shape: f32[1,128], index: 3, kind: input, shape index: {}]   ;;  %s8393_s4 = inlined_call_operand.vmem [shape: bf16[12,128,32], index: 4, kind: input, shape index: {}]   ;;  %s8394_s5 = inlined_call_operand.vmem [shape: bf16[128,128], index: 5, kind: input, shape index: {}]   ;;  %s8395_s6 = inlined_call_operand.vmem [shape: f32[1,128], index: 6, kind: input, shape index: {}]   ;;  %s8396_s7 = inlined_call_operand.vmem [shape: f32[1,128], index: 7, kind: input, shape index: {}]   ;;  %s8397_s8 = inlined_call_operand.vmem [shape: f32[1,128], index: 8, kind: input, shape index: {}]   ;;  %s8398_s9 = inlined_call_operand.vmem [shape: f32[1,128], index: 9, kind: input, shape index: {}]   ;;  %s8399_s10 = inlined_call_operand.vmem [shape: f32[1,128], index: 10, kind: input, shape index: {}]   ;;  %s8400_s11 = inlined_call_operand.vmem [shape: bf16[128,256], index: 11, kind: input, shape index: {}]   ;;  %s8401_s12 = inlined_call_operand.vmem [shape: f32[1,256], index: 12, kind: input, shape index: {}]   ;;  %s8402_s13 = inlined_call_operand.vmem [shape: bf16[256,128], index: 13, kind: input, shape index: {}]   ;;  %s8403_s14 = inlined_call_operand.vmem [shape: f32[1,128], index: 14, kind: input, shape index: {}]   ;;  %s8404_s15 = inlined_call_operand.hbm [shape: f32[64,256], index: 15, kind: output, shape index: {}]  }
   0x1   :  { %8413 = sst [smem:[#allocation25_spill]] %s8389_s0 }
   0x2   :  { %8414 = sst [smem:[#allocation26_spill]] %s8390_s1 }
   0x3   :  { %8415 = sst [smem:[#allocation27_spill]] %s8391_s2 }
   0x4   :  { %20 = vsyncpa [#allocation4], 0 }
   0x5   :  { %22 = vsyncpa [#allocation4 + $0x1], 0  ;;  %s5876_s18 = smov 0   ;;  %s5878_s19 = smov 0  }
   0x6   :  { %s5880_s20 = smov 0   ;;  %s5882_s21 = smov 0  }
   0x7 LB: > { %8416 = sst [smem:[#allocation6_spill]] %s5783_s20  ;;  %s8405_s22 = sadd.s32 4294967295, %s5787_s21   ;;  %s5787_s21 = sphi %s5882_s21, %s8506_s21   ;;  %s5783_s20 = sphi %s5880_s20, %s8508_s20   ;;  %s5779_s19 = sphi %s5878_s19, %s8510_s19   ;;  %s5775_s18 = sphi %s5876_s18, %s8509_s18  }
   0x8   : > { %s4685_s23 = sadd.s32 4294967294, %s5787_s21   ;;  %s5899_s24 = sadd.s32 1, %s5787_s21  }
   0x9   : > { %8417 = sst [smem:[#allocation7_spill]] %s5899_s24  ;;  %s35_s25 = sadd.s32 1, %s5783_s20 }
   0xa   : > { %s32_s26 = ssub.s32 %s5787_s21, %s5899_s24  ;;  %p42_p0 = scmp.ne.s32.totalorder %s5783_s20, %s5779_s19 }
   0xb   : > { %p33_p1 = scmp.eq.s32.totalorder %s32_s26, 0  ;;  %p43_p2 = scmp.eq.s32.totalorder %s5787_s21, 0 }
   0xc   : > { %p366_p3 = scmp.eq.s32.totalorder %s8405_s22, 1  ;;  %p371_p4 = scmp.ne.s32.totalorder %s5779_s19, %s5775_s18 }
   0xd   : > { %s5912_s27 = scalar_select %p33_p1, %s5783_s20, %s35_s25  }
   0xe   : > { %p44_p5 = por %p43_p2, %p42_p0  ;;  %p5914_p6 = por %p366_p3, %p42_p0 }
   0xf   : > { %8418 = sst [smem:[#allocation8_spill]] %s5912_s27  ;;  %p372_p7 = scmp.eq.s32.totalorder %s4685_s23, 1 }
  0x10   : > { %p4687_p9 = scmp.ge.s32.totalorder %s5787_s21, 2 }
  0x11   : > { %p5918_p8 = por %p372_p7, %p371_p4 }
  0x12   : > { %430 = sbr.rel (%p4687_p9) target bundleno = 41 (0x29), region = 72 }
  0x13   : > { %s8420_s29 = scalar_select %p5918_p8, 1, 0 }
  0x15   : > { %8421 = sst [smem:[#allocation9_spill]] %s8420_s29 }
  0x17   : > { %433 = sbr.rel (!%p44_p5) target bundleno = 41 (0x29), region = 76  ;;  %s435_s30 = sand.u32 (%p44_p5), 1, %s5783_s20  }
  0x18   : > { %s4689_s16 = sshll.u32 (%p44_p5), %s5787_s21, 3  ;;  %s4688_s17 = sshll.u32 (%p44_p5), %s435_s30, 6 }
  0x19   : > { %s8422_s0 = sld [smem:[#allocation25_spill]] (%p44_p5)  ;;  %s437_s23 = scalar_lea.vmem (%p44_p5), [#allocation2], %s4688_s17 }
  0x1f   : > { %s439_s22 = scalar_lea.vmem %s8422_s0, %s4689_s16 }
  0x20   : > { %v482_v0 = vld [vmem:[%s439_s22] sm:$0xff]  ;;  %v484_v1 = vld [vmem:[%s439_s22 + $0x10] sm:$0xff] }
  0x21   : > { %v486_v2 = vld [vmem:[%s439_s22 + $0x20] sm:$0xff]  ;;  %483 = vst [vmem:[%s437_s23] sm:$0xff] %v482_v0  ;;  %v488_v3 = vld [vmem:[%s439_s22 + $0x30] sm:$0xff] }
  0x22   : > { %485 = vst [vmem:[%s437_s23 + $0x8] sm:$0xff] %v484_v1  ;;  %v490_v4 = vld [vmem:[%s439_s22 + $0x40] sm:$0xff]  ;;  %v492_v5 = vld [vmem:[%s439_s22 + $0x50] sm:$0xff] }
  0x23   : > { %487 = vst [vmem:[%s437_s23 + $0x10] sm:$0xff] %v486_v2  ;;  %v494_v6 = vld [vmem:[%s439_s22 + $0x60] sm:$0xff]  ;;  %v496_v7 = vld [vmem:[%s439_s22 + $0x70] sm:$0xff] }
  0x24   : > { %489 = vst [vmem:[%s437_s23 + $0x18] sm:$0xff] %v488_v3 }
  0x25   : > { %491 = vst [vmem:[%s437_s23 + $0x20] sm:$0xff] %v490_v4 }
  0x26   : > { %493 = vst [vmem:[%s437_s23 + $0x28] sm:$0xff] %v492_v5 }
  0x27   : > { %495 = vst [vmem:[%s437_s23 + $0x30] sm:$0xff] %v494_v6 }
  0x28   : > { %497 = vst [vmem:[%s437_s23 + $0x38] sm:$0xff] %v496_v7 }
  0x29 PF: > { %p4690_p10 = scmp.ge.s32.totalorder %s5787_s21, 1  ;;  %p502_p11 = scmp.lt.s32.totalorder %s5787_s21, 3 }
  0x2b   : > { %p503_p12 = pnand %p4690_p10, %p502_p11 }
  0x2d   : > { %506 = sbr.rel (%p503_p12) target bundleno = 2477 (0x9ad), region = 114 }
  0x32   : > { %s8406_s30 = sand.u32 1, %s5779_s19   ;;  %v5789_v15 = vmov 128.0   ;;  %v5280_v51 = vld [vmem:[%s8393_s4 + $0x38] sm:$0xff]  ;;  %v5279_v52 = vld [vmem:[%s8393_s4 + $0x30] sm:$0xff]  ;;  %v5278_v53 = vld [vmem:[%s8393_s4 + $0x28] sm:$0xff]  ;;  %s8424_s2 = sld [smem:[#allocation27_spill]] }
  0x33   : > { %s5935_s16 = sshll.u32 %s8406_s30, 6  ;;  %5539 = vrcp.f32 %v5789_v15  ;;  %5409 = vmatpush.bf16.msra.mxu1 %v5280_v51  ;;  %1124 = vmatpush.bf16.msra.mxu0 %v5280_v51  ;;  %v5277_v54 = vld [vmem:[%s8393_s4 + $0x20] sm:$0xff]  ;;  %v5276_v55 = vld [vmem:[%s8393_s4 + $0x18] sm:$0xff]  ;;  %v5275_v60 = vld [vmem:[%s8393_s4 + $0x10] sm:$0xff]  ;;  %s8445_s1 = sld [smem:[#allocation26_spill]] }
  0x34   : > { %s5938_s17 = scalar_lea.vmem [#allocation2], %s5935_s16  ;;  %v5296_v56 = vld [vmem:[%s8393_s4 + $0xb8] sm:$0xff]  ;;  %v5295_v61 = vld [vmem:[%s8393_s4 + $0xb0] sm:$0xff]  ;;  %v5274_v0 = vld [vmem:[%s8393_s4 + $0x8] sm:$0xff]  ;;  %s5790_s22 = smov 32  }
  0x35   : > { %v563_v8 = vld [vmem:[%s5938_s17 + $0x30] sm:$0xff]  ;;  %v561_v9 = vld [vmem:[%s5938_s17 + $0x20] sm:$0xff]  ;;  %v564_v11 = vld [vmem:[%s5938_s17 + $0x38] sm:$0xff]  ;;  %1278 = vmatpush.bf16.msra.mxu2 %v5296_v56  ;;  %s5791_s25 = smov 64   ;;  %s5792_s24 = smov 96  }
  0x36   : > { %v557_v10 = vld [vmem:[%s5938_s17] sm:$0xff]  ;;  %579 = vadd.xlane.f32.xlu1 %v563_v8  ;;  %575 = vadd.xlane.f32.xlu0 %v561_v9  ;;  %v562_v12 = vld [vmem:[%s5938_s17 + $0x28] sm:$0xff]  ;;  %v559_v14 = vld [vmem:[%s5938_s17 + $0x10] sm:$0xff]  ;;  %s8336_s30 = scalar_lea.vmem [#allocation3], %s5935_s16  ;;  %s8503_s16 = sadd.s32 4294967295, %s5787_s21  }
  0x37   : > { %567 = vadd.xlane.f32.xlu2 %v557_v10  ;;  %v558_v13 = vld [vmem:[%s5938_s17 + $0x8] sm:$0xff]  ;;  %v5963_v37 = vld [vmem:[%s5938_s17 + $0x18] sm:$0xff]  ;;  %5410 = vmatpush.bf16.msra.mxu1 %v5279_v52  ;;  %v5303_v62 = vld [vmem:[%s8393_s4 + $0xf0] sm:$0xff]  ;;  %s4614_s23 = sshll.u32 %s8336_s30, 4  ;;  %s8504_s0 = sand.u32 1, %s5779_s19   ;;  %s4615_s23 = int_to_ptr.vmem [resolvable:$true] %s4614_s23 }
  0x38   : > { %1125 = vmatpush.bf16.msra.mxu0 %v5279_v52  ;;  %v5304_v57 = vld [vmem:[%s8393_s4 + $0xf8] sm:$0xff]  ;;  %v5294_v1 = vld [vmem:[%s8393_s4 + $0xa8] sm:$0xff]  ;;  %s4603_s20 = scalar_lea.sflag [#allocation4], %s8504_s0 }
  0x39   : > { %v5540_v16 = vpop.eup %5539  ;;  %1355 = vmatpush.bf16.msra.mxu3 %v5304_v57  ;;  %1279 = vmatpush.bf16.msra.mxu2 %v5295_v61  ;;  %v5302_v2 = vld [vmem:[%s8393_s4 + $0xe8] sm:$0xff] }
  0x3a   : > { %v584_v17 = vmul.f32 128.0, %v5540_v16  ;;  %vm588_vm0 = vweird.f32 %v5540_v16  ;;  %v5298_v51 = vld [vmem:[%s8393_s4 + $0xc8] sm:$0xff] }
  0x3b   : > { %5411 = vmatpush.bf16.msra.mxu1 %v5278_v53 }
  0x3c   : > { %v585_v18 = vsub.f32 1.0, %v584_v17  ;;  %1126 = vmatpush.bf16.msra.mxu0 %v5278_v53 }
  0x3d   : > { %1356 = vmatpush.bf16.msra.mxu3 %v5303_v62  ;;  %1280 = vmatpush.bf16.msra.mxu2 %v5294_v1 }
  0x3e   : > { %581 = vadd.xlane.f32.xlu1 %v564_v11  ;;  %577 = vadd.xlane.f32.xlu0 %v562_v12  ;;  %v586_v19 = vmul.f32 %v5540_v16, %v585_v18  ;;  %v5288_v18 = vld [vmem:[%s8393_s4 + $0x78] sm:$0xff] }
  0x3f   : > { %569 = vadd.xlane.f32.xlu2 %v558_v13  ;;  %5412 = vmatpush.bf16.msra.mxu1 %v5277_v54 }
  0x40   : > { %v587_v20 = vadd.f32 %v5540_v16, %v586_v19  ;;  %1127 = vmatpush.bf16.msra.mxu0 %v5277_v54  ;;  %v5292_v19 = vld [vmem:[%s8393_s4 + $0x98] sm:$0xff] }
  0x41   : > { %1357 = vmatpush.bf16.msra.mxu3 %v5302_v2 }
  0x42   : > { %v5947_v21 = vsel %vm588_vm0, %v5540_v16, %v587_v20 }
  0x43   : > { %8423 = vst [vmem:[#allocation10_spill] sm:$0xff] %v5947_v21  ;;  %5413 = vmatpush.bf16.msra.mxu1 %v5276_v55 }
  0x44   : > { %1128 = vmatpush.bf16.msra.mxu0 %v5276_v55 }
  0x47   : > { %571 = vadd.xlane.f32.xlu2 %v559_v14  ;;  %5414 = vmatpush.bf16.msra.mxu1 %v5275_v60 }
  0x48   : > { %1129 = vmatpush.bf16.msra.mxu0 %v5275_v60  ;;  %v6112_v60 = vld [vmem:[%s8392_s3] ss:$0 sm:$0xff] }
  0x4b   : > { %5415 = vmatpush.bf16.msra.mxu1 %v5274_v0 }
  0x4c   : > { %1130 = vmatpush.bf16.msra.mxu0 %v5274_v0 }
  0xa9   : > { %v580_v22 = vpop.xlane.xlu1 %579  ;;  %v576_v23 = vpop.xlane.xlu0 %575 }
  0xaa   : > { %v594_v24 = vmul.f32 %v5947_v21, %v576_v23  ;;  %v568_v25 = vpop.xlane.xlu2 %567  ;;  %v596_v33 = vmul.f32 %v5947_v21, %v580_v22  ;;  %v5300_v22 = vld [vmem:[%s8393_s4 + $0xd8] sm:$0xff] }
  0xab   : > { %v590_v34 = vmul.f32 %v5947_v21, %v568_v25 }
  0xac   : > { %v5950_v26 = vsub.f32 %v561_v9, %v594_v24  ;;  %v5969_v40 = vsub.f32 %v563_v8, %v596_v33  ;;  %v5273_v8 = vld [vmem:[%s8393_s4] sm:$0xff] }
  0xad   : > { %v5971_v41 = vsub.f32 %v557_v10, %v590_v34  ;;  %v5293_v9 = vld [vmem:[%s8393_s4 + $0xa0] sm:$0xff]  ;;  %5416 = vmatpush.bf16.msra.mxu1 %v5273_v8  ;;  %1131 = vmatpush.bf16.msra.mxu0 %v5273_v8 }
  0xae   : > { %v610_v27 = vmul.f32 %v5950_v26, %v5950_v26  ;;  %v612_v45 = vmul.f32 %v5969_v40, %v5969_v40  ;;  %v5301_v10 = vld [vmem:[%s8393_s4 + $0xe0] sm:$0xff]  ;;  %1281 = vmatpush.bf16.msra.mxu2 %v5293_v9 }
  0xaf   : > { %v606_v46 = vmul.f32 %v5971_v41, %v5971_v41  ;;  %1358 = vmatpush.bf16.msra.mxu3 %v5301_v10  ;;  %v5284_v10 = vld [vmem:[%s8393_s4 + $0x58] sm:$0xff] }
  0xb0   : > { %622 = vadd.xlane.f32.xlu0 %v610_v27 }
  0xb1   : > { %v582_v28 = vpop.xlane.xlu1 %581  ;;  %v578_v29 = vpop.xlane.xlu0 %577  ;;  %1201 = vmatpush.bf16.msrb.mxu1 %v5288_v18 }
  0xb2   : > { %v597_v30 = vmul.f32 %v5947_v21, %v582_v28  ;;  %v595_v31 = vmul.f32 %v5947_v21, %v578_v29  ;;  %v570_v32 = vpop.xlane.xlu2 %569  ;;  %1282 = vmatpush.bf16.msra.mxu2 %v5292_v19  ;;  %v5287_v29 = vld [vmem:[%s8393_s4 + $0x70] sm:$0xff] }
  0xb3   : > { %v591_v44 = vmul.f32 %v5947_v21, %v570_v32  ;;  %1359 = vmatpush.bf16.msra.mxu3 %v5300_v22 }
  0xb4   : > { %v5958_v35 = vsub.f32 %v564_v11, %v597_v30  ;;  %v5960_v36 = vsub.f32 %v562_v12, %v595_v31  ;;  %v5291_v30 = vld [vmem:[%s8393_s4 + $0x90] sm:$0xff] }
  0xb5   : > { %v5984_v49 = vsub.f32 %v558_v13, %v591_v44  ;;  %v5299_v31 = vld [vmem:[%s8393_s4 + $0xd0] sm:$0xff]  ;;  %1202 = vmatpush.bf16.msrb.mxu1 %v5287_v29  ;;  %v5286_v44 = vld [vmem:[%s8393_s4 + $0x68] sm:$0xff] }
  0xb6   : > { %v611_v38 = vmul.f32 %v5960_v36, %v5960_v36  ;;  %v613_v39 = vmul.f32 %v5958_v35, %v5958_v35  ;;  %1283 = vmatpush.bf16.msra.mxu2 %v5291_v30 }
  0xb7   : > { %v607_v50 = vmul.f32 %v5984_v49, %v5984_v49  ;;  %1360 = vmatpush.bf16.msra.mxu3 %v5299_v31 }
  0xb8   : > { %624 = vadd.xlane.f32.xlu1 %v611_v38  ;;  %573 = vadd.xlane.f32.xlu0 %v5963_v37 }
  0xb9   : > { %628 = vadd.xlane.f32.xlu2 %v613_v39  ;;  %1203 = vmatpush.bf16.msrb.mxu1 %v5286_v44 }
  0xba   : > { %v572_v42 = vpop.xlane.xlu2 %571 }
  0xbb   : > { %v592_v43 = vmul.f32 %v5947_v21, %v572_v42  ;;  %1361 = vmatpush.bf16.msra.mxu3 %v5298_v51 }
  0xbd   : > { %v5980_v47 = vsub.f32 %v559_v14, %v592_v43 }
  0xbf   : > { %v608_v48 = vmul.f32 %v5980_v47, %v5980_v47 }
  0xc0   : > { %626 = vadd.xlane.f32.xlu1 %v612_v45  ;;  %614 = vadd.xlane.f32.xlu0 %v606_v46  ;;  %v5290_v45 = vld [vmem:[%s8393_s4 + $0x88] sm:$0xff]  ;;  %v6090_v46 = vld [vmem:[%s8424_s2] ss:$0 sm:$0xff] }
  0xc1   : > { %618 = vadd.xlane.f32.xlu2 %v608_v48  ;;  %1284 = vmatpush.bf16.msra.mxu2 %v5290_v45 }
  0xc8   : > { %616 = vadd.xlane.f32.xlu1 %v607_v50 }
 0x123   : > { %v623_v58 = vpop.xlane.xlu0 %622 }
 0x124   : > { %v634_v59 = vmul.f32 %v623_v58, %v5947_v21  ;;  %v5285_v58 = vld [vmem:[%s8393_s4 + $0x60] sm:$0xff] }
 0x125   : > { %1204 = vmatpush.bf16.msrb.mxu1 %v5285_v58 }
 0x126   : > { %v642_v63 = vadd.f32 1e-05, %v634_v59  ;;  %v5297_v59 = vld [vmem:[%s8393_s4 + $0xc0] sm:$0xff] }
 0x127   : > { %1362 = vmatpush.bf16.msra.mxu3 %v5297_v59 }
 0x128   : > { %5541 = vrsqrt.f32 %v642_v63  ;;  %vm692_vm2 = vweird.f32 %v642_v63 }
 0x129   : > { %1205 = vmatpush.bf16.msrb.mxu1 %v5284_v10 }
 0x12b   : > { %v625_v3 = vpop.xlane.xlu1 %624  ;;  %v574_v4 = vpop.xlane.xlu0 %573 }
 0x12c   : > { %v635_v5 = vmul.f32 %v625_v3, %v5947_v21  ;;  %v593_v6 = vmul.f32 %v5947_v21, %v574_v4  ;;  %v629_v7 = vpop.xlane.xlu2 %628 }
 0x12d   : > { %v637_v11 = vmul.f32 %v629_v7, %v5947_v21 }
 0x12e   : > { %v5542_v12 = vpop.eup %5541  ;;  %v6040_v13 = vadd.f32 1e-05, %v635_v5  ;;  %v6043_v14 = vsub.f32 %v5963_v37, %v593_v6 }
 0x12f   : > { %v687_v15 = vmul.f32 %v5542_v12, %v642_v63  ;;  %v6045_v16 = vadd.f32 1e-05, %v637_v11  ;;  %vm693_vm1 = vweird.f32 %v5542_v12 }
 0x130   : > { %5543 = vrsqrt.f32 %v6040_v13  ;;  %v609_v17 = vmul.f32 %v6043_v14, %v6043_v14  ;;  %vm694_vm3 = vmor %vm692_vm2, %vm693_vm1  ;;  %vm702_vm4 = vweird.f32 %v6040_v13 }
 0x131   : > { %v688_v20 = vmul.f32 %v5542_v12, %v687_v15  ;;  %5545 = vrsqrt.f32 %v6045_v16  ;;  %vm722_vm7 = vweird.f32 %v6045_v16 }
 0x132   : > { %620 = vadd.xlane.f32.xlu0 %v609_v17  ;;  %v5283_v17 = vld [vmem:[%s8393_s4 + $0x50] sm:$0xff] }
 0x133   : > { %v689_v23 = vmul.f32 0.5, %v688_v20  ;;  %v627_v24 = vpop.xlane.xlu1 %626  ;;  %v615_v25 = vpop.xlane.xlu0 %614  ;;  %1206 = vmatpush.bf16.msrb.mxu1 %v5283_v17 }
 0x134   : > { %v636_v27 = vmul.f32 %v627_v24, %v5947_v21  ;;  %v630_v28 = vmul.f32 %v615_v25, %v5947_v21 }
 0x135   : > { %v690_v32 = vsub.f32 1.5, %v689_v23 }
 0x136   : > { %v5544_v33 = vpop.eup %5543  ;;  %v6071_v34 = vadd.f32 1e-05, %v636_v27  ;;  %v6073_v37 = vadd.f32 1e-05, %v630_v28  ;;  %v5282_v28 = vld [vmem:[%s8393_s4 + $0x48] sm:$0xff] }
 0x137   : > { %v6075_v38 = vpop.eup %5545  ;;  %v691_v39 = vmul.f32 %v5542_v12, %v690_v32  ;;  %v697_v42 = vmul.f32 %v5544_v33, %v6040_v13  ;;  %vm703_vm5 = vweird.f32 %v5544_v33  ;;  %1207 = vmatpush.bf16.msrb.mxu1 %v5282_v28  ;;  %v5306_v28 = vld [vmem:[%s8393_s4 + $0x108] sm:$0xff] }
 0x138   : > { %v717_v43 = vmul.f32 %v6075_v38, %v6045_v16  ;;  %5547 = vrsqrt.f32 %v6071_v34  ;;  %vm6115_vm6 = vmor %vm702_vm4, %vm703_vm5  ;;  %vm723_vm8 = vweird.f32 %v6075_v38  ;;  %vm712_vm10 = vweird.f32 %v6071_v34 }
 0x139   : > { %v695_v48 = vsel %vm694_vm3, %v5542_v12, %v691_v39  ;;  %v698_v50 = vmul.f32 %v5544_v33, %v697_v42  ;;  %5549 = vrsqrt.f32 %v6073_v37  ;;  %vm6131_vm9 = vmor %vm722_vm7, %vm723_vm8  ;;  %vm652_vm12 = vweird.f32 %v6073_v37 }
 0x13a   : > { %v730_v52 = vmul.f32 %v695_v48, %v5950_v26  ;;  %v718_v53 = vmul.f32 %v6075_v38, %v717_v43  ;;  %v5289_v26 = vld [vmem:[%s8393_s4 + $0x80] sm:$0xff] }
 0x13b   : > { %v699_v54 = vmul.f32 0.5, %v698_v50  ;;  %v617_v55 = vpop.xlane.xlu1 %616  ;;  %1285 = vmatpush.bf16.msra.mxu2 %v5289_v26  ;;  %v5281_v43 = vld [vmem:[%s8393_s4 + $0x40] sm:$0xff] }
 0x13c   : > { %v719_v56 = vmul.f32 0.5, %v718_v53  ;;  %v631_v57 = vmul.f32 %v617_v55, %v5947_v21  ;;  %v741_v61 = vmul.f32 %v6090_v46, %v730_v52  ;;  %1208 = vmatpush.bf16.msrb.mxu1 %v5281_v43 }
 0x13d   : > { %v700_v62 = vsub.f32 1.5, %v699_v54 }
 0x13e   : > { %v5548_v63 = vpop.eup %5547  ;;  %v720_v1 = vsub.f32 1.5, %v719_v56  ;;  %v639_v5 = vadd.f32 1e-05, %v631_v57  ;;  %v752_v7 = vadd.f32 %v6112_v60, %v741_v61 }
 0x13f   : > { %v5550_v2 = vpop.eup %5549  ;;  %v701_v3 = vmul.f32 %v5544_v33, %v700_v62  ;;  %v707_v4 = vmul.f32 %v5548_v63, %v6071_v34  ;;  %vm713_vm11 = vweird.f32 %v5548_v63 }
 0x140   : > { %v647_v6 = vmul.f32 %v5550_v2, %v6073_v37  ;;  %v721_v12 = vmul.f32 %v6075_v38, %v720_v1  ;;  %5551 = vrsqrt.f32 %v639_v5  ;;  %vm653_vm13 = vweird.f32 %v5550_v2  ;;  %vm714_vm14 = vmor %vm712_vm10, %vm713_vm11 }
 0x141   : > { %v705_v8 = vsel %vm6115_vm6, %v5544_v33, %v701_v3  ;;  %v708_v9 = vmul.f32 %v5548_v63, %v707_v4  ;;  %v760_v19 = vpack.c.bf16 %v752_v7, %v752_v7  ;;  %vm6145_vm15 = vmor %vm652_vm12, %vm653_vm13  ;;  %vm662_vm0 = vweird.f32 %v639_v5 }
 0x142   : > { %v731_v11 = vmul.f32 %v705_v8, %v5960_v36  ;;  %v648_v13 = vmul.f32 %v5550_v2, %v647_v6  ;;  %v725_v23 = vsel %vm6131_vm9, %v6075_v38, %v721_v12  ;;  %vm2136_vm9 = vcmask 261120  }
 0x143   : > { %v709_v16 = vmul.f32 0.5, %v708_v9  ;;  %v1064_v32 = vunpack.c.l.b16 %v760_v19  ;;  %v733_v33 = vmul.f32 %v725_v23, %v5958_v35  ;;  %v5312_v9 = vld [vmem:[%s8393_s4 + $0x138] sm:$0xff]  ;;  %v5307_v23 = vld [vmem:[%s8393_s4 + $0x110] sm:$0xff]  ;;  %vm2469_vm10 = vcmask 523264  }
 0x144   : > { %v742_v18 = vmul.f32 %v6090_v46, %v731_v11  ;;  %v649_v36 = vmul.f32 0.5, %v648_v13  ;;  %1432 = vmatpush.bf16.msrb.mxu0 %v5312_v9  ;;  %v5311_v11 = vld [vmem:[%s8393_s4 + $0x130] sm:$0xff]  ;;  %v5310_v13 = vld [vmem:[%s8393_s4 + $0x128] sm:$0xff] }
 0x145   : > { %v710_v20 = vsub.f32 1.5, %v709_v16  ;;  %v744_v50 = vmul.f32 %v6090_v46, %v733_v33  ;;  %v5305_v33 = vld [vmem:[%s8393_s4 + $0x100] sm:$0xff]  ;;  %v5343_v9 = vld [vmem:[%s8393_s4 + $0x230] sm:$0xff] }
 0x146   : > { %v753_v22 = vadd.f32 %v6112_v60, %v742_v18  ;;  %v650_v24 = vsub.f32 1.5, %v649_v36  ;;  %v5552_v31 = vpop.eup %5551  ;;  %v5309_v18 = vld [vmem:[%s8393_s4 + $0x120] sm:$0xff] }
 0x147   : > { %v711_v25 = vmul.f32 %v5548_v63, %v710_v20  ;;  %v657_v42 = vmul.f32 %v5552_v31, %v639_v5  ;;  %vm663_vm1 = vweird.f32 %v5552_v31  ;;  %v755_v54 = vadd.f32 %v6112_v60, %v744_v50  ;;  %v5308_v20 = vld [vmem:[%s8393_s4 + $0x118] sm:$0xff]  ;;  %v5327_v50 = vld [vmem:[%s8393_s4 + $0x1b0] sm:$0xff] }
 0x148   : > { %v761_v29 = vpack.c.bf16 %v753_v22, %v753_v22  ;;  %v651_v30 = vmul.f32 %v5550_v2, %v650_v24  ;;  %vm664_vm2 = vmor %vm662_vm0, %vm663_vm1  ;;  %1433 = vmatpush.bf16.msrb.mxu0 %v5311_v11  ;;  %v5341_v11 = vld [vmem:[%s8393_s4 + $0x220] sm:$0xff] }
 0x149   : > { %v715_v34 = vsel %vm714_vm14, %v5548_v63, %v711_v25  ;;  %v658_v48 = vmul.f32 %v5552_v31, %v657_v42  ;;  %v763_v26 = vpack.c.bf16 %v755_v54, %v755_v54 }
 0x14a   : > { %v1065_v37 = vunpack.c.l.b16 %v761_v29  ;;  %v732_v38 = vmul.f32 %v715_v34, %v5969_v40  ;;  %v655_v39 = vsel %vm6145_vm15, %v5550_v2, %v651_v30 }
 0x14b   : > { %v726_v35 = vmul.f32 %v655_v39, %v5971_v41  ;;  %v659_v51 = vmul.f32 0.5, %v658_v48  ;;  %v1067_v0 = vunpack.c.l.b16 %v763_v26  ;;  %v5336_v39 = vld [vmem:[%s8393_s4 + $0x1f8] sm:$0xff] }
 0x14c   : > { %v6159_v44 = vpack.c.b16 %v1065_v37, %v1064_v32  ;;  %v743_v45 = vmul.f32 %v6090_v46, %v732_v38  ;;  %1434 = vmatpush.bf16.msrb.mxu0 %v5310_v13  ;;  %v5320_v38 = vld [vmem:[%s8393_s4 + $0x178] sm:$0xff]  ;;  %1663 = vmatpush.bf16.msrb.mxu3 %v5336_v39  ;;  %v5339_v13 = vld [vmem:[%s8393_s4 + $0x210] sm:$0xff]  ;;  %v5354_v39 = vld [vmem:[%s8393_s4 + $0x288] sm:$0xff] }
 0x14d   : > { %v660_v52 = vsub.f32 1.5, %v659_v51  ;;  %v737_v53 = vmul.f32 %v6090_v46, %v726_v35  ;;  %v5319_v35 = vld [vmem:[%s8393_s4 + $0x170] sm:$0xff]  ;;  %v5316_v26 = vld [vmem:[%s8393_s4 + $0x158] sm:$0xff] }
 0x14e   : > { %1142 = vmatmul.bf16.vlgmr.msra.gmra.mxu1 %v6159_v44  ;;  %v754_v40 = vadd.f32 %v6112_v60, %v743_v45 }
 0x14f   : > { %v661_v55 = vmul.f32 %v5552_v31, %v660_v52  ;;  %v748_v41 = vadd.f32 %v6112_v60, %v737_v53  ;;  %1509 = vmatpush.bf16.msra.mxu1 %v5320_v38  ;;  %v5326_v53 = vld [vmem:[%s8393_s4 + $0x1a8] sm:$0xff]  ;;  %v5363_v38 = vld [vmem:[%s8393_s4 + $0x2d0] sm:$0xff] }
 0x150   : > { %v762_v56 = vpack.c.bf16 %v754_v40, %v754_v40  ;;  %1435 = vmatpush.bf16.msrb.mxu0 %v5309_v18  ;;  %v5360_v18 = vld [vmem:[%s8393_s4 + $0x2b8] sm:$0xff] }
 0x151   : > { %v665_v57 = vsel %vm664_vm2, %v5552_v31, %v661_v55  ;;  %v756_v62 = vpack.c.bf16 %v748_v41, %v748_v41  ;;  %v5325_v41 = vld [vmem:[%s8393_s4 + $0x1a0] sm:$0xff] }
 0x152   : > { %v727_v58 = vmul.f32 %v665_v57, %v5984_v49  ;;  %v1066_v61 = vunpack.c.l.b16 %v762_v56  ;;  %v619_v49 = vpop.xlane.xlu2 %618  ;;  %v5317_v57 = vld [vmem:[%s8393_s4 + $0x160] sm:$0xff] }
 0x153   : > { %v1060_v3 = vunpack.c.l.b16 %v756_v62  ;;  %v632_v6 = vmul.f32 %v619_v49, %v5947_v21  ;;  %1510 = vmatpush.bf16.msra.mxu1 %v5319_v35  ;;  %v5315_v62 = vld [vmem:[%s8393_s4 + $0x150] sm:$0xff]  ;;  %v5313_v49 = vld [vmem:[%s8393_s4 + $0x140] sm:$0xff] }
 0x154   : > { %v738_v59 = vmul.f32 %v6090_v46, %v727_v58  ;;  %v6172_v2 = vpack.c.b16 %v1067_v0, %v1066_v61  ;;  %1436 = vmatpush.bf16.msrb.mxu0 %v5308_v20  ;;  %v5333_v58 = vld [vmem:[%s8393_s4 + $0x1e0] sm:$0xff]  ;;  %v5332_v61 = vld [vmem:[%s8393_s4 + $0x1d8] sm:$0xff]  ;;  %v5331_v0 = vld [vmem:[%s8393_s4 + $0x1d0] sm:$0xff] }
 0x155   : > { %v640_v7 = vadd.f32 1e-05, %v632_v6  ;;  %v5321_v6 = vld [vmem:[%s8393_s4 + $0x180] sm:$0xff]  ;;  %v5359_v20 = vld [vmem:[%s8393_s4 + $0x2b0] sm:$0xff] }
 0x156   : > { %v749_v63 = vadd.f32 %v6112_v60, %v738_v59  ;;  %v5324_v59 = vld [vmem:[%s8393_s4 + $0x198] sm:$0xff]  ;;  %v5361_v35 = vld [vmem:[%s8393_s4 + $0x2c0] sm:$0xff] }
 0x157   : > { %5553 = vrsqrt.f32 %v640_v7  ;;  %vm672_vm3 = vweird.f32 %v640_v7 }
 0x158   : > { %v757_v1 = vpack.c.bf16 %v749_v63, %v749_v63  ;;  %1437 = vmatpush.bf16.msrb.mxu0 %v5307_v23  ;;  %v5323_v63 = vld [vmem:[%s8393_s4 + $0x190] sm:$0xff]  ;;  %v5350_v23 = vld [vmem:[%s8393_s4 + $0x268] sm:$0xff] }
 0x15a   : > { %v1061_v4 = vunpack.c.l.b16 %v757_v1  ;;  %v5314_v1 = vld [vmem:[%s8393_s4 + $0x148] sm:$0xff] }
 0x15c   : > { %v6175_v5 = vpack.c.b16 %v1061_v4, %v1060_v3  ;;  %1438 = vmatpush.bf16.msrb.mxu0 %v5306_v28  ;;  %v5322_v3 = vld [vmem:[%s8393_s4 + $0x188] sm:$0xff]  ;;  %v5357_v28 = vld [vmem:[%s8393_s4 + $0x2a0] sm:$0xff] }
 0x15d   : > { %v5554_v8 = vpop.eup %5553  ;;  %v5330_v4 = vld [vmem:[%s8393_s4 + $0x1c8] sm:$0xff] }
 0x15e   : > { %1147 = vmatmul.bf16.gmra.mxu1 %v6172_v2  ;;  %1132 = vmatmul.bf16.vlgmr.msra.gmra.mxu0 %v6175_v5  ;;  %v667_v10 = vmul.f32 %v5554_v8, %v640_v7  ;;  %vm673_vm4 = vweird.f32 %v5554_v8  ;;  %v5329_v7 = vld [vmem:[%s8393_s4 + $0x1c0] sm:$0xff] }
 0x15f   : > { %1286 = vmatmul.bf16.vlgmr.msra.gmra.mxu2 %v6175_v5  ;;  %1363 = vmatmul.bf16.vlgmr.msra.gmra.mxu3 %v6175_v5  ;;  %vm674_vm5 = vmor %vm672_vm3, %vm673_vm4 }
 0x160   : > { %v668_v12 = vmul.f32 %v5554_v8, %v667_v10  ;;  %1439 = vmatpush.bf16.msrb.mxu0 %v5305_v33  ;;  %v5342_v10 = vld [vmem:[%s8393_s4 + $0x228] sm:$0xff] }
 0x162   : > { %v669_v15 = vmul.f32 0.5, %v668_v12  ;;  %v5340_v12 = vld [vmem:[%s8393_s4 + $0x218] sm:$0xff] }
 0x164   : > { %v670_v19 = vsub.f32 1.5, %v669_v15  ;;  %v5338_v15 = vld [vmem:[%s8393_s4 + $0x208] sm:$0xff] }
 0x166   : > { %v671_v22 = vmul.f32 %v5554_v8, %v670_v19  ;;  %v5351_v19 = vld [vmem:[%s8393_s4 + $0x270] sm:$0xff] }
 0x168   : > { %v675_v25 = vsel %vm674_vm5, %v5554_v8, %v671_v22  ;;  %v5344_v8 = vld [vmem:[%s8393_s4 + $0x238] sm:$0xff]  ;;  %v5367_v22 = vld [vmem:[%s8393_s4 + $0x2f0] sm:$0xff] }
 0x169   : > { %v728_v30 = vmul.f32 %v675_v25, %v5980_v47  ;;  %v5328_v47 = vld [vmem:[%s8393_s4 + $0x1b8] sm:$0xff]  ;;  %1740 = vmatpush.bf16.msra.mxu0 %v5344_v8  ;;  %v5366_v25 = vld [vmem:[%s8393_s4 + $0x2e8] sm:$0xff] }
 0x16a   : > { %1586 = vmatpush.bf16.msrb.mxu2 %v5328_v47  ;;  %v5346_v47 = vld [vmem:[%s8393_s4 + $0x248] sm:$0xff] }
 0x16b   : > { %v739_v34 = vmul.f32 %v6090_v46, %v728_v30  ;;  %v5348_v30 = vld [vmem:[%s8393_s4 + $0x258] sm:$0xff] }
 0x16d   : > { %v750_v43 = vadd.f32 %v6112_v60, %v739_v34  ;;  %1741 = vmatpush.bf16.msra.mxu0 %v5343_v9  ;;  %v5347_v34 = vld [vmem:[%s8393_s4 + $0x250] sm:$0xff] }
 0x16e   : > { %1209 = vmatmul.bf16.vlgmr.msrb.gmra.mxu1 %v6175_v5  ;;  %1587 = vmatpush.bf16.msrb.mxu2 %v5327_v50 }
 0x16f   : > { %v758_v51 = vpack.c.bf16 %v750_v43, %v750_v43  ;;  %v5345_v43 = vld [vmem:[%s8393_s4 + $0x240] sm:$0xff] }
 0x171   : > { %v1062_v54 = vunpack.c.l.b16 %v758_v51  ;;  %1742 = vmatpush.bf16.msra.mxu0 %v5342_v10 }
 0x172   : > { %1588 = vmatpush.bf16.msrb.mxu2 %v5326_v53 }
 0x175   : > { %1743 = vmatpush.bf16.msra.mxu0 %v5341_v11 }
 0x176   : > { %1589 = vmatpush.bf16.msrb.mxu2 %v5325_v41 }
 0x179   : > { %1744 = vmatpush.bf16.msra.mxu0 %v5340_v12 }
 0x17a   : > { %1590 = vmatpush.bf16.msrb.mxu2 %v5324_v59 }
 0x17d   : > { %1745 = vmatpush.bf16.msra.mxu0 %v5339_v13 }
 0x17e   : > { %1591 = vmatpush.bf16.msrb.mxu2 %v5323_v63 }
 0x181   : > { %1746 = vmatpush.bf16.msra.mxu0 %v5338_v15 }
 0x182   : > { %1592 = vmatpush.bf16.msrb.mxu2 %v5322_v3 }
 0x186   : > { %1593 = vmatpush.bf16.msrb.mxu2 %v5321_v6 }
 0x18a   : > { %1894 = vmatpush.bf16.msra.mxu2 %v5360_v18 }
 0x18e   : > { %1895 = vmatpush.bf16.msra.mxu2 %v5359_v20 }
 0x1a5   : > { %v621_v16 = vpop.xlane.xlu0 %620 }
 0x1a6   : > { %v633_v17 = vmul.f32 %v621_v16, %v5947_v21  ;;  %v5337_v16 = vld [vmem:[%s8393_s4 + $0x200] sm:$0xff] }
 0x1a7   : > { %1747 = vmatpush.bf16.msra.mxu0 %v5337_v16 }
 0x1a8   : > { %v641_v36 = vadd.f32 1e-05, %v633_v17  ;;  %v5352_v17 = vld [vmem:[%s8393_s4 + $0x278] sm:$0xff] }
 0x1aa   : > { %5555 = vrsqrt.f32 %v641_v36  ;;  %vm682_vm7 = vweird.f32 %v641_v36 }
 0x1b0   : > { %v5556_v24 = vpop.eup %5555 }
 0x1b1   : > { %v677_v27 = vmul.f32 %v5556_v24, %v641_v36  ;;  %vm683_vm6 = vweird.f32 %v5556_v24  ;;  %v5368_v36 = vld [vmem:[%s8393_s4 + $0x2f8] sm:$0xff] }
 0x1b2   : > { %vm684_vm8 = vmor %vm682_vm7, %vm683_vm6 }
 0x1b3   : > { %v678_v29 = vmul.f32 %v5556_v24, %v677_v27  ;;  %v5349_v27 = vld [vmem:[%s8393_s4 + $0x260] sm:$0xff] }
 0x1b5   : > { %v679_v31 = vmul.f32 0.5, %v678_v29  ;;  %v5365_v29 = vld [vmem:[%s8393_s4 + $0x2e0] sm:$0xff] }
 0x1b7   : > { %v680_v32 = vsub.f32 1.5, %v679_v31  ;;  %v5356_v31 = vld [vmem:[%s8393_s4 + $0x298] sm:$0xff] }
 0x1b9   : > { %v681_v37 = vmul.f32 %v5556_v24, %v680_v32  ;;  %v5364_v32 = vld [vmem:[%s8393_s4 + $0x2d8] sm:$0xff] }
 0x1bb   : > { %v685_v42 = vsel %vm684_vm8, %v5556_v24, %v681_v37  ;;  %v5358_v24 = vld [vmem:[%s8393_s4 + $0x2a8] sm:$0xff]  ;;  %v5355_v37 = vld [vmem:[%s8393_s4 + $0x290] sm:$0xff] }
 0x1bc   : > { %v729_v45 = vmul.f32 %v685_v42, %v6043_v14  ;;  %v5335_v14 = vld [vmem:[%s8393_s4 + $0x1f0] sm:$0xff]  ;;  %1896 = vmatpush.bf16.msra.mxu2 %v5358_v24  ;;  %v5362_v42 = vld [vmem:[%s8393_s4 + $0x2c8] sm:$0xff] }
 0x1bd   : > { %1664 = vmatpush.bf16.msrb.mxu3 %v5335_v14  ;;  %v994_v24 = vld [vmem:[%s8445_s1 + $0x130] sm:$0xff] }
 0x1be   : > { %v740_v48 = vmul.f32 %v6090_v46, %v729_v45  ;;  %v5318_v46 = vld [vmem:[%s8393_s4 + $0x168] sm:$0xff]  ;;  %v5353_v45 = vld [vmem:[%s8393_s4 + $0x280] sm:$0xff] }
 0x1bf   : > { %1511 = vmatpush.bf16.msra.mxu1 %v5318_v46 }
 0x1c0   : > { %v751_v40 = vadd.f32 %v6112_v60, %v740_v48  ;;  %v5334_v60 = vld [vmem:[%s8393_s4 + $0x1e8] sm:$0xff]  ;;  %1897 = vmatpush.bf16.msra.mxu2 %v5357_v28  ;;  %v995_v28 = vld [vmem:[%s8445_s1 + $0x138] sm:$0xff] }
 0x1c1   : > { %1665 = vmatpush.bf16.msrb.mxu3 %v5334_v60 }
 0x1c2   : > { %v759_v52 = vpack.c.bf16 %v751_v40, %v751_v40 }
 0x1c3   : > { %1512 = vmatpush.bf16.msra.mxu1 %v5317_v57 }
 0x1c4   : > { %v1063_v55 = vunpack.c.l.b16 %v759_v52  ;;  %1898 = vmatpush.bf16.msra.mxu2 %v5356_v31  ;;  %v992_v31 = vld [vmem:[%s8445_s1 + $0x120] sm:$0xff] }
 0x1c5   : > { %1666 = vmatpush.bf16.msrb.mxu3 %v5333_v58 }
 0x1c6   : > { %v6240_v56 = vpack.c.b16 %v1063_v55, %v1062_v54 }
 0x1c7   : > { %1513 = vmatpush.bf16.msra.mxu1 %v5316_v26 }
 0x1c8   : > { %1137 = vmatmul.bf16.gmra.mxu0 %v6240_v56  ;;  %1214 = vmatmul.bf16.gmra.mxu1 %v6240_v56 }
 0x1c9   : > { %1291 = vmatmul.bf16.gmra.mxu2 %v6240_v56  ;;  %1368 = vmatmul.bf16.gmra.mxu3 %v6240_v56 }
 0x1ca   : > { %1667 = vmatpush.bf16.msrb.mxu3 %v5332_v61  ;;  %1899 = vmatpush.bf16.msra.mxu2 %v5355_v37 }
 0x1cb   : > { %1514 = vmatpush.bf16.msra.mxu1 %v5315_v62  ;;  %v6376_v33 = vpop.f32.mrf.mxu1 }
 0x1ce   : > { %1668 = vmatpush.bf16.msrb.mxu3 %v5331_v0  ;;  %1900 = vmatpush.bf16.msra.mxu2 %v5354_v39 }
 0x1cf   : > { %1515 = vmatpush.bf16.msra.mxu1 %v5314_v1 }
 0x1d2   : > { %1669 = vmatpush.bf16.msrb.mxu3 %v5330_v4  ;;  %1901 = vmatpush.bf16.msra.mxu2 %v5353_v45 }
 0x1d3   : > { %1516 = vmatpush.bf16.msra.mxu1 %v5313_v49  ;;  %v6402_v48 = vpop.f32.mrf.mxu1 }
 0x1d6   : > { %1670 = vmatpush.bf16.msrb.mxu3 %v5329_v7 }
 0x1d7   : > { %1817 = vmatpush.bf16.msrb.mxu1 %v5352_v17 }
 0x1d8   : > { %1219 = vmatmul.bf16.gmra.mxu1 %v6159_v44  ;;  %1440 = vmatmul.bf16.vlgmr.msrb.gmra.mxu0 %v6175_v5 }
 0x1d9   : > { %1296 = vmatmul.bf16.gmra.mxu2 %v6159_v44  ;;  %1373 = vmatmul.bf16.gmra.mxu3 %v6159_v44 }
 0x1da   : > { %1971 = vmatpush.bf16.msra.mxu3 %v5368_v36 }
 0x1db   : > { %1818 = vmatpush.bf16.msrb.mxu1 %v5351_v19  ;;  %v6411_v50 = vpop.f32.mrf.mxu1  ;;  %v6419_v40 = vpop.f32.mrf.mxu0 }
 0x1de   : > { %1972 = vmatpush.bf16.msra.mxu3 %v5367_v22 }
 0x1df   : > { %1819 = vmatpush.bf16.msrb.mxu1 %v5350_v23 }
 0x1e2   : > { %1973 = vmatpush.bf16.msra.mxu3 %v5366_v25  ;;  %v6427_v52 = vpop.f32.mrf.mxu2  ;;  %v6429_v46 = vpop.f32.mrf.mxu3 }
 0x1e3   : > { %1820 = vmatpush.bf16.msrb.mxu1 %v5349_v27  ;;  %v6415_v51 = vpop.f32.mrf.mxu1  ;;  %v6431_v53 = vpop.f32.mrf.mxu0  ;;  %v993_v27 = vld [vmem:[%s8445_s1 + $0x128] sm:$0xff] }
 0x1e6   : > { %1974 = vmatpush.bf16.msra.mxu3 %v5365_v29 }
 0x1e7   : > { %1821 = vmatpush.bf16.msrb.mxu1 %v5348_v30 }
 0x1e8   : > { %1224 = vmatmul.bf16.gmra.mxu1 %v6172_v2  ;;  %1445 = vmatmul.bf16.gmra.mxu0 %v6240_v56 }
 0x1e9   : > { %1301 = vmatmul.bf16.gmra.mxu2 %v6172_v2  ;;  %1378 = vmatmul.bf16.gmra.mxu3 %v6172_v2 }
 0x1ea   : > { %1975 = vmatpush.bf16.msra.mxu3 %v5364_v32  ;;  %v6435_v55 = vpop.f32.mrf.mxu2  ;;  %v6437_v60 = vpop.f32.mrf.mxu3 }
 0x1eb   : > { %1822 = vmatpush.bf16.msrb.mxu1 %v5347_v34  ;;  %v6421_v14 = vpop.f32.mrf.mxu1 }
 0x1ee   : > { %1976 = vmatpush.bf16.msra.mxu3 %v5363_v38 }
 0x1ef   : > { %1823 = vmatpush.bf16.msrb.mxu1 %v5346_v47 }
 0x1f2   : > { %1977 = vmatpush.bf16.msra.mxu3 %v5362_v42 }
 0x1f3   : > { %1824 = vmatpush.bf16.msrb.mxu1 %v5345_v43  ;;  %v6433_v54 = vpop.f32.mrf.mxu1 }
 0x1f6   : > { %1978 = vmatpush.bf16.msra.mxu3 %v5361_v35 }
 0x1f8   : > { %1450 = vmatmul.bf16.gmra.mxu0 %v6159_v44  ;;  %1517 = vmatmul.bf16.vlgmr.msra.gmra.mxu1 %v6175_v5 }
 0x1f9   : > { %1594 = vmatmul.bf16.vlgmr.msrb.gmra.mxu2 %v6175_v5  ;;  %1671 = vmatmul.bf16.vlgmr.msrb.gmra.mxu3 %v6175_v5 }
 0x208   : > { %1455 = vmatmul.bf16.gmra.mxu0 %v6172_v2  ;;  %1522 = vmatmul.bf16.gmra.mxu1 %v6240_v56 }
 0x209   : > { %1599 = vmatmul.bf16.gmra.mxu2 %v6240_v56  ;;  %1676 = vmatmul.bf16.gmra.mxu3 %v6240_v56 }
 0x218   : > { %1527 = vmatmul.bf16.gmra.mxu1 %v6159_v44  ;;  %1748 = vmatmul.bf16.vlgmr.msra.gmra.mxu0 %v6175_v5 }
 0x219   : > { %1604 = vmatmul.bf16.gmra.mxu2 %v6159_v44  ;;  %1681 = vmatmul.bf16.gmra.mxu3 %v6159_v44 }
 0x228   : > { %1532 = vmatmul.bf16.gmra.mxu1 %v6172_v2  ;;  %1753 = vmatmul.bf16.gmra.mxu0 %v6240_v56 }
 0x229   : > { %1609 = vmatmul.bf16.gmra.mxu2 %v6172_v2  ;;  %1686 = vmatmul.bf16.gmra.mxu3 %v6172_v2 }
 0x238   : > { %1758 = vmatmul.bf16.gmra.mxu0 %v6159_v44  ;;  %1825 = vmatmul.bf16.vlgmr.msrb.gmra.mxu1 %v6175_v5 }
 0x239   : > { %1902 = vmatmul.bf16.vlgmr.msra.gmra.mxu2 %v6175_v5  ;;  %1979 = vmatmul.bf16.vlgmr.msra.gmra.mxu3 %v6175_v5 }
 0x245   : > { %v6439_v57 = vpop.f32.mrf.mxu0  ;;  %v6441_v41 = vpop.f32.mrf.mxu1 }
 0x248   : > { %1763 = vmatmul.bf16.gmra.mxu0 %v6172_v2  ;;  %1830 = vmatmul.bf16.gmra.mxu1 %v6240_v56 }
 0x249   : > { %1907 = vmatmul.bf16.gmra.mxu2 %v6240_v56  ;;  %1984 = vmatmul.bf16.gmra.mxu3 %v6240_v56 }
 0x24c   : > { %v6447_v5 = vpop.f32.mrf.mxu2  ;;  %v6449_v58 = vpop.f32.mrf.mxu3 }
 0x24d   : > { %8431 = vst [vmem:[#allocation11_spill] sm:$0xff] %v6447_v5  ;;  %v6451_v26 = vpop.f32.mrf.mxu0  ;;  %v6453_v59 = vpop.f32.mrf.mxu1 }
 0x24e   : > { %8432 = vst [vmem:[#allocation12_spill] sm:$0xff] %v6449_v58 }
 0x254   : > { %v6455_v61 = vpop.f32.mrf.mxu2  ;;  %v6457_v62 = vpop.f32.mrf.mxu3 }
 0x255   : > { %v6459_v63 = vpop.f32.mrf.mxu1  ;;  %v6461_v0 = vpop.f32.mrf.mxu0 }
 0x256   : > { %8433 = vst [vmem:[#allocation13_spill] sm:$0xff] %v6459_v63 }
 0x258   : > { %1835 = vmatmul.bf16.gmra.mxu1 %v6159_v44 }
 0x259   : > { %1912 = vmatmul.bf16.gmra.mxu2 %v6159_v44  ;;  %1989 = vmatmul.bf16.gmra.mxu3 %v6159_v44 }
 0x25c   : > { %v6466_v56 = vpop.f32.mrf.mxu2  ;;  %v6468_v1 = vpop.f32.mrf.mxu3 }
 0x25d   : > { %8434 = vst [vmem:[#allocation14_spill] sm:$0xff] %v6466_v56  ;;  %v6470_v3 = vpop.f32.mrf.mxu1  ;;  %v6472_v4 = vpop.f32.mrf.mxu0 }
 0x25e   : > { %8435 = vst [vmem:[#allocation15_spill] sm:$0xff] %v6468_v1 }
 0x25f   : > { %8436 = vst [vmem:[#allocation16_spill] sm:$0xff] %v6470_v3 }
 0x264   : > { %v6474_v49 = vpop.f32.mrf.mxu2  ;;  %v6476_v6 = vpop.f32.mrf.mxu3 }
 0x265   : > { %8437 = vst [vmem:[#allocation17_spill] sm:$0xff] %v6474_v49  ;;  %v6478_v7 = vpop.f32.mrf.mxu1  ;;  %v1446_v8 = vpop.f32.mrf.mxu0 }
 0x266   : > { %8438 = vst [vmem:[#allocation18_spill] sm:$0xff] %v6476_v6 }
 0x267   : > { %8439 = vst [vmem:[#allocation19_spill] sm:$0xff] %v6478_v7 }
 0x268   : > { %1840 = vmatmul.bf16.gmra.mxu1 %v6172_v2 }
 0x269   : > { %1917 = vmatmul.bf16.gmra.mxu2 %v6172_v2  ;;  %1994 = vmatmul.bf16.gmra.mxu3 %v6172_v2 }
 0x26c   : > { %v6483_v44 = vpop.f32.mrf.mxu2  ;;  %v6485_v9 = vpop.f32.mrf.mxu3 }
 0x26d   : > { %8440 = vst [vmem:[#allocation20_spill] sm:$0xff] %v6483_v44  ;;  %v6487_v10 = vpop.f32.mrf.mxu1  ;;  %v1448_v11 = vpop.f32.mrf.mxu0 }
 0x26e   : > { %8441 = vst [vmem:[#allocation21_spill] sm:$0xff] %v6485_v9 }
 0x26f   : > { %8442 = vst [vmem:[#allocation22_spill] sm:$0xff] %v6487_v10 }
 0x274   : > { %v6489_v12 = vpop.f32.mrf.mxu2  ;;  %v6491_v13 = vpop.f32.mrf.mxu3 }
 0x275   : > { %8443 = vst [vmem:[#allocation23_spill] sm:$0xff] %v6489_v12  ;;  %v1451_v15 = vpop.f32.mrf.mxu0  ;;  %v6493_v16 = vpop.f32.mrf.mxu1 }
 0x276   : > { %8444 = vst [vmem:[#allocation24_spill] sm:$0xff] %v6491_v13  ;;  %v1452_v39 = vadd.f32 %v1451_v15, %v992_v31 }
 0x27c   : > { %v6495_v17 = vpop.f32.mrf.mxu2  ;;  %v6497_v18 = vpop.f32.mrf.mxu3 }
 0x27d   : > { %v1453_v36 = vpop.f32.mrf.mxu0  ;;  %v6499_v2 = vpop.f32.mrf.mxu1 }
 0x27e   : > { %v1454_v37 = vadd.f32 %v1453_v36, %v993_v27  ;;  %v990_v36 = vld [vmem:[%s8445_s1 + $0x110] sm:$0xff] }
 0x280   : > { %v2037_v43 = vpack.c.bf16 %v1454_v37, %v1454_v37 }
 0x284   : > { %v6501_v19 = vpop.f32.mrf.mxu2  ;;  %v6503_v20 = vpop.f32.mrf.mxu3 }
 0x285   : > { %v1456_v22 = vpop.f32.mrf.mxu0  ;;  %v6505_v23 = vpop.f32.mrf.mxu1 }
 0x286   : > { %v1457_v25 = vadd.f32 %v1456_v22, %v994_v24  ;;  %v991_v22 = vld [vmem:[%s8445_s1 + $0x118] sm:$0xff]  ;;  %v2036_v24 = vpack.c.bf16 %v1452_v39, %v1452_v39  ;;  %v989_v39 = vld [vmem:[%s8445_s1 + $0x108] sm:$0xff] }
 0x287   : > { %v1449_v27 = vadd.f32 %v1448_v11, %v991_v22  ;;  %v988_v11 = vld [vmem:[%s8445_s1 + $0x100] sm:$0xff] }
 0x288   : > { %v2038_v38 = vpack.c.bf16 %v1457_v25, %v1457_v25  ;;  %v2128_v37 = vunpack.c.l.b16 %v2036_v24 }
 0x28a   : > { %v2130_v45 = vunpack.c.l.b16 %v2038_v38  ;;  %v2035_v38 = vpack.c.bf16 %v1449_v27, %v1449_v27 }
 0x28c   : > { %v6516_v29 = vpop.f32.mrf.mxu2  ;;  %v6518_v30 = vpop.f32.mrf.mxu3  ;;  %v2127_v22 = vunpack.c.l.b16 %v2035_v38 }
 0x28d   : > { %v1458_v32 = vpop.f32.mrf.mxu0  ;;  %v6523_v34 = vpop.f32.mrf.mxu1 }
 0x28e   : > { %v1459_v47 = vadd.f32 %v1458_v32, %v995_v28  ;;  %v2129_v28 = vunpack.c.l.b16 %v2037_v43  ;;  %v1447_v32 = vadd.f32 %v1446_v8, %v990_v36  ;;  %v1444_v8 = vadd.f32 %v6472_v4, %v989_v39  ;;  %v956_v4 = vld [vmem:[%s8445_s1] sm:$0xff]  ;;  %v1002_v39 = vld [vmem:[%s8445_s1 + $0x170] sm:$0xff] }
 0x28f   : > { %v1442_v36 = vadd.f32 %v6461_v0, %v988_v11  ;;  %v1134_v11 = vadd.f32 %v6419_v40, %v956_v4 }
 0x290   : > { %v2039_v42 = vpack.c.bf16 %v1459_v47, %v1459_v47  ;;  %v2134_v47 = vpack.c.b16 %v2129_v28, %v2128_v37  ;;  %v2033_v28 = vpack.c.bf16 %v1444_v8, %v1444_v8 }
 0x291   : > { %v2032_v37 = vpack.c.bf16 %v1442_v36, %v1442_v36  ;;  %v1001_v36 = vld [vmem:[%s8445_s1 + $0x168] sm:$0xff] }
 0x292   : > { %v2131_v35 = vunpack.c.l.b16 %v2039_v42  ;;  %v2034_v42 = vpack.c.bf16 %v1447_v32, %v1447_v32  ;;  %v2156_v24 = vsel %vm2136_vm9, %v2134_v47, 0  ;;  %v957_v32 = vld [vmem:[%s8445_s1 + $0x8] sm:$0xff]  ;;  %v2125_v38 = vunpack.c.l.b16 %v2033_v28 }
 0x293   : > { %v1136_v47 = vadd.f32 %v6431_v53, %v957_v32  ;;  %v1000_v32 = vld [vmem:[%s8445_s1 + $0x160] sm:$0xff] }
 0x294   : > { %v2135_v21 = vpack.c.b16 %v2131_v35, %v2130_v45  ;;  %v6528_v9 = vpop.f32.mrf.mxu2  ;;  %v6530_v13 = vpop.f32.mrf.mxu3  ;;  %v2126_v27 = vunpack.c.l.b16 %v2034_v42  ;;  %v2124_v42 = vunpack.c.l.b16 %v2032_v37 }
 0x295   : > { %v1528_v25 = vpop.f32.mrf.mxu1  ;;  %v6535_v15 = vpop.f32.mrf.mxu0 }
 0x296   : > { %v2159_v31 = vsel %vm2136_vm9, %v2135_v21, 0 }
 0x297   : > { %2165 = vmatpush.bf16.xpose.msrb.mxu0 %v2159_v31  ;;  %v2133_v31 = vpack.c.b16 %v2127_v22, %v2126_v27  ;;  %v2132_v22 = vpack.c.b16 %v2125_v38, %v2124_v42  ;;  %v1003_v27 = vld [vmem:[%s8445_s1 + $0x178] sm:$0xff]  ;;  %v1010_v38 = vld [vmem:[%s8445_s1 + $0x1b0] sm:$0xff] }
 0x299   : > { %v2153_v0 = vsel %vm2136_vm9, %v2133_v31, 0  ;;  %v2000_v31 = vpack.c.bf16 %v1134_v11, %v1134_v11  ;;  %v1529_v11 = vadd.f32 %v1528_v25, %v1000_v32  ;;  %v1019_v25 = vld [vmem:[%s8445_s1 + $0x1f8] sm:$0xff]  ;;  %v1016_v32 = vld [vmem:[%s8445_s1 + $0x1e0] sm:$0xff] }
 0x29b   : > { %v2104_v1 = vunpack.c.l.b16 %v2000_v31  ;;  %v959_v31 = vld [vmem:[%s8445_s1 + $0x18] sm:$0xff] }
 0x29c   : > { %v6541_v45 = vpop.f32.mrf.mxu2  ;;  %v6543_v35 = vpop.f32.mrf.mxu3  ;;  %v1141_v5 = vadd.f32 %v6451_v26, %v959_v31 }
 0x29d   : > { %v1530_v43 = vpop.f32.mrf.mxu1  ;;  %v6548_v21 = vpop.f32.mrf.mxu0 }
 0x29f   : > { %2166 = vmatpush.bf16.xpose.msrb.mxu0 %v2156_v24  ;;  %v2001_v24 = vpack.c.bf16 %v1136_v47, %v1136_v47 }
 0x2a1   : > { %v2105_v42 = vunpack.c.l.b16 %v2001_v24 }
 0x2a3   : > { %v2112_v24 = vpack.c.b16 %v2105_v42, %v2104_v1 }
 0x2a4   : > { %v1607_v12 = vpop.f32.mrf.mxu2  ;;  %v1684_v44 = vpop.f32.mrf.mxu3 }
 0x2a5   : > { %v1533_v10 = vpop.f32.mrf.mxu1  ;;  %v6556_v7 = vpop.f32.mrf.mxu0 }
 0x2a6   : > { %v1534_v8 = vadd.f32 %v1533_v10, %v1002_v39  ;;  %v1531_v10 = vadd.f32 %v1530_v43, %v1001_v36  ;;  %v2150_v39 = vsel %vm2136_vm9, %v2132_v22, 0  ;;  %v1009_v43 = vld [vmem:[%s8445_s1 + $0x1a8] sm:$0xff]  ;;  %v1011_v22 = vld [vmem:[%s8445_s1 + $0x1b8] sm:$0xff] }
 0x2a7   : > { %2167 = vmatpush.bf16.xpose.msrb.mxu0 %v2153_v0  ;;  %v1018_v0 = vld [vmem:[%s8445_s1 + $0x1f0] sm:$0xff] }
 0x2a8   : > { %v2046_v4 = vpack.c.bf16 %v1534_v8, %v1534_v8  ;;  %v1017_v8 = vld [vmem:[%s8445_s1 + $0x1e8] sm:$0xff]  ;;  %v2045_v56 = vpack.c.bf16 %v1531_v10, %v1531_v10 }
 0x2a9   : > { %v1685_v10 = vadd.f32 %v1684_v44, %v1017_v8  ;;  %v1683_v8 = vadd.f32 %v6543_v35, %v1016_v32 }
 0x2aa   : > { %v2224_v63 = vunpack.c.l.b16 %v2046_v4  ;;  %v2223_v44 = vunpack.c.l.b16 %v2045_v56 }
 0x2ab   : > { %v2061_v56 = vpack.c.bf16 %v1685_v10, %v1685_v10 }
 0x2ac   : > { %v1610_v53 = vpop.f32.mrf.mxu2  ;;  %v1687_v28 = vpop.f32.mrf.mxu3 }
 0x2ad   : > { %v1535_v37 = vpop.f32.mrf.mxu1  ;;  %v6576_v40 = vpop.f32.mrf.mxu0  ;;  %v1611_v36 = vadd.f32 %v1610_v53, %v1010_v38  ;;  %v1688_v49 = vadd.f32 %v1687_v28, %v1018_v0  ;;  %v999_v53 = vld [vmem:[%s8445_s1 + $0x158] sm:$0xff]  ;;  %v2044_v28 = vpack.c.bf16 %v1529_v11, %v1529_v11  ;;  %v998_v0 = vld [vmem:[%s8445_s1 + $0x150] sm:$0xff] }
 0x2ae   : > { %v1536_v47 = vadd.f32 %v1535_v37, %v1003_v27  ;;  %v1608_v37 = vadd.f32 %v1607_v12, %v1009_v43  ;;  %v1526_v12 = vadd.f32 %v6523_v34, %v999_v53  ;;  %v958_v43 = vld [vmem:[%s8445_s1 + $0x10] sm:$0xff]  ;;  %v1524_v26 = vadd.f32 %v6505_v23, %v998_v0  ;;  %v997_v23 = vld [vmem:[%s8445_s1 + $0x148] sm:$0xff] }
 0x2af   : > { %2168 = vmatpush.bf16.xpose.msrb.mxu0 %v2150_v39  ;;  %v2062_v39 = vpack.c.bf16 %v1688_v49, %v1688_v49 }
 0x2b0   : > { %v2047_v6 = vpack.c.bf16 %v1536_v47, %v1536_v47  ;;  %v2054_v47 = vpack.c.bf16 %v1611_v36, %v1611_v36  ;;  %v2053_v34 = vpack.c.bf16 %v1608_v37, %v1608_v37  ;;  %v2043_v32 = vpack.c.bf16 %v1526_v12, %v1526_v12 }
 0x2b1   : > { %v2060_v37 = vpack.c.bf16 %v1683_v8, %v1683_v8  ;;  %v2042_v0 = vpack.c.bf16 %v1524_v26, %v1524_v26 }
 0x2b2   : > { %v2225_v27 = vunpack.c.l.b16 %v2047_v6  ;;  %v1008_v6 = vld [vmem:[%s8445_s1 + $0x1a0] sm:$0xff]  ;;  %v2317_v31 = vunpack.c.l.b16 %v2054_v47  ;;  %v1006_v47 = vld [vmem:[%s8445_s1 + $0x190] sm:$0xff] }
 0x2b3   : > { %v1606_v49 = vadd.f32 %v6541_v45, %v1008_v6  ;;  %v2410_v45 = vunpack.c.l.b16 %v2062_v39  ;;  %v1139_v6 = vadd.f32 %v6439_v57, %v958_v43  ;;  %v1014_v57 = vld [vmem:[%s8445_s1 + $0x1d0] sm:$0xff] }
 0x2b4   : > { %v2229_v1 = vpack.c.b16 %v2225_v27, %v2224_v63  ;;  %v1612_v4 = vpop.f32.mrf.mxu2  ;;  %v1689_v38 = vpop.f32.mrf.mxu3 }
 0x2b5   : > { %v1613_v42 = vadd.f32 %v1612_v4, %v1011_v22  ;;  %v1690_v11 = vadd.f32 %v1689_v38, %v1019_v25  ;;  %v6612_v3 = vpop.f32.mrf.mxu0  ;;  %v6614_v58 = vpop.f32.mrf.mxu1  ;;  %v2222_v22 = vunpack.c.l.b16 %v2044_v28  ;;  %v1007_v25 = vld [vmem:[%s8445_s1 + $0x198] sm:$0xff]  ;;  %v2052_v28 = vpack.c.bf16 %v1606_v49, %v1606_v49 }
 0x2b6   : > { %5077 = vmatmul.msk.bf16.vlgmr.msrb.gmra.mxu0 %vm2136_vm9, %v2112_v24  ;;  %v2252_v63 = vsel %vm2136_vm9, %v2229_v1, 0  ;;  %v1015_v24 = vld [vmem:[%s8445_s1 + $0x1d8] sm:$0xff]  ;;  %v2003_v38 = vpack.c.bf16 %v1141_v5, %v1141_v5  ;;  %v1603_v39 = vadd.f32 %v6528_v9, %v1007_v25  ;;  %v996_v5 = vld [vmem:[%s8445_s1 + $0x140] sm:$0xff]  ;;  %v2408_v25 = vunpack.c.l.b16 %v2060_v37 }
 0x2b7   : > { %v2055_v36 = vpack.c.bf16 %v1613_v42, %v1613_v42  ;;  %v2063_v27 = vpack.c.bf16 %v1690_v11, %v1690_v11  ;;  %2258 = vmatpush.bf16.xpose.msra.mxu1 %v2252_v63  ;;  %v2228_v1 = vpack.c.b16 %v2223_v44, %v2222_v22  ;;  %v1680_v42 = vadd.f32 %v6530_v13, %v1015_v24  ;;  %v961_v24 = vld [vmem:[%s8445_s1 + $0x28] sm:$0xff] }
 0x2b8   : > { %v2316_v44 = vunpack.c.l.b16 %v2053_v34  ;;  %v2409_v63 = vunpack.c.l.b16 %v2061_v56  ;;  %v1521_v13 = vadd.f32 %v6499_v2, %v997_v23  ;;  %v1601_v22 = vadd.f32 %v6516_v29, %v1006_v47  ;;  %v1013_v29 = vld [vmem:[%s8445_s1 + $0x1c8] sm:$0xff] }
 0x2b9   : > { %v2318_v53 = vunpack.c.l.b16 %v2055_v36  ;;  %v2411_v35 = vunpack.c.l.b16 %v2063_v27  ;;  %v2002_v36 = vpack.c.bf16 %v1139_v6, %v1139_v6  ;;  %v2221_v27 = vunpack.c.l.b16 %v2043_v32 }
 0x2ba   : > { %v2249_v26 = vsel %vm2136_vm9, %v2228_v1, 0  ;;  %v1678_v34 = vadd.f32 %v6518_v30, %v1014_v57  ;;  %v2315_v56 = vunpack.c.l.b16 %v2052_v28  ;;  %v2220_v2 = vunpack.c.l.b16 %v2042_v0  ;;  %v1012_v0 = vld [vmem:[%s8445_s1 + $0x1c0] sm:$0xff] }
 0x2bb   : > { %v2322_v10 = vpack.c.b16 %v2318_v53, %v2317_v31  ;;  %v2415_v4 = vpack.c.b16 %v2411_v35, %v2410_v45  ;;  %v2107_v31 = vunpack.c.l.b16 %v2003_v38  ;;  %v1519_v45 = vadd.f32 %v6493_v16, %v996_v5  ;;  %v1005_v53 = vld [vmem:[%s8445_s1 + $0x188] sm:$0xff]  ;;  %v1004_v38 = vld [vmem:[%s8445_s1 + $0x180] sm:$0xff] }
 0x2bc   : > { %v6644_v11 = vpop.f32.mrf.mxu2  ;;  %v6646_v12 = vpop.f32.mrf.mxu3  ;;  %v2051_v30 = vpack.c.bf16 %v1603_v39, %v1603_v39  ;;  %v2059_v35 = vpack.c.bf16 %v1680_v42, %v1680_v42  ;;  %v2321_v6 = vpack.c.b16 %v2316_v44, %v2315_v56  ;;  %v2414_v32 = vpack.c.b16 %v2409_v63, %v2408_v25  ;;  %v960_v5 = vld [vmem:[%s8445_s1 + $0x20] sm:$0xff]  ;;  %v965_v44 = vld [vmem:[%s8445_s1 + $0x48] sm:$0xff]  ;;  %v1026_v25 = vld [vmem:[%s8445_s1 + $0x230] sm:$0xff] }
 0x2bd   : > { %v6651_v43 = vpop.f32.mrf.mxu0  ;;  %v6653_v49 = vpop.f32.mrf.mxu1  ;;  %v2345_v8 = vsel %vm2136_vm9, %v2322_v10, 0  ;;  %v2438_v9 = vsel %vm2136_vm9, %v2415_v4, 0  ;;  %v2106_v1 = vunpack.c.l.b16 %v2002_v36  ;;  %v2041_v23 = vpack.c.bf16 %v1521_v13, %v1521_v13 }
 0x2be   : > { %2351 = vmatpush.bf16.xpose.msrb.mxu2 %v2345_v8  ;;  %2444 = vmatpush.bf16.xpose.msrb.mxu3 %v2438_v9  ;;  %v2227_v28 = vpack.c.b16 %v2221_v27, %v2220_v2  ;;  %v1146_v37 = vadd.f32 %v6402_v48, %v961_v24  ;;  %v2050_v10 = vpack.c.bf16 %v1601_v22, %v1601_v22  ;;  %v2314_v63 = vunpack.c.l.b16 %v2051_v30 }
 0x2bf   : > { %2259 = vmatpush.bf16.xpose.msra.mxu1 %v2249_v26  ;;  %v2058_v16 = vpack.c.bf16 %v1678_v34, %v1678_v34  ;;  %v2040_v4 = vpack.c.bf16 %v1519_v45, %v1519_v45  ;;  %v1598_v47 = vadd.f32 %v6501_v19, %v1005_v53  ;;  %v1675_v57 = vadd.f32 %v6503_v20, %v1013_v29  ;;  %v964_v45 = vld [vmem:[%s8445_s1 + $0x40] sm:$0xff] }
 0x2c0   : > { %v2113_v48 = vpack.c.b16 %v2107_v31, %v2106_v1  ;;  %v2407_v8 = vunpack.c.l.b16 %v2059_v35  ;;  %v2342_v19 = vsel %vm2136_vm9, %v2321_v6, 0  ;;  %v2435_v20 = vsel %vm2136_vm9, %v2414_v32, 0 }
 0x2c1   : > { %v2219_v13 = vunpack.c.l.b16 %v2041_v23  ;;  %v2246_v27 = vsel %vm2136_vm9, %v2227_v28, 0  ;;  %v1596_v26 = vadd.f32 %v6495_v17, %v1004_v38  ;;  %v1673_v22 = vadd.f32 %v6497_v18, %v1012_v0  ;;  %v973_v18 = vld [vmem:[%s8445_s1 + $0x88] sm:$0xff] }
 0x2c2   : > { %v2313_v34 = vunpack.c.l.b16 %v2050_v10  ;;  %v2406_v56 = vunpack.c.l.b16 %v2058_v16  ;;  %v1144_v24 = vadd.f32 %v6376_v33, %v960_v5  ;;  %v2005_v31 = vpack.c.bf16 %v1146_v37, %v1146_v37  ;;  %v1025_v28 = vld [vmem:[%s8445_s1 + $0x228] sm:$0xff] }
 0x2c3   : > { %v1213_v17 = vadd.f32 %v6433_v54, %v965_v44  ;;  %v2218_v2 = vunpack.c.l.b16 %v2040_v4  ;;  %v2049_v53 = vpack.c.bf16 %v1598_v47, %v1598_v47  ;;  %v2057_v29 = vpack.c.bf16 %v1675_v57, %v1675_v57  ;;  %v1027_v54 = vld [vmem:[%s8445_s1 + $0x238] sm:$0xff]  ;;  %v972_v47 = vld [vmem:[%s8445_s1 + $0x80] sm:$0xff] }
 0x2c4   : > { %v6680_v39 = vpop.f32.mrf.mxu2  ;;  %v6682_v42 = vpop.f32.mrf.mxu3  ;;  %v2320_v30 = vpack.c.b16 %v2314_v63, %v2313_v34  ;;  %v2413_v35 = vpack.c.b16 %v2407_v8, %v2406_v56  ;;  %v1211_v33 = vadd.f32 %v6421_v14, %v964_v45  ;;  %v2048_v1 = vpack.c.bf16 %v1596_v26, %v1596_v26  ;;  %v981_v14 = vld [vmem:[%s8445_s1 + $0xc8] sm:$0xff] }
 0x2c5   : > { %v1764_v9 = vpop.f32.mrf.mxu0  ;;  %v6690_v36 = vpop.f32.mrf.mxu1  ;;  %v2226_v32 = vpack.c.b16 %v2219_v13, %v2218_v2  ;;  %v2056_v23 = vpack.c.bf16 %v1673_v22, %v1673_v22  ;;  %v2004_v37 = vpack.c.bf16 %v1144_v24, %v1144_v24  ;;  %v6716_v10 = vunpack.c.l.b16 %v2005_v31 }
 0x2c6   : > { %2352 = vmatpush.bf16.xpose.msrb.mxu2 %v2342_v19  ;;  %2445 = vmatpush.bf16.xpose.msrb.mxu3 %v2435_v20  ;;  %v1765_v6 = vadd.f32 %v1764_v9, %v1026_v25  ;;  %v6719_v16 = vadd.f32 %v6435_v55, %v973_v18  ;;  %v2009_v4 = vpack.c.bf16 %v1213_v17, %v1213_v17  ;;  %v2312_v57 = vunpack.c.l.b16 %v2049_v53  ;;  %v1024_v55 = vld [vmem:[%s8445_s1 + $0x220] sm:$0xff]  ;;  %v1023_v25 = vld [vmem:[%s8445_s1 + $0x218] sm:$0xff] }
 0x2c7   : > { %5078 = vmatmul.msk.bf16.gmra.mxu0 %vm2136_vm9, %v2113_v48  ;;  %2260 = vmatpush.bf16.xpose.msra.mxu1 %v2246_v27  ;;  %v2405_v48 = vunpack.c.l.b16 %v2057_v29  ;;  %v2339_v63 = vsel %vm2136_vm9, %v2320_v30, 0  ;;  %v2432_v8 = vsel %vm2136_vm9, %v2413_v35, 0  ;;  %v980_v9 = vld [vmem:[%s8445_s1 + $0xc0] sm:$0xff]  ;;  %v1762_v19 = vadd.f32 %v6651_v43, %v1025_v28 }
 0x2c8   : > { %v2070_v20 = vpack.c.bf16 %v1765_v6, %v1765_v6  ;;  %v2243_v27 = vsel %vm2136_vm9, %v2226_v32, 0  ;;  %v1367_v26 = vadd.f32 %v6437_v60, %v981_v14  ;;  %v2008_v22 = vpack.c.bf16 %v1211_v33, %v1211_v33  ;;  %v1022_v60 = vld [vmem:[%s8445_s1 + $0x210] sm:$0xff] }
 0x2c9   : > { %v2311_v34 = vunpack.c.l.b16 %v2048_v1  ;;  %v2404_v56 = vunpack.c.l.b16 %v2056_v23  ;;  %v2108_v24 = vunpack.c.l.b16 %v2004_v37  ;;  %v1288_v31 = vadd.f32 %v6427_v52, %v972_v47 }
 0x2ca   : > { %v1760_v43 = vadd.f32 %v6612_v3, %v1024_v55  ;;  %v1365_v17 = vadd.f32 %v6429_v46, %v980_v9  ;;  %v2199_v2 = vunpack.c.l.b16 %v2009_v4  ;;  %v1757_v29 = vadd.f32 %v6576_v40, %v1023_v25  ;;  %v1021_v46 = vld [vmem:[%s8445_s1 + $0x208] sm:$0xff]  ;;  %v1020_v4 = vld [vmem:[%s8445_s1 + $0x200] sm:$0xff] }
 0x2cb   : > { %v2319_v18 = vpack.c.b16 %v2312_v57, %v2311_v34  ;;  %v2412_v53 = vpack.c.b16 %v2405_v48, %v2404_v56  ;;  %v2069_v30 = vpack.c.bf16 %v1762_v19, %v1762_v19  ;;  %v2824_v35 = vunpack.c.l.b16 %v2070_v20  ;;  %v967_v48 = vld [vmem:[%s8445_s1 + $0x58] sm:$0xff] }
 0x2cc   : > { %v6724_v38 = vpop.f32.mrf.mxu2  ;;  %v6726_v0 = vpop.f32.mrf.mxu3  ;;  %v2114_v32 = vpack.c.b16 %v6716_v10, %v2108_v24  ;;  %v2017_v52 = vpack.c.bf16 %v6719_v16, %v6719_v16  ;;  %v2025_v3 = vpack.c.bf16 %v1367_v26, %v1367_v26  ;;  %v2198_v33 = vunpack.c.l.b16 %v2008_v22  ;;  %v963_v10 = vld [vmem:[%s8445_s1 + $0x38] sm:$0xff] }
 0x2cd   : > { %v1766_v5 = vpop.f32.mrf.mxu0  ;;  %v6734_v44 = vpop.f32.mrf.mxu1  ;;  %v2016_v1 = vpack.c.bf16 %v1288_v31, %v1288_v31  ;;  %v1755_v23 = vadd.f32 %v6556_v7, %v1022_v60  ;;  %v2068_v28 = vpack.c.bf16 %v1760_v43, %v1760_v43  ;;  %v2024_v14 = vpack.c.bf16 %v1365_v17, %v1365_v17  ;;  %v983_v60 = vld [vmem:[%s8445_s1 + $0xd8] sm:$0xff] }
 0x2ce   : > { %v1767_v13 = vadd.f32 %v1766_v5, %v1027_v54  ;;  %2353 = vmatpush.bf16.xpose.msrb.mxu2 %v2339_v63  ;;  %2446 = vmatpush.bf16.xpose.msrb.mxu3 %v2432_v8  ;;  %v2206_v16 = vpack.c.b16 %v2199_v2, %v2198_v33  ;;  %v2336_v7 = vsel %vm2136_vm9, %v2319_v18, 0  ;;  %v2429_v57 = vsel %vm2136_vm9, %v2412_v53, 0  ;;  %v962_v8 = vld [vmem:[%s8445_s1 + $0x30] sm:$0xff] }
 0x2cf   : > { %2261 = vmatpush.bf16.xpose.msra.mxu1 %v2243_v27  ;;  %v1752_v55 = vadd.f32 %v6548_v21, %v1021_v46  ;;  %v2067_v5 = vpack.c.bf16 %v1757_v29, %v1757_v29  ;;  %v2823_v63 = vunpack.c.l.b16 %v2069_v30  ;;  %v2292_v9 = vunpack.c.l.b16 %v2017_v52  ;;  %v966_v21 = vld [vmem:[%s8445_s1 + $0x50] sm:$0xff] }
 0x2d0   : > { %v2071_v45 = vpack.c.bf16 %v1767_v13, %v1767_v13  ;;  %v2385_v19 = vunpack.c.l.b16 %v2025_v3  ;;  %v1151_v20 = vadd.f32 %v6415_v51, %v963_v10  ;;  %v1750_v13 = vadd.f32 %v6535_v15, %v1020_v4  ;;  %v975_v15 = vld [vmem:[%s8445_s1 + $0x98] sm:$0xff] }
 0x2d1   : > { %v2066_v27 = vpack.c.bf16 %v1755_v23, %v1755_v23  ;;  %v2822_v26 = vunpack.c.l.b16 %v2068_v28  ;;  %v2291_v22 = vunpack.c.l.b16 %v2016_v1  ;;  %v2384_v34 = vunpack.c.l.b16 %v2024_v14  ;;  %v8446_v28 = vld [vmem:[#allocation11_spill] sm:$0xff]  ;;  %v8447_v14 = vld [vmem:[#allocation12_spill] sm:$0xff] }
 0x2d2   : > { %v2825_v6 = vunpack.c.l.b16 %v2071_v45  ;;  %v1218_v56 = vadd.f32 %v6453_v59, %v967_v48  ;;  %v1149_v25 = vadd.f32 %v6411_v50, %v962_v8  ;;  %v2065_v24 = vpack.c.bf16 %v1752_v55, %v1752_v55  ;;  %v977_v8 = vld [vmem:[%s8445_s1 + $0xa8] sm:$0xff] }
 0x2d3   : > { %v2821_v31 = vunpack.c.l.b16 %v2067_v5  ;;  %v2828_v43 = vpack.c.b16 %v2823_v63, %v2822_v26  ;;  %v2299_v51 = vpack.c.b16 %v2292_v9, %v2291_v22  ;;  %v2392_v45 = vpack.c.b16 %v2385_v19, %v2384_v34  ;;  %v976_v63 = vld [vmem:[%s8445_s1 + $0xa0] sm:$0xff]  ;;  %v8448_v26 = vld [vmem:[#allocation16_spill] sm:$0xff]  ;;  %v985_v34 = vld [vmem:[%s8445_s1 + $0xe8] sm:$0xff] }
 0x2d4   : > { %v2829_v54 = vpack.c.b16 %v2825_v6, %v2824_v35  ;;  %v6761_v40 = vpop.f32.mrf.mxu2  ;;  %v6763_v37 = vpop.f32.mrf.mxu3  ;;  %v1216_v17 = vadd.f32 %v6441_v41, %v966_v21  ;;  %v2007_v2 = vpack.c.bf16 %v1151_v20, %v1151_v20  ;;  %v2064_v18 = vpack.c.bf16 %v1750_v13, %v1750_v13  ;;  %v974_v35 = vld [vmem:[%s8445_s1 + $0x90] sm:$0xff] }
 0x2d5   : > { %v6771_v47 = vpop.f32.mrf.mxu1  ;;  %v2820_v59 = vunpack.c.l.b16 %v2066_v27  ;;  %v2011_v29 = vpack.c.bf16 %v1218_v56, %v1218_v56  ;;  %v2006_v30 = vpack.c.bf16 %v1149_v25, %v1149_v25  ;;  %v982_v6 = vld [vmem:[%s8445_s1 + $0xd0] sm:$0xff]  ;;  %v1295_v33 = vadd.f32 %v6455_v61, %v975_v15  ;;  %v984_v27 = vld [vmem:[%s8445_s1 + $0xe0] sm:$0xff]  ;;  %v8449_v25 = vld [vmem:[#allocation13_spill] sm:$0xff] }
 0x2d6   : > { %2354 = vmatpush.bf16.xpose.msrb.mxu2 %v2336_v7  ;;  %2447 = vmatpush.bf16.xpose.msrb.mxu3 %v2429_v57  ;;  %v2010_v3 = vpack.c.bf16 %v1216_v17, %v1216_v17  ;;  %v1372_v46 = vadd.f32 %v6457_v62, %v983_v60  ;;  %v2111_v1 = vunpack.c.l.b16 %v2007_v2  ;;  %v2818_v23 = vunpack.c.l.b16 %v2064_v18  ;;  %v969_v7 = vld [vmem:[%s8445_s1 + $0x68] sm:$0xff]  ;;  %v968_v62 = vld [vmem:[%s8445_s1 + $0x60] sm:$0xff]  ;;  %v8451_v17 = vld [vmem:[#allocation17_spill] sm:$0xff] }
 0x2d7   : > { %5079 = vmatmul.msk.bf16.gmra.mxu0 %vm2136_vm9, %v2114_v32  ;;  %5081 = vmatmul.msk.bf16.vlgmr.msra.gmra.mxu1 %vm2136_vm9, %v2206_v16  ;;  %v2819_v32 = vunpack.c.l.b16 %v2065_v24  ;;  %v2827_v52 = vpack.c.b16 %v2821_v31, %v2820_v59  ;;  %v1370_v10 = vadd.f32 %v8447_v14, %v982_v6  ;;  %v2201_v16 = vunpack.c.l.b16 %v2011_v29  ;;  %v1034_v15 = vld [vmem:[%s8445_s1 + $0x270] sm:$0xff]  ;;  %v8452_v60 = vld [vmem:[#allocation15_spill] sm:$0xff]  ;;  %v8453_v59 = vld [vmem:[#allocation18_spill] sm:$0xff] }
 0x2d8   : > { %2850 = vmatpush.bf16.msra.mxu0 %v2829_v54  ;;  %v2110_v4 = vunpack.c.l.b16 %v2006_v30  ;;  %v2200_v48 = vunpack.c.l.b16 %v2010_v3  ;;  %v2019_v55 = vpack.c.bf16 %v1295_v33, %v1295_v33  ;;  %v2027_v61 = vpack.c.bf16 %v1372_v46, %v1372_v46  ;;  %v970_v3 = vld [vmem:[%s8445_s1 + $0x70] sm:$0xff]  ;;  %v1035_v14 = vld [vmem:[%s8445_s1 + $0x278] sm:$0xff] }
 0x2d9   : > { %v2826_v57 = vpack.c.b16 %v2819_v32, %v2818_v23  ;;  %v2026_v21 = vpack.c.bf16 %v1370_v10, %v1370_v10  ;;  %v1223_v22 = vadd.f32 %v8448_v26, %v969_v7  ;;  %v1221_v24 = vadd.f32 %v8449_v25, %v968_v62  ;;  %v1033_v32 = vld [vmem:[%s8445_s1 + $0x268] sm:$0xff]  ;;  %v1028_v25 = vld [vmem:[%s8445_s1 + $0x240] sm:$0xff] }
 0x2da   : > { %v2115_v5 = vpack.c.b16 %v2111_v1, %v2110_v4  ;;  %v2207_v13 = vpack.c.b16 %v2201_v16, %v2200_v48  ;;  %v2294_v31 = vunpack.c.l.b16 %v2019_v55  ;;  %v1300_v2 = vadd.f32 %v8451_v17, %v977_v8  ;;  %v1031_v4 = vld [vmem:[%s8445_s1 + $0x258] sm:$0xff]  ;;  %v1041_v17 = vld [vmem:[%s8445_s1 + $0x2a8] sm:$0xff] }
 0x2db   : > { %v1375_v18 = vadd.f32 %v8452_v60, %v984_v27  ;;  %v1377_v29 = vadd.f32 %v8453_v59, %v985_v34  ;;  %v2013_v6 = vpack.c.bf16 %v1223_v22, %v1223_v22  ;;  %v971_v22 = vld [vmem:[%s8445_s1 + $0x78] sm:$0xff]  ;;  %v1834_v34 = vadd.f32 %v6734_v44, %v1031_v4  ;;  %v8455_v60 = vld [vmem:[#allocation22_spill] sm:$0xff] }
 0x2dc   : > { %2851 = vmatpush.bf16.msra.mxu0 %v2828_v43  ;;  %v6798_v50 = vpop.f32.mrf.mxu2  ;;  %v6800_v53 = vpop.f32.mrf.mxu3 }
 0x2dd   : > { %5085 = vmatmul.msk.bf16.vlgmr.msrb.gmra.mxu2 %vm2136_vm9, %v2299_v51  ;;  %5089 = vmatmul.msk.bf16.vlgmr.msrb.gmra.mxu3 %vm2136_vm9, %v2392_v45  ;;  %v6804_v41 = vpop.f32.mrf.mxu1  ;;  %v8450_v51 = vld [vmem:[#allocation14_spill] sm:$0xff]  ;;  %v2028_v10 = vpack.c.bf16 %v1375_v18, %v1375_v18  ;;  %v2029_v16 = vpack.c.bf16 %v1377_v29, %v1377_v29  ;;  %v6867_v55 = vunpack.c.l.b16 %v2013_v6  ;;  %v6910_v18 = vadd.f32 %v8455_v60, %v971_v22  ;;  %v1037_v22 = vld [vmem:[%s8445_s1 + $0x288] sm:$0xff]  ;;  %v1047_v60 = vld [vmem:[%s8445_s1 + $0x2d8] sm:$0xff] }
 0x2de   : > { %5417 = vmatpush.bf16.msra.mxu2 %v2829_v54  ;;  %v1293_v54 = vadd.f32 %v8446_v28, %v974_v35  ;;  %v1298_v45 = vadd.f32 %v8450_v51, %v976_v63  ;;  %v2386_v35 = vunpack.c.l.b16 %v2026_v21  ;;  %v2021_v28 = vpack.c.bf16 %v1300_v2, %v1300_v2  ;;  %v1030_v63 = vld [vmem:[%s8445_s1 + $0x250] sm:$0xff] }
 0x2df   : > { %v1839_v7 = vadd.f32 %v6804_v41, %v1033_v32  ;;  %v1832_v44 = vadd.f32 %v6690_v36, %v1030_v63  ;;  %v1827_v6 = vadd.f32 %v6614_v58, %v1028_v25 }
 0x2e0   : > { %2852 = vmatpush.bf16.msra.mxu0 %v2827_v52  ;;  %v2018_v20 = vpack.c.bf16 %v1293_v54, %v1293_v54  ;;  %v2020_v23 = vpack.c.bf16 %v1298_v45, %v1298_v45  ;;  %v1032_v54 = vld [vmem:[%s8445_s1 + $0x260] sm:$0xff]  ;;  %v6883_v26 = vunpack.c.l.b16 %v2021_v28 }
 0x2e1   : > { %v1837_v8 = vadd.f32 %v6771_v47, %v1032_v54  ;;  %v6891_v47 = vunpack.c.l.b16 %v2029_v16  ;;  %v1039_v16 = vld [vmem:[%s8445_s1 + $0x298] sm:$0xff] }
 0x2e2   : > { %5418 = vmatpush.bf16.msra.mxu2 %v2828_v43  ;;  %v2387_v43 = vunpack.c.l.b16 %v2027_v61  ;;  %v2293_v30 = vunpack.c.l.b16 %v2018_v20  ;;  %v8454_v61 = vld [vmem:[#allocation19_spill] sm:$0xff]  ;;  %v1042_v20 = vld [vmem:[%s8445_s1 + $0x2b0] sm:$0xff]  ;;  %v6881_v27 = vunpack.c.l.b16 %v2020_v23 }
 0x2e3   : > { %v6870_v62 = vadd.f32 %v8454_v61, %v970_v3  ;;  %v2076_v59 = vpack.c.bf16 %v1837_v8, %v1837_v8  ;;  %v1040_v3 = vld [vmem:[%s8445_s1 + $0x2a0] sm:$0xff]  ;;  %v2072_v8 = vpack.c.bf16 %v1827_v6, %v1827_v6 }
 0x2e4   : > { %2853 = vmatpush.bf16.msra.mxu0 %v2826_v57  ;;  %v6828_v9 = vpop.f32.mrf.mxu2  ;;  %v6830_v19 = vpop.f32.mrf.mxu3  ;;  %v2300_v46 = vpack.c.b16 %v2294_v31, %v2293_v30  ;;  %v2393_v1 = vpack.c.b16 %v2387_v43, %v2386_v35  ;;  %v2077_v31 = vpack.c.bf16 %v1839_v7, %v1839_v7  ;;  %v1043_v35 = vld [vmem:[%s8445_s1 + $0x2b8] sm:$0xff]  ;;  %v2301_v36 = vpack.c.b16 %v6883_v26, %v6881_v27  ;;  %v1050_v7 = vld [vmem:[%s8445_s1 + $0x2f0] sm:$0xff] }
 0x2e5   : > { %v1841_v56 = vpop.f32.mrf.mxu1  ;;  %v2014_v45 = vpack.c.bf16 %v6870_v62, %v6870_v62  ;;  %v1916_v23 = vadd.f32 %v6828_v9, %v1041_v17  ;;  %v2015_v9 = vpack.c.bf16 %v6910_v18, %v6910_v18  ;;  %v2907_v61 = vunpack.c.l.b16 %v2076_v59  ;;  %v8458_v27 = vld [vmem:[#allocation24_spill] sm:$0xff] }
 0x2e6   : > { %5419 = vmatpush.bf16.msra.mxu2 %v2827_v52  ;;  %v2012_v52 = vpack.c.bf16 %v1221_v24, %v1221_v24  ;;  %v1842_v33 = vadd.f32 %v1841_v56, %v1034_v15  ;;  %v6889_v56 = vunpack.c.l.b16 %v2028_v10  ;;  %v1029_v24 = vld [vmem:[%s8445_s1 + $0x248] sm:$0xff]  ;;  %v978_v15 = vld [vmem:[%s8445_s1 + $0xb0] sm:$0xff]  ;;  %v2074_v10 = vpack.c.bf16 %v1832_v44, %v1832_v44 }
 0x2e7   : > { %5080 = vmatmul.msk.bf16.gmra.mxu0 %vm2136_vm9, %v2115_v5  ;;  %5082 = vmatmul.msk.bf16.gmra.mxu1 %vm2136_vm9, %v2207_v13  ;;  %v1829_v32 = vadd.f32 %v6653_v49, %v1029_v24 }
 0x2e8   : > { %v2078_v41 = vpack.c.bf16 %v1842_v33, %v1842_v33  ;;  %v2202_v13 = vunpack.c.l.b16 %v2012_v52  ;;  %v2075_v52 = vpack.c.bf16 %v1834_v34, %v1834_v34  ;;  %v1051_v33 = vld [vmem:[%s8445_s1 + $0x2f8] sm:$0xff]  ;;  %v1911_v34 = vadd.f32 %v6761_v40, %v1039_v16  ;;  %v1036_v40 = vld [vmem:[%s8445_s1 + $0x280] sm:$0xff] }
 0x2e9   : > { %v2905_v25 = vunpack.c.l.b16 %v2074_v10  ;;  %v1044_v16 = vld [vmem:[%s8445_s1 + $0x2c0] sm:$0xff] }
 0x2ea   : > { %5420 = vmatpush.bf16.msra.mxu2 %v2826_v57  ;;  %v2208_v51 = vpack.c.b16 %v6867_v55, %v2202_v13  ;;  %v2909_v29 = vunpack.c.l.b16 %v2078_v41  ;;  %v1038_v55 = vld [vmem:[%s8445_s1 + $0x290] sm:$0xff]  ;;  %v2073_v41 = vpack.c.bf16 %v1829_v32, %v1829_v32 }
 0x2eb   : > { %v1909_v24 = vadd.f32 %v6724_v38, %v1038_v55  ;;  %v8459_v55 = vld [vmem:[#allocation21_spill] sm:$0xff] }
 0x2ec   : > { %v1918_v57 = vpop.f32.mrf.mxu2  ;;  %v6865_v48 = vpop.f32.mrf.mxu3  ;;  %v2904_v38 = vunpack.c.l.b16 %v2073_v41 }
 0x2ed   : > { %5086 = vmatmul.msk.bf16.gmra.mxu2 %vm2136_vm9, %v2300_v46  ;;  %5090 = vmatmul.msk.bf16.gmra.mxu3 %vm2136_vm9, %v2393_v1  ;;  %v1843_v5 = vpop.f32.mrf.mxu1  ;;  %v1919_v2 = vadd.f32 %v1918_v57, %v1042_v20  ;;  %v2394_v46 = vpack.c.b16 %v6891_v47, %v6889_v56  ;;  %v2908_v1 = vunpack.c.l.b16 %v2077_v31  ;;  %v2906_v20 = vunpack.c.l.b16 %v2075_v52  ;;  %v1048_v31 = vld [vmem:[%s8445_s1 + $0x2e0] sm:$0xff] }
 0x2ee   : > { %v1844_v21 = vadd.f32 %v1843_v5, %v1035_v14  ;;  %v8456_v14 = vld [vmem:[#allocation20_spill] sm:$0xff]  ;;  %v1914_v5 = vadd.f32 %v6798_v50, %v1040_v3  ;;  %v2085_v50 = vpack.c.bf16 %v1916_v23, %v1916_v23  ;;  %v1996_v56 = vadd.f32 %v6865_v48, %v1050_v7 }
 0x2ef   : > { %v6929_v49 = vadd.f32 %v8456_v14, %v978_v15  ;;  %v2086_v4 = vpack.c.bf16 %v1919_v2, %v1919_v2  ;;  %v2913_v47 = vpack.c.b16 %v2908_v1, %v2907_v61  ;;  %v1906_v15 = vadd.f32 %v6680_v39, %v1037_v22  ;;  %v8457_v39 = vld [vmem:[#allocation23_spill] sm:$0xff] }
 0x2f0   : > { %v2079_v43 = vpack.c.bf16 %v1844_v21, %v1844_v21  ;;  %v1049_v21 = vld [vmem:[%s8445_s1 + $0x2e8] sm:$0xff]  ;;  %v2084_v17 = vpack.c.bf16 %v1914_v5, %v1914_v5  ;;  %v1991_v6 = vadd.f32 %v6800_v53, %v1048_v31  ;;  %v2993_v32 = vunpack.c.l.b16 %v2085_v50 }
 0x2f1   : > { %v1993_v48 = vadd.f32 %v6830_v19, %v1049_v21  ;;  %v1046_v19 = vld [vmem:[%s8445_s1 + $0x2d0] sm:$0xff]  ;;  %v2094_v52 = vpack.c.bf16 %v1996_v56, %v1996_v56  ;;  %v1904_v1 = vadd.f32 %v6644_v11, %v1036_v40  ;;  %v2082_v23 = vpack.c.bf16 %v1909_v24, %v1909_v24  ;;  %v1045_v53 = vld [vmem:[%s8445_s1 + $0x2c8] sm:$0xff] }
 0x2f2   : > { %v2910_v30 = vunpack.c.l.b16 %v2079_v43  ;;  %v2994_v43 = vunpack.c.l.b16 %v2086_v4  ;;  %v2092_v7 = vpack.c.bf16 %v1991_v6, %v1991_v6  ;;  %v2205_v5 = vunpack.c.l.b16 %v2015_v9 }
 0x2f3   : > { %v2093_v11 = vpack.c.bf16 %v1993_v48, %v1993_v48  ;;  %v1981_v50 = vadd.f32 %v6646_v12, %v1044_v16 }
 0x2f4   : > { %v2914_v28 = vpack.c.b16 %v2910_v30, %v2909_v29  ;;  %v1920_v54 = vpop.f32.mrf.mxu2  ;;  %v1997_v58 = vpop.f32.mrf.mxu3  ;;  %v2912_v29 = vpack.c.b16 %v2906_v20, %v2905_v25  ;;  %v987_v30 = vld [vmem:[%s8445_s1 + $0xf8] sm:$0xff]  ;;  %v3077_v56 = vunpack.c.l.b16 %v2092_v7 }
 0x2f5   : > { %v1921_v57 = vadd.f32 %v1920_v54, %v1043_v35  ;;  %v1998_v63 = vadd.f32 %v1997_v58, %v1051_v33  ;;  %v2083_v35 = vpack.c.bf16 %v1911_v34, %v1911_v34  ;;  %v2903_v33 = vunpack.c.l.b16 %v2072_v8 }
 0x2f6   : > { %2935 = vmatpush.bf16.msrb.mxu1 %v2914_v28  ;;  %5421 = vmatpush.bf16.msra.mxu3 %v2914_v28  ;;  %v986_v28 = vld [vmem:[%s8445_s1 + $0xf0] sm:$0xff]  ;;  %v1988_v54 = vadd.f32 %v6763_v37, %v1047_v60  ;;  %v2992_v58 = vunpack.c.l.b16 %v2084_v17  ;;  %v1382_v26 = vadd.f32 %v8458_v27, %v987_v30  ;;  %v1983_v8 = vadd.f32 %v6682_v42, %v1045_v53 }
 0x2f7   : > { %v2087_v13 = vpack.c.bf16 %v1921_v57, %v1921_v57  ;;  %5083 = vmatmul.msk.bf16.gmra.mxu1 %vm2136_vm9, %v2208_v51  ;;  %v979_v51 = vld [vmem:[%s8445_s1 + $0xb8] sm:$0xff]  ;;  %v2095_v2 = vpack.c.bf16 %v1998_v63, %v1998_v63  ;;  %v2911_v10 = vpack.c.b16 %v2904_v38, %v2903_v33  ;;  %v2991_v4 = vunpack.c.l.b16 %v2083_v35 }
 0x2f8   : > { %v1305_v3 = vadd.f32 %v8457_v39, %v979_v51  ;;  %v3079_v57 = vunpack.c.l.b16 %v2094_v52  ;;  %v2998_v37 = vpack.c.b16 %v2993_v32, %v2992_v58  ;;  %v1380_v61 = vadd.f32 %v8459_v55, %v986_v28 }
 0x2f9   : > { %v2995_v44 = vunpack.c.l.b16 %v2087_v13  ;;  %v3080_v14 = vunpack.c.l.b16 %v2095_v2  ;;  %v2080_v63 = vpack.c.bf16 %v1904_v1, %v1904_v1  ;;  %v2091_v41 = vpack.c.bf16 %v1988_v54, %v1988_v54 }
 0x2fa   : > { %2936 = vmatpush.bf16.msrb.mxu1 %v2913_v47  ;;  %5422 = vmatpush.bf16.msra.mxu3 %v2913_v47  ;;  %v3078_v20 = vunpack.c.l.b16 %v2093_v11  ;;  %v2204_v13 = vunpack.c.l.b16 %v2014_v45  ;;  %v2023_v22 = vpack.c.bf16 %v1305_v3, %v1305_v3  ;;  %v2031_v34 = vpack.c.bf16 %v1382_v26, %v1382_v26 }
 0x2fb   : > { %v2999_v59 = vpack.c.b16 %v2995_v44, %v2994_v43  ;;  %v3084_v21 = vpack.c.b16 %v3080_v14, %v3079_v57  ;;  %v2022_v47 = vpack.c.bf16 %v6929_v49, %v6929_v49  ;;  %v2030_v25 = vpack.c.bf16 %v1380_v61, %v1380_v61 }
 0x2fc   : > { %v2209_v24 = vpack.c.b16 %v2205_v5, %v2204_v13  ;;  %v2988_v31 = vunpack.c.l.b16 %v2080_v63  ;;  %v2089_v43 = vpack.c.bf16 %v1983_v8, %v1983_v8  ;;  %v3076_v44 = vunpack.c.l.b16 %v2091_v41 }
 0x2fd   : > { %5087 = vmatmul.msk.bf16.gmra.mxu2 %vm2136_vm9, %v2301_v36  ;;  %5091 = vmatmul.msk.bf16.gmra.mxu3 %vm2136_vm9, %v2394_v46  ;;  %v2081_v36 = vpack.c.bf16 %v1906_v15, %v1906_v15  ;;  %v1986_v46 = vadd.f32 %v6726_v0, %v1046_v19  ;;  %v2990_v0 = vunpack.c.l.b16 %v2082_v23  ;;  %v3083_v62 = vpack.c.b16 %v3078_v20, %v3077_v56 }
 0x2fe   : > { %3020 = vmatpush.bf16.msrb.mxu2 %v2999_v59  ;;  %2937 = vmatpush.bf16.msrb.mxu1 %v2912_v29  ;;  %v2298_v45 = vunpack.c.l.b16 %v2023_v22  ;;  %v2391_v51 = vunpack.c.l.b16 %v2031_v34  ;;  %v2088_v12 = vpack.c.bf16 %v1981_v50, %v1981_v50  ;;  %v2297_v48 = vunpack.c.l.b16 %v2022_v47 }
 0x2ff   : > { %5423 = vmatpush.bf16.msra.mxu3 %v2912_v29  ;;  %v2989_v18 = vunpack.c.l.b16 %v2081_v36  ;;  %v2090_v9 = vpack.c.bf16 %v1986_v46, %v1986_v46  ;;  %v2997_v42 = vpack.c.b16 %v2991_v4, %v2990_v0  ;;  %v2390_v2 = vunpack.c.l.b16 %v2030_v25 }
 0x300   : > { %v3074_v38 = vunpack.c.l.b16 %v2089_v43  ;;  %v2302_v15 = vpack.c.b16 %v2298_v45, %v2297_v48  ;;  %v3073_v59 = vunpack.c.l.b16 %v2088_v12 }
 0x301   : > { %v3075_v40 = vunpack.c.l.b16 %v2090_v9  ;;  %v2996_v17 = vpack.c.b16 %v2989_v18, %v2988_v31  ;;  %v2395_v60 = vpack.c.b16 %v2391_v51, %v2390_v2 }
 0x302   : > { %3021 = vmatpush.bf16.msrb.mxu2 %v2998_v37  ;;  %2938 = vmatpush.bf16.msrb.mxu1 %v2911_v10  ;;  %v3081_v29 = vpack.c.b16 %v3074_v38, %v3073_v59 }
 0x303   : > { %5424 = vmatpush.bf16.msra.mxu3 %v2911_v10  ;;  %v3082_v49 = vpack.c.b16 %v3076_v44, %v3075_v40 }
 0x306   : > { %3022 = vmatpush.bf16.msrb.mxu2 %v2997_v42 }
 0x307   : > { %3105 = vmatpush.bf16.msrb.mxu3 %v3084_v21  ;;  %5084 = vmatmul.msk.bf16.gmra.mxu1 %vm2136_vm9, %v2209_v24 }
 0x30a   : > { %3023 = vmatpush.bf16.msrb.mxu2 %v2996_v17 }
 0x30b   : > { %3106 = vmatpush.bf16.msrb.mxu3 %v3083_v62 }
 0x30d   : > { %5088 = vmatmul.msk.bf16.gmra.mxu2 %vm2136_vm9, %v2302_v15  ;;  %5092 = vmatmul.msk.bf16.gmra.mxu3 %vm2136_vm9, %v2395_v60 }
 0x30f   : > { %3107 = vmatpush.bf16.msrb.mxu3 %v3082_v49 }
 0x313   : > { %3108 = vmatpush.bf16.msrb.mxu3 %v3081_v29 }
 0x333   : > { %v7007_v30 = vpop.f32.mrf.mxu0 }
 0x334   : > { %v2470_v25 = vsel %vm2469_vm10, %v7007_v30, -inf }
 0x33b   : > { %v7009_v19 = vpop.f32.mrf.mxu0 }
 0x33c   : > { %v2473_v12 = vsel %vm2469_vm10, %v7009_v19, -inf }
 0x344   : > { %v7011_v35 = vpop.f32.mrf.mxu0 }
 0x345   : > { %v2476_v51 = vsel %vm2469_vm10, %v7011_v35, -inf }
 0x34c   : > { %v7013_v6 = vpop.f32.mrf.mxu0 }
 0x34d   : > { %v2479_v49 = vsel %vm2469_vm10, %v7013_v6, -inf }
 0x354   : > { %v7015_v32 = vpop.f32.mrf.mxu0  ;;  %v7017_v52 = vpop.f32.mrf.mxu1 }
 0x355   : > { %v2494_v4 = vsel %vm2469_vm10, %v7017_v52, -inf  ;;  %v2482_v29 = vsel %vm2469_vm10, %v7015_v32, -inf }
 0x35c   : > { %v7019_v39 = vpop.f32.mrf.mxu0  ;;  %v7021_v3 = vpop.f32.mrf.mxu1 }
 0x35d   : > { %v2497_v47 = vsel %vm2469_vm10, %v7021_v3, -inf  ;;  %v2485_v17 = vsel %vm2469_vm10, %v7019_v39, -inf }
 0x360   : > { %v7023_v33 = vpop.f32.mrf.mxu2  ;;  %v7025_v1 = vpop.f32.mrf.mxu3 }
 0x361   : > { %v2542_v23 = vsel %vm2469_vm10, %v7025_v1, -inf  ;;  %v2518_v28 = vsel %vm2469_vm10, %v7023_v33, -inf }
 0x362   : > { %2543 = vmax.xlane.f32.xlu1 %v2542_v23  ;;  %2519 = vmax.xlane.f32.xlu2 %v2518_v28 }
 0x364   : > { %v7031_v53 = vpop.f32.mrf.mxu0  ;;  %v7033_v54 = vpop.f32.mrf.mxu1 }
 0x365   : > { %v2488_v26 = vsel %vm2469_vm10, %v7031_v53, -inf  ;;  %v2500_v42 = vsel %vm2469_vm10, %v7033_v54, -inf }
 0x368   : > { %v7035_v58 = vpop.f32.mrf.mxu2  ;;  %v7037_v11 = vpop.f32.mrf.mxu3 }
 0x369   : > { %v2545_v14 = vsel %vm2469_vm10, %v7037_v11, -inf  ;;  %v2521_v27 = vsel %vm2469_vm10, %v7035_v58, -inf }
 0x36a   : > { %2546 = vmax.xlane.f32.xlu2 %v2545_v14  ;;  %2522 = vmax.xlane.f32.xlu0 %v2521_v27 }
 0x36b   : > { %2489 = vmax.xlane.f32.xlu1 %v2488_v26 }
 0x36c   : > { %v7045_v36 = vpop.f32.mrf.mxu1  ;;  %v7047_v46 = vpop.f32.mrf.mxu0 }
 0x36d   : > { %v2491_v7 = vsel %vm2469_vm10, %v7047_v46, -inf  ;;  %v2503_v45 = vsel %vm2469_vm10, %v7045_v36, -inf }
 0x370   : > { %v7049_v10 = vpop.f32.mrf.mxu2  ;;  %v7051_v16 = vpop.f32.mrf.mxu3 }
 0x371   : > { %v2524_v55 = vsel %vm2469_vm10, %v7049_v10, -inf  ;;  %v2548_v31 = vsel %vm2469_vm10, %v7051_v16, -inf }
 0x372   : > { %2495 = vmax.xlane.f32.xlu0 %v2494_v4  ;;  %2492 = vmax.xlane.f32.xlu2 %v2491_v7 }
 0x374   : > { %v7057_v57 = vpop.f32.mrf.mxu1 }
 0x375   : > { %v2506_v62 = vsel %vm2469_vm10, %v7057_v57, -inf }
 0x378   : > { %v7059_v37 = vpop.f32.mrf.mxu2  ;;  %v7063_v61 = vpop.f32.mrf.mxu3 }
 0x379   : > { %v2551_v8 = vsel %vm2469_vm10, %v7063_v61, -inf  ;;  %v2527_v34 = vsel %vm2469_vm10, %v7059_v37, -inf }
 0x37a   : > { %2525 = vmax.xlane.f32.xlu2 %v2524_v55 }
 0x37c   : > { %v7065_v5 = vpop.f32.mrf.mxu1 }
 0x37d   : > { %v2509_v38 = vsel %vm2469_vm10, %v7065_v5, -inf }
 0x380   : > { %v7067_v63 = vpop.f32.mrf.mxu2  ;;  %v7071_v0 = vpop.f32.mrf.mxu3 }
 0x381   : > { %v2530_v21 = vsel %vm2469_vm10, %v7067_v63, -inf  ;;  %v2554_v40 = vsel %vm2469_vm10, %v7071_v0, -inf }
 0x382   : > { %2552 = vmax.xlane.f32.xlu2 %v2551_v8 }
 0x384   : > { %v7073_v41 = vpop.f32.mrf.mxu1 }
 0x385   : > { %v2512_v20 = vsel %vm2469_vm10, %v7073_v41, -inf }
 0x386   : > { %2513 = vmax.xlane.f32.xlu0 %v2512_v20 }
 0x388   : > { %v7079_v13 = vpop.f32.mrf.mxu2  ;;  %v7087_v18 = vpop.f32.mrf.mxu3 }
 0x389   : > { %v2557_v9 = vsel %vm2469_vm10, %v7087_v18, -inf  ;;  %v2533_v24 = vsel %vm2469_vm10, %v7079_v13, -inf }
 0x38a   : > { %2531 = vmax.xlane.f32.xlu2 %v2530_v21 }
 0x38c   : > { %v7081_v22 = vpop.f32.mrf.mxu1 }
 0x38d   : > { %v2515_v50 = vsel %vm2469_vm10, %v7081_v22, -inf }
 0x38e   : > { %2528 = vmax.xlane.f32.xlu0 %v2527_v34  ;;  %2516 = vmax.xlane.f32.xlu1 %v2515_v50 }
 0x390   : > { %v7091_v56 = vpop.f32.mrf.mxu2  ;;  %v7119_v48 = vpop.f32.mrf.mxu3 }
 0x391   : > { %v2560_v2 = vsel %vm2469_vm10, %v7119_v48, -inf  ;;  %v2536_v15 = vsel %vm2469_vm10, %v7091_v56, -inf }
 0x392   : > { %2558 = vmax.xlane.f32.xlu2 %v2557_v9 }
 0x396   : > { %2501 = vmax.xlane.f32.xlu0 %v2500_v42  ;;  %2498 = vmax.xlane.f32.xlu1 %v2497_v47 }
 0x398   : > { %v7103_v43 = vpop.f32.mrf.mxu2  ;;  %v7129_v60 = vpop.f32.mrf.mxu3 }
 0x399   : > { %v2539_v44 = vsel %vm2469_vm10, %v7103_v43, -inf  ;;  %v2563_v59 = vsel %vm2469_vm10, %v7129_v60, -inf }
 0x39a   : > { %2471 = vmax.xlane.f32.xlu2 %v2470_v25 }
 0x39e   : > { %2534 = vmax.xlane.f32.xlu0 %v2533_v24  ;;  %2549 = vmax.xlane.f32.xlu1 %v2548_v31 }
 0x3a2   : > { %2540 = vmax.xlane.f32.xlu2 %v2539_v44 }
 0x3a6   : > { %2507 = vmax.xlane.f32.xlu0 %v2506_v62  ;;  %2504 = vmax.xlane.f32.xlu1 %v2503_v45 }
 0x3aa   : > { %2477 = vmax.xlane.f32.xlu2 %v2476_v51 }
 0x3ae   : > { %2474 = vmax.xlane.f32.xlu0 %v2473_v12  ;;  %2555 = vmax.xlane.f32.xlu1 %v2554_v40 }
 0x3b2   : > { %2486 = vmax.xlane.f32.xlu2 %v2485_v17 }
 0x3b6   : > { %2561 = vmax.xlane.f32.xlu0 %v2560_v2  ;;  %2510 = vmax.xlane.f32.xlu1 %v2509_v38 }
 0x3be   : > { %2480 = vmax.xlane.f32.xlu0 %v2479_v49  ;;  %2537 = vmax.xlane.f32.xlu1 %v2536_v15 }
 0x3c6   : > { %2564 = vmax.xlane.f32.xlu1 %v2563_v59 }
 0x3ce   : > { %2483 = vmax.xlane.f32.xlu1 %v2482_v29 }
 0x3d5   : > { %v7135_v23 = vpop.xlane.xlu1 %2543  ;;  %v2520_v28 = vpop.xlane.xlu2 %2519 }
 0x3d6   : > { %v2582_v9 = vsub.f32 %v7023_v33, %v2520_v28 }
 0x3d8   : > { %v2630_v24 = vmul.f32 1.442695, %v2582_v9 }
 0x3dd   : > { %v7137_v14 = vpop.xlane.xlu2 %2546  ;;  %v2523_v8 = vpop.xlane.xlu0 %2522 }
 0x3de   : > { %v2490_v27 = vpop.xlane.xlu1 %2489  ;;  %v2583_v34 = vsub.f32 %v7035_v58, %v2523_v8 }
 0x3df   : > { %v2572_v26 = vsub.f32 %v7031_v53, %v2490_v27 }
 0x3e0   : > { %v2632_v53 = vmul.f32 1.442695, %v2583_v34 }
 0x3e1   : > { %v2610_v4 = vmul.f32 1.442695, %v2572_v26 }
 0x3e3   : > { %5557 = vpow2.f32 %v2610_v4 }
 0x3e5   : > { %v2493_v7 = vpop.xlane.xlu2 %2492  ;;  %v2496_v25 = vpop.xlane.xlu0 %2495 }
 0x3e6   : > { %v2573_v55 = vsub.f32 %v7047_v46, %v2493_v7  ;;  %v2574_v26 = vsub.f32 %v7017_v52, %v2496_v25 }
 0x3e8   : > { %v2612_v20 = vmul.f32 1.442695, %v2573_v55 }
 0x3e9   : > { %v7141_v21 = vpop.eup %5557 }
 0x3ea   : > { %5559 = vpow2.f32 %v2612_v20  ;;  %v2764_v42 = vpack.c.bf16 %v7141_v21, %v7141_v21  ;;  %v2614_v20 = vmul.f32 1.442695, %v2574_v26 }
 0x3eb   : > { %5561 = vpow2.f32 %v2632_v53 }
 0x3ec   : > { %v2804_v31 = vunpack.c.l.b16 %v2764_v42  ;;  %5563 = vpow2.f32 %v2630_v24  ;;  %v2590_v42 = vsub.f32 %v7025_v1, %v7135_v23 }
 0x3ed   : > { %v2526_v50 = vpop.xlane.xlu2 %2525 }
 0x3ee   : > { %v2584_v40 = vsub.f32 %v7049_v10, %v2526_v50  ;;  %v2646_v1 = vmul.f32 1.442695, %v2590_v42 }
 0x3f0   : > { %v7147_v47 = vpop.eup %5559  ;;  %v2634_v15 = vmul.f32 1.442695, %v2584_v40 }
 0x3f1   : > { %v2765_v46 = vpack.c.bf16 %v7147_v47, %v7147_v47  ;;  %v7154_v45 = vpop.eup %5561 }
 0x3f2   : > { %v7157_v12 = vpop.eup %5563  ;;  %v2775_v2 = vpack.c.bf16 %v7154_v45, %v7154_v45 }
 0x3f3   : > { %v2805_v44 = vunpack.c.l.b16 %v2765_v46  ;;  %v2774_v49 = vpack.c.bf16 %v7157_v12, %v7157_v12 }
 0x3f4   : > { %v2969_v28 = vunpack.c.l.b16 %v2775_v2 }
 0x3f5   : > { %v7151_v62 = vpop.xlane.xlu2 %2552  ;;  %v2809_v58 = vpack.c.b16 %v2805_v44, %v2804_v31  ;;  %v2968_v10 = vunpack.c.l.b16 %v2774_v49 }
 0x3f7   : > { %5096 = vmatmul.msk.bf16.vlgmr.msra.gmra.mxu2 %vm2469_vm10, %v2809_v58  ;;  %v2976_v8 = vpack.c.b16 %v2969_v28, %v2968_v10 }
 0x3f9   : > { %v2514_v33 = vpop.xlane.xlu0 %2513 }
 0x3fa   : > { %v2580_v51 = vsub.f32 %v7073_v41, %v2514_v33 }
 0x3fc   : > { %v2626_v38 = vmul.f32 1.442695, %v2580_v51 }
 0x3fd   : > { %v2532_v17 = vpop.xlane.xlu2 %2531 }
 0x3fe   : > { %5565 = vpow2.f32 %v2626_v38  ;;  %v2586_v23 = vsub.f32 %v7067_v63, %v2532_v17 }
 0x3ff   : > { %5567 = vpow2.f32 %v2634_v15 }
 0x401   : > { %v2529_v59 = vpop.xlane.xlu0 %2528  ;;  %v2517_v29 = vpop.xlane.xlu1 %2516 }
 0x402   : > { %v2585_v27 = vsub.f32 %v7059_v37, %v2529_v59  ;;  %v2581_v41 = vsub.f32 %v7081_v22, %v2517_v29  ;;  %v2591_v37 = vsub.f32 %v7037_v11, %v7137_v14  ;;  %v2638_v29 = vmul.f32 1.442695, %v2586_v23 }
 0x404   : > { %v2636_v4 = vmul.f32 1.442695, %v2585_v27  ;;  %v2628_v7 = vmul.f32 1.442695, %v2581_v41  ;;  %v7170_v34 = vpop.eup %5565  ;;  %v2648_v31 = vmul.f32 1.442695, %v2591_v37 }
 0x405   : > { %v7167_v55 = vpop.xlane.xlu2 %2558  ;;  %v7175_v9 = vpop.eup %5567  ;;  %v2772_v25 = vpack.c.bf16 %v7170_v34, %v7170_v34 }
 0x406   : > { %5569 = vpow2.f32 %v2636_v4  ;;  %v2776_v58 = vpack.c.bf16 %v7175_v9, %v7175_v9 }
 0x407   : > { %5571 = vpow2.f32 %v2628_v7  ;;  %5101 = vmatmul.msk.bf16.vlgmr.msrb.gmra.mxu2 %vm2469_vm10, %v2976_v8  ;;  %v2889_v33 = vunpack.c.l.b16 %v2772_v25 }
 0x408   : > { %5573 = vpow2.f32 %v2614_v20  ;;  %v2970_v28 = vunpack.c.l.b16 %v2776_v58 }
 0x409   : > { %v2502_v22 = vpop.xlane.xlu0 %2501  ;;  %v2499_v52 = vpop.xlane.xlu1 %2498 }
 0x40a   : > { %v2575_v50 = vsub.f32 %v7021_v3, %v2499_v52  ;;  %v2576_v63 = vsub.f32 %v7033_v54, %v2502_v22 }
 0x40c   : > { %v7179_v53 = vpop.eup %5569  ;;  %v2616_v46 = vmul.f32 1.442695, %v2575_v50  ;;  %v2618_v54 = vmul.f32 1.442695, %v2576_v63 }
 0x40d   : > { %v7183_v24 = vpop.eup %5571  ;;  %v2472_v11 = vpop.xlane.xlu2 %2471  ;;  %v2777_v14 = vpack.c.bf16 %v7179_v53, %v7179_v53 }
 0x40e   : > { %v2773_v3 = vpack.c.bf16 %v7183_v24, %v7183_v24  ;;  %v2566_v44 = vsub.f32 %v7007_v30, %v2472_v11  ;;  %5575 = vpow2.f32 %v2616_v46  ;;  %v7193_v2 = vpop.eup %5573  ;;  %v2593_v11 = vsub.f32 %v7063_v61, %v7151_v62 }
 0x40f   : > { %5577 = vpow2.f32 %v2648_v31  ;;  %v2971_v15 = vunpack.c.l.b16 %v2777_v14  ;;  %v2766_v17 = vpack.c.bf16 %v7193_v2, %v7193_v2 }
 0x410   : > { %v2890_v51 = vunpack.c.l.b16 %v2773_v3  ;;  %v2598_v40 = vmul.f32 1.442695, %v2566_v44  ;;  %v2652_v61 = vmul.f32 1.442695, %v2593_v11 }
 0x411   : > { %v2535_v38 = vpop.xlane.xlu0 %2534  ;;  %v2550_v49 = vpop.xlane.xlu1 %2549  ;;  %v2883_v8 = vunpack.c.l.b16 %v2766_v17 }
 0x412   : > { %v2894_v59 = vpack.c.b16 %v2890_v51, %v2889_v33  ;;  %5579 = vpow2.f32 %v2598_v40  ;;  %v2587_v30 = vsub.f32 %v7079_v13, %v2535_v38  ;;  %v2977_v13 = vpack.c.b16 %v2971_v15, %v2970_v28 }
 0x413   : > { %5581 = vpow2.f32 %v2646_v1  ;;  %v2592_v22 = vsub.f32 %v7051_v16, %v2550_v49 }
 0x414   : > { %v2640_v27 = vmul.f32 1.442695, %v2587_v30  ;;  %5100 = vmatmul.msk.bf16.vlgmr.msra.gmra.mxu3 %vm2469_vm10, %v2894_v59  ;;  %v7200_v41 = vpop.eup %5575 }
 0x415   : > { %v7202_v26 = vpop.xlane.xlu2 %2540  ;;  %v2767_v10 = vpack.c.bf16 %v7200_v41, %v7200_v41  ;;  %v7206_v4 = vpop.eup %5577  ;;  %v2650_v1 = vmul.f32 1.442695, %v2592_v22 }
 0x416   : > { %5583 = vpow2.f32 %v2640_v27  ;;  %v2783_v25 = vpack.c.bf16 %v7206_v4, %v7206_v4 }
 0x417   : > { %5585 = vpow2.f32 %v2638_v29  ;;  %v2884_v20 = vunpack.c.l.b16 %v2767_v10  ;;  %5102 = vmatmul.msk.bf16.gmra.mxu2 %vm2469_vm10, %v2977_v13 }
 0x418   : > { %v7208_v7 = vpop.eup %5579  ;;  %5587 = vpow2.f32 %v2618_v54  ;;  %v3054_v58 = vunpack.c.l.b16 %v2783_v25 }
 0x419   : > { %v7211_v37 = vpop.eup %5581  ;;  %v2508_v52 = vpop.xlane.xlu0 %2507  ;;  %v2662_v42 = vsel %vm2469_vm10, %v7208_v7, 0.0  ;;  %v2891_v46 = vpack.c.b16 %v2884_v20, %v2883_v8 }
 0x41a   : > { %v2505_v50 = vpop.xlane.xlu1 %2504  ;;  %2663 = vadd.xlane.f32.xlu0 %v2662_v42  ;;  %v2782_v16 = vpack.c.bf16 %v7211_v37, %v7211_v37 }
 0x41b   : > { %v2577_v31 = vsub.f32 %v7045_v36, %v2505_v50  ;;  %5097 = vmatmul.msk.bf16.vlgmr.msrb.gmra.mxu1 %vm2469_vm10, %v2891_v46  ;;  %v2595_v46 = vsub.f32 %v7087_v18, %v7167_v55 }
 0x41c   : > { %v7221_v14 = vpop.eup %5583  ;;  %v3053_v62 = vunpack.c.l.b16 %v2782_v16 }
 0x41d   : > { %v2620_v3 = vmul.f32 1.442695, %v2577_v31  ;;  %v7226_v44 = vpop.eup %5585  ;;  %v2478_v23 = vpop.xlane.xlu2 %2477  ;;  %v2779_v36 = vpack.c.bf16 %v7221_v14, %v7221_v14 }
 0x41e   : > { %v2568_v33 = vsub.f32 %v7011_v35, %v2478_v23  ;;  %v2778_v51 = vpack.c.bf16 %v7226_v44, %v7226_v44  ;;  %v7233_v38 = vpop.eup %5587  ;;  %v3061_v59 = vpack.c.b16 %v3054_v58, %v3053_v62  ;;  %v2578_v35 = vsub.f32 %v7057_v57, %v2508_v52 }
 0x41f   : > { %5589 = vpow2.f32 %v2620_v3  ;;  %v2973_v30 = vunpack.c.l.b16 %v2779_v36  ;;  %v2768_v17 = vpack.c.bf16 %v7233_v38, %v7233_v38  ;;  %v2758_v3 = vpack.c.bf16 %v7208_v7, %v7208_v7 }
 0x420   : > { %v2602_v40 = vmul.f32 1.442695, %v2568_v33  ;;  %5591 = vpow2.f32 %v2650_v1  ;;  %v2972_v63 = vunpack.c.l.b16 %v2778_v51  ;;  %v2656_v36 = vmul.f32 1.442695, %v2595_v46 }
 0x421   : > { %v2475_v49 = vpop.xlane.xlu0 %2474  ;;  %v2885_v57 = vunpack.c.l.b16 %v2768_v17 }
 0x422   : > { %v2556_v15 = vpop.xlane.xlu1 %2555  ;;  %5593 = vpow2.f32 %v2602_v40  ;;  %v2567_v29 = vsub.f32 %v7009_v19, %v2475_v49  ;;  %v2978_v13 = vpack.c.b16 %v2973_v30, %v2972_v63  ;;  %v2622_v19 = vmul.f32 1.442695, %v2578_v35 }
 0x423   : > { %5595 = vpow2.f32 %v2652_v61  ;;  %v2594_v52 = vsub.f32 %v7071_v0, %v2556_v15  ;;  %v2589_v0 = vsub.f32 %v7103_v43, %v7202_v26  ;;  %v2798_v61 = vunpack.c.l.b16 %v2758_v3 }
 0x424   : > { %v2600_v28 = vmul.f32 1.442695, %v2567_v29  ;;  %5105 = vmatmul.msk.bf16.vlgmr.msrb.gmra.mxu3 %vm2469_vm10, %v3061_v59 }
 0x425   : > { %v7240_v27 = vpop.eup %5589  ;;  %v2654_v55 = vmul.f32 1.442695, %v2594_v52  ;;  %v2644_v7 = vmul.f32 1.442695, %v2589_v0 }
 0x426   : > { %v2769_v10 = vpack.c.bf16 %v7240_v27, %v7240_v27  ;;  %5597 = vpow2.f32 %v2600_v28  ;;  %v7244_v54 = vpop.eup %5591  ;;  %v2734_v28 = vsel %vm2469_vm10, %v7211_v37, 0.0 }
 0x427   : > { %5103 = vmatmul.msk.bf16.gmra.mxu2 %vm2469_vm10, %v2978_v13  ;;  %v2784_v31 = vpack.c.bf16 %v7244_v54, %v7244_v54  ;;  %5599 = vpow2.f32 %v2622_v19 }
 0x428   : > { %v7246_v8 = vpop.eup %5593  ;;  %v2886_v20 = vunpack.c.l.b16 %v2769_v10  ;;  %v2487_v10 = vpop.xlane.xlu2 %2486 }
 0x429   : > { %v7249_v22 = vpop.eup %5595  ;;  %v7252_v50 = vpop.xlane.xlu0 %2561  ;;  %v2668_v25 = vsel %vm2469_vm10, %v7246_v8, 0.0  ;;  %v3055_v33 = vunpack.c.l.b16 %v2784_v31  ;;  %v2760_v31 = vpack.c.bf16 %v7246_v8, %v7246_v8 }
 0x42a   : > { %v2511_v42 = vpop.xlane.xlu1 %2510  ;;  %2669 = vadd.xlane.f32.xlu2 %v2668_v25  ;;  %v2892_v16 = vpack.c.b16 %v2886_v20, %v2885_v57  ;;  %v2785_v23 = vpack.c.bf16 %v7249_v22, %v7249_v22  ;;  %v2571_v25 = vsub.f32 %v7019_v39, %v2487_v10 }
 0x42b   : > { %v2579_v11 = vsub.f32 %v7065_v5, %v2511_v42 }
 0x42c   : > { %v5598_v1 = vpop.eup %5597  ;;  %5098 = vmatmul.msk.bf16.gmra.mxu1 %vm2469_vm10, %v2892_v16  ;;  %v3056_v43 = vunpack.c.l.b16 %v2785_v23 }
 0x42d   : > { %v2624_v58 = vmul.f32 1.442695, %v2579_v11  ;;  %v2759_v18 = vpack.c.bf16 %v5598_v1, %v5598_v1  ;;  %v2665_v5 = vsel %vm2469_vm10, %v5598_v1, 0.0  ;;  %v7269_v26 = vpop.eup %5599  ;;  %v2596_v11 = vsub.f32 %v7119_v48, %v7252_v50 }
 0x42e   : > { %2666 = vadd.xlane.f32.xlu1 %v2665_v5  ;;  %v3062_v30 = vpack.c.b16 %v3056_v43, %v3055_v33  ;;  %v2770_v29 = vpack.c.bf16 %v7269_v26, %v7269_v26  ;;  %v2800_v50 = vunpack.c.l.b16 %v2760_v31 }
 0x42f   : > { %v2799_v62 = vunpack.c.l.b16 %v2759_v18  ;;  %5601 = vpow2.f32 %v2624_v58  ;;  %v2608_v18 = vmul.f32 1.442695, %v2571_v25 }
 0x430   : > { %5603 = vpow2.f32 %v2654_v55  ;;  %v2887_v19 = vunpack.c.l.b16 %v2770_v29  ;;  %v2658_v55 = vmul.f32 1.442695, %v2596_v11  ;;  %v2692_v11 = vsel %vm2469_vm10, %v7233_v38, 0.0 }
 0x431   : > { %v2806_v51 = vpack.c.b16 %v2799_v62, %v2798_v61  ;;  %v2481_v40 = vpop.xlane.xlu0 %2480  ;;  %5605 = vpow2.f32 %v2656_v36 }
 0x432   : > { %v2538_v49 = vpop.xlane.xlu1 %2537  ;;  %v2569_v15 = vsub.f32 %v7013_v6, %v2481_v40  ;;  %5607 = vpow2.f32 %v2644_v7 }
 0x433   : > { %v2588_v59 = vsub.f32 %v7091_v56, %v2538_v49  ;;  %5093 = vmatmul.msk.bf16.vlgmr.msra.gmra.mxu0 %vm2469_vm10, %v2806_v51  ;;  %v2689_v49 = vsel %vm2469_vm10, %v7200_v41, 0.0  ;;  %v2686_v41 = vsel %vm2469_vm10, %v7193_v2, 0.0  ;;  %v2719_v2 = vsel %vm2469_vm10, %v7179_v53, 0.0 }
 0x434   : > { %v2604_v35 = vmul.f32 1.442695, %v2569_v15  ;;  %5106 = vmatmul.msk.bf16.gmra.mxu3 %vm2469_vm10, %v3062_v30  ;;  %v2713_v15 = vsel %vm2469_vm10, %v7154_v45, 0.0  ;;  %v2725_v53 = vsel %vm2469_vm10, %v7221_v14, 0.0  ;;  %v2698_v14 = vsel %vm2469_vm10, %v7269_v26, 0.0 }
 0x435   : > { %v2642_v63 = vmul.f32 1.442695, %v2588_v59  ;;  %v7277_v17 = vpop.eup %5601  ;;  %v2704_v26 = vsel %vm2469_vm10, %v7170_v34, 0.0 }
 0x436   : > { %v2771_v6 = vpack.c.bf16 %v7277_v17, %v7277_v17  ;;  %5609 = vpow2.f32 %v2604_v35  ;;  %2735 = vadd.xlane.f32.xlu1 %v2734_v28  ;;  %v5604_v56 = vpop.eup %5603  ;;  %v2701_v38 = vsel %vm2469_vm10, %v7277_v17, 0.0 }
 0x437   : > { %5611 = vpow2.f32 %v2642_v63  ;;  %v7283_v13 = vpop.eup %5605  ;;  %v2786_v42 = vpack.c.bf16 %v5604_v56, %v5604_v56  ;;  %v2746_v10 = vsel %vm2469_vm10, %v5604_v56, 0.0  ;;  %v2695_v56 = vsel %vm2469_vm10, %v7240_v27, 0.0 }
 0x438   : > { %v2888_v57 = vunpack.c.l.b16 %v2771_v6  ;;  %v7285_v20 = vpop.eup %5607  ;;  %v2787_v3 = vpack.c.bf16 %v7283_v13, %v7283_v13  ;;  %v2749_v17 = vsel %vm2469_vm10, %v7283_v13, 0.0 }
 0x439   : > { %v2781_v0 = vpack.c.bf16 %v7285_v20, %v7285_v20  ;;  %v3057_v58 = vunpack.c.l.b16 %v2786_v42 }
 0x43a   : > { %v2565_v52 = vpop.xlane.xlu1 %2564  ;;  %v2893_v46 = vpack.c.b16 %v2888_v57, %v2887_v19  ;;  %v3058_v36 = vunpack.c.l.b16 %v2787_v3 }
 0x43b   : > { %v2597_v37 = vsub.f32 %v7129_v60, %v2565_v52  ;;  %v2740_v60 = vsel %vm2469_vm10, %v7244_v54, 0.0  ;;  %v2975_v33 = vunpack.c.l.b16 %v2781_v0  ;;  %v2722_v0 = vsel %vm2469_vm10, %v7226_v44, 0.0 }
 0x43c   : > { %v5610_v16 = vpop.eup %5609  ;;  %5099 = vmatmul.msk.bf16.gmra.mxu1 %vm2469_vm10, %v2893_v46  ;;  %v3063_v51 = vpack.c.b16 %v3058_v36, %v3057_v58  ;;  %v2710_v46 = vsel %vm2469_vm10, %v7157_v12, 0.0  ;;  %v2716_v12 = vsel %vm2469_vm10, %v7175_v9, 0.0  ;;  %v2707_v9 = vsel %vm2469_vm10, %v7183_v24, 0.0 }
 0x43d   : > { %v5612_v1 = vpop.eup %5611  ;;  %v2761_v39 = vpack.c.bf16 %v5610_v16, %v5610_v16  ;;  %v2660_v23 = vmul.f32 1.442695, %v2597_v37  ;;  %v2671_v8 = vsel %vm2469_vm10, %v5610_v16, 0.0  ;;  %v2737_v16 = vsel %vm2469_vm10, %v7206_v4, 0.0 }
 0x43e   : > { %v2780_v48 = vpack.c.bf16 %v5612_v1, %v5612_v1  ;;  %2741 = vadd.xlane.f32.xlu1 %v2740_v60  ;;  %2672 = vadd.xlane.f32.xlu0 %v2671_v8  ;;  %v2728_v31 = vsel %vm2469_vm10, %v5612_v1, 0.0  ;;  %v2743_v4 = vsel %vm2469_vm10, %v7249_v22, 0.0  ;;  %v2731_v22 = vsel %vm2469_vm10, %v7285_v20, 0.0 }
 0x43f   : > { %v2801_v5 = vunpack.c.l.b16 %v2761_v39  ;;  %5613 = vpow2.f32 %v2660_v23 }
 0x440   : > { %v2974_v61 = vunpack.c.l.b16 %v2780_v48  ;;  %5615 = vpow2.f32 %v2608_v18 }
 0x441   : > { %v2807_v62 = vpack.c.b16 %v2801_v5, %v2800_v50  ;;  %5617 = vpow2.f32 %v2658_v55 }
 0x442   : > { %v2484_v7 = vpop.xlane.xlu1 %2483  ;;  %v2979_v54 = vpack.c.b16 %v2975_v33, %v2974_v61 }
 0x443   : > { %v2570_v43 = vsub.f32 %v7015_v32, %v2484_v7  ;;  %5094 = vmatmul.msk.bf16.gmra.mxu0 %vm2469_vm10, %v2807_v62 }
 0x444   : > { %5104 = vmatmul.msk.bf16.gmra.mxu2 %vm2469_vm10, %v2979_v54  ;;  %5107 = vmatmul.msk.bf16.gmra.mxu3 %vm2469_vm10, %v3063_v51 }
 0x445   : > { %v2606_v40 = vmul.f32 1.442695, %v2570_v43  ;;  %v5614_v32 = vpop.eup %5613 }
 0x446   : > { %2690 = vadd.xlane.f32.xlu1 %v2689_v49  ;;  %2714 = vadd.xlane.f32.xlu0 %v2713_v15  ;;  %v7309_v59 = vpop.eup %5615  ;;  %v2789_v29 = vpack.c.bf16 %v5614_v32, %v5614_v32  ;;  %v2755_v27 = vsel %vm2469_vm10, %v5614_v32, 0.0 }
 0x447   : > { %5619 = vpow2.f32 %v2606_v40  ;;  %v5618_v30 = vpop.eup %5617  ;;  %v2763_v35 = vpack.c.bf16 %v7309_v59, %v7309_v59 }
 0x448   : > { %v2788_v28 = vpack.c.bf16 %v5618_v30, %v5618_v30  ;;  %v3060_v19 = vunpack.c.l.b16 %v2789_v29  ;;  %v2752_v3 = vsel %vm2469_vm10, %v5618_v30, 0.0 }
 0x449   : > { %v2803_v57 = vunpack.c.l.b16 %v2763_v35 }
 0x44a   : > { %v3059_v42 = vunpack.c.l.b16 %v2788_v28 }
 0x44c   : > { %v3064_v37 = vpack.c.b16 %v3060_v19, %v3059_v42 }
 0x44d   : > { %v5620_v63 = vpop.eup %5619 }
 0x44e   : > { %v2762_v6 = vpack.c.bf16 %v5620_v63, %v5620_v63  ;;  %v2674_v45 = vsel %vm2469_vm10, %v5620_v63, 0.0  ;;  %2747 = vadd.xlane.f32.xlu1 %v2746_v10  ;;  %2687 = vadd.xlane.f32.xlu0 %v2686_v41 }
 0x44f   : > { %2675 = vadd.xlane.f32.xlu2 %v2674_v45 }
 0x450   : > { %v2802_v52 = vunpack.c.l.b16 %v2762_v6 }
 0x452   : > { %v2808_v25 = vpack.c.b16 %v2803_v57, %v2802_v52 }
 0x454   : > { %5095 = vmatmul.msk.bf16.gmra.mxu0 %vm2469_vm10, %v2808_v25  ;;  %5108 = vmatmul.msk.bf16.gmra.mxu3 %vm2469_vm10, %v3064_v37 }
 0x456   : > { %2696 = vadd.xlane.f32.xlu1 %v2695_v56  ;;  %2720 = vadd.xlane.f32.xlu0 %v2719_v2 }
 0x457   : > { %2711 = vadd.xlane.f32.xlu2 %v2710_v46 }
 0x45e   : > { %2729 = vadd.xlane.f32.xlu1 %v2728_v31  ;;  %2693 = vadd.xlane.f32.xlu0 %v2692_v11 }
 0x45f   : > { %2738 = vadd.xlane.f32.xlu2 %v2737_v16 }
 0x466   : > { %2756 = vadd.xlane.f32.xlu1 %v2755_v27  ;;  %2726 = vadd.xlane.f32.xlu0 %v2725_v53 }
 0x467   : > { %2717 = vadd.xlane.f32.xlu2 %v2716_v12 }
 0x46e   : > { %2702 = vadd.xlane.f32.xlu1 %v2701_v38  ;;  %2753 = vadd.xlane.f32.xlu0 %v2752_v3 }
 0x46f   : > { %2744 = vadd.xlane.f32.xlu2 %v2743_v4 }
 0x476   : > { %2699 = vadd.xlane.f32.xlu0 %v2698_v14 }
 0x477   : > { %2723 = vadd.xlane.f32.xlu2 %v2722_v0 }
 0x47a   : > { %v7368_v18 = vpop.f32.mrf.mxu2 }
 0x47e   : > { %2708 = vadd.xlane.f32.xlu0 %v2707_v9 }
 0x47f   : > { %2750 = vadd.xlane.f32.xlu2 %v2749_v17 }
 0x482   : > { %v7378_v43 = vpop.f32.mrf.mxu2 }
 0x487   : > { %2732 = vadd.xlane.f32.xlu2 %v2731_v22 }
 0x48a   : > { %v3025_v2 = vpop.f32.mrf.mxu2 }
 0x48d   : > { %v7356_v39 = vpop.xlane.xlu0 %2663 }
 0x48f   : > { %2705 = vadd.xlane.f32.xlu2 %v2704_v26 }
 0x497   : > { %v7388_v30 = vpop.f32.mrf.mxu3 }
 0x498   : > { %v2940_v51 = vpop.f32.mrf.mxu1 }
 0x49d   : > { %v7362_v13 = vpop.xlane.xlu2 %2669 }
 0x49f   : > { %v7412_v14 = vpop.f32.mrf.mxu3 }
 0x4a0   : > { %v2942_v27 = vpop.f32.mrf.mxu1 }
 0x4a1   : > { %v7352_v1 = vpop.xlane.xlu1 %2666 }
 0x4a9   : > { %v7354_v44 = vpop.xlane.xlu1 %2735 }
 0x4b1   : > { %v7358_v24 = vpop.xlane.xlu0 %2672  ;;  %v7360_v23 = vpop.xlane.xlu1 %2741 }
 0x4b9   : > { %v7364_v60 = vpop.xlane.xlu0 %2714  ;;  %v2691_v20 = vpop.xlane.xlu1 %2690 }
 0x4ba   : > { %5621 = vrcp.f32 %v2691_v20  ;;  %vm3270_vm12 = vweird.f32 %v2691_v20  ;;  %v3274_v28 = vand.u32 2147483647, %v2691_v20  ;;  %v3276_v6 = vand.u32 2147483648, %v2691_v20 }
 0x4bb   : > { %vm3390_vm7 = vweird.f32 %v7364_v60 }
 0x4bc   : > { %v3277_v25 = vor.u32 1.1754944e-38, %v3276_v6  ;;  %vm3275_vm0 = vcmp.eq.f32.partialorder %v3274_v28, 8.507059e+37 }
 0x4c0   : > { %v5622_v34 = vpop.eup %5621 }
 0x4c1   : > { %v2688_v8 = vpop.xlane.xlu0 %2687  ;;  %v3266_v50 = vmul.f32 %v5622_v34, %v2691_v20  ;;  %v7374_v36 = vpop.xlane.xlu1 %2747  ;;  %vm3271_vm11 = vweird.f32 %v5622_v34 }
 0x4c2   : > { %v7366_v58 = vpop.xlane.xlu2 %2675  ;;  %5623 = vrcp.f32 %v2688_v8  ;;  %v3259_v41 = vand.u32 2147483647, %v2688_v8  ;;  %v3261_v45 = vand.u32 2147483648, %v2688_v8  ;;  %vm7397_vm13 = vmor %vm3270_vm12, %vm3271_vm11  ;;  %vm3255_vm15 = vweird.f32 %v2688_v8 }
 0x4c3   : > { %v3267_v61 = vsub.f32 1.0, %v3266_v50  ;;  %5625 = vrcp.f32 %v7364_v60 }
 0x4c4   : > { %v3262_v56 = vor.u32 1.1754944e-38, %v3261_v45  ;;  %vm3260_vm2 = vcmp.eq.f32.partialorder %v3259_v41, 8.507059e+37  ;;  %v7450_v45 = vpop.f32.mrf.mxu3 }
 0x4c5   : > { %v3268_v62 = vmul.f32 %v5622_v34, %v3267_v61  ;;  %v3394_v61 = vand.u32 2147483647, %v7364_v60 }
 0x4c7   : > { %v3269_v29 = vadd.f32 %v5622_v34, %v3268_v62  ;;  %vm3395_vm12 = vcmp.eq.f32.partialorder %v3394_v61, 8.507059e+37 }
 0x4c8   : > { %v5624_v48 = vpop.eup %5623 }
 0x4c9   : > { %v7370_v55 = vpop.xlane.xlu0 %2720  ;;  %v3251_v33 = vmul.f32 %v5624_v48, %v2688_v8  ;;  %v7380_v54 = vpop.eup %5625  ;;  %vm3256_vm14 = vweird.f32 %v5624_v48  ;;  %v3273_v42 = vsel %vm7397_vm13, %v5622_v34, %v3269_v29 }
 0x4ca   : > { %v7372_v5 = vpop.xlane.xlu2 %2711  ;;  %v7390_v35 = vpop.xlane.xlu1 %2696  ;;  %v3386_v10 = vmul.f32 %v7380_v54, %v7364_v60  ;;  %vm3257_vm1 = vmor %vm3255_vm15, %vm3256_vm14  ;;  %v3278_v11 = vsel %vm3275_vm0, %v3277_v25, %v3273_v42  ;;  %vm3391_vm5 = vweird.f32 %v7380_v54 }
 0x4cb   : > { %5627 = vrcp.f32 %v7372_v5  ;;  %v3252_v7 = vsub.f32 1.0, %v3251_v33  ;;  %v3279_v3 = vmul.f32 %v3278_v11, %v2942_v27  ;;  %v3381_v20 = vand.u32 2147483648, %v7372_v5  ;;  %v3027_v29 = vpop.f32.mrf.mxu2  ;;  %vm3392_vm8 = vmor %vm3390_vm7, %vm3391_vm5  ;;  %v2945_v25 = vpop.f32.mrf.mxu1 }
 0x4cc   : > { %v3387_v37 = vsub.f32 1.0, %v3386_v10  ;;  %vm3375_vm4 = vweird.f32 %v7372_v5  ;;  %v3379_v8 = vand.u32 2147483647, %v7372_v5  ;;  %vm3300_vm0 = vweird.f32 %v7390_v35 }
 0x4cd   : > { %v3253_v49 = vmul.f32 %v5624_v48, %v3252_v7 }
 0x4ce   : > { %v3388_v0 = vmul.f32 %v7380_v54, %v3387_v37  ;;  %vm3380_vm11 = vcmp.eq.f32.partialorder %v3379_v8, 8.507059e+37 }
 0x4cf   : > { %v3254_v57 = vadd.f32 %v5624_v48, %v3253_v49  ;;  %v3382_v49 = vor.u32 1.1754944e-38, %v3381_v20 }
 0x4d0   : > { %v3389_v34 = vadd.f32 %v7380_v54, %v3388_v0 }
 0x4d1   : > { %v7382_v40 = vpop.eup %5627  ;;  %v7384_v15 = vpop.xlane.xlu0 %2693  ;;  %v3258_v31 = vsel %vm3257_vm1, %v5624_v48, %v3254_v57  ;;  %v3396_v48 = vand.u32 2147483648, %v7364_v60 }
 0x4d2   : > { %v7386_v32 = vpop.xlane.xlu2 %2738  ;;  %v3371_v63 = vmul.f32 %v7382_v40, %v7372_v5  ;;  %5629 = vrcp.f32 %v7384_v15  ;;  %v3263_v53 = vsel %vm3260_vm2, %v3262_v56, %v3258_v31  ;;  %vm3376_vm3 = vweird.f32 %v7382_v40  ;;  %v7465_v31 = vpop.xlane.xlu1 %2729 }
 0x4d3   : > { %5631 = vrcp.f32 %v7390_v35  ;;  %v3264_v38 = vmul.f32 %v3263_v53, %v2940_v51  ;;  %vm7430_vm6 = vmor %vm3375_vm4, %vm3376_vm3  ;;  %v3397_v28 = vor.u32 1.1754944e-38, %v3396_v48  ;;  %v3393_v10 = vsel %vm3392_vm8, %v7380_v54, %v3389_v34  ;;  %v3030_v34 = vpop.f32.mrf.mxu2 }
 0x4d4   : > { %v3372_v52 = vsub.f32 1.0, %v3371_v63  ;;  %5633 = vrcp.f32 %v7354_v44  ;;  %v3291_v11 = vand.u32 2147483648, %v7384_v15  ;;  %vm3285_vm15 = vweird.f32 %v7384_v15 }
 0x4d5   : > { %5635 = vrcp.f32 %v7370_v55  ;;  %v5471_v22 = vpack.i.bf16 %v3279_v3, %v3264_v38  ;;  %v3398_v42 = vsel %vm3395_vm12, %v3397_v28, %v3393_v10  ;;  %v3289_v38 = vand.u32 2147483647, %v7384_v15 }
 0x4d6   : > { %v3373_v46 = vmul.f32 %v7382_v40, %v3372_v52  ;;  %v3399_v37 = vmul.f32 %v3398_v42, %v3027_v29  ;;  %v3292_v20 = vor.u32 1.1754944e-38, %v3291_v11  ;;  %vm3420_vm8 = vweird.f32 %v7370_v55 }
 0x4d7   : > { %5472 = vrot.lane.b32.xlu1 %v5471_v22, %s5790_s22  ;;  %v3304_v22 = vand.u32 2147483647, %v7390_v35  ;;  %vm3290_vm3 = vcmp.eq.f32.partialorder %v3289_v38, 8.507059e+37  ;;  %v3514_v48 = vand.u32 2147483647, %v7386_v32 }
 0x4d8   : > { %v7405_v16 = vpop.eup %5629  ;;  %v3374_v9 = vadd.f32 %v7382_v40, %v3373_v46 }
 0x4d9   : > { %v7407_v12 = vpop.eup %5631  ;;  %v3281_v17 = vmul.f32 %v7405_v16, %v7384_v15  ;;  %v7455_v52 = vpop.xlane.xlu0 %2726  ;;  %vm3286_vm13 = vweird.f32 %v7405_v16  ;;  %vm3305_vm4 = vcmp.eq.f32.partialorder %v3304_v22, 8.507059e+37 }
 0x4da   : > { %v7410_v4 = vpop.xlane.xlu2 %2717  ;;  %v3296_v26 = vmul.f32 %v7407_v12, %v7390_v35  ;;  %v7434_v33 = vpop.eup %5633  ;;  %v3378_v5 = vsel %vm7430_vm6, %v7382_v40, %v3374_v9  ;;  %vm3301_vm14 = vweird.f32 %v7407_v12  ;;  %vm3287_vm1 = vmor %vm3285_vm15, %vm3286_vm13 }
 0x4db   : > { %5637 = vrcp.f32 %v7410_v4  ;;  %v3282_v7 = vsub.f32 1.0, %v3281_v17  ;;  %v7440_v62 = vpop.eup %5635  ;;  %v3383_v6 = vsel %vm3380_vm11, %v3382_v49, %v3378_v5  ;;  %v3491_v54 = vmul.f32 %v7434_v33, %v7354_v44  ;;  %vm7481_vm2 = vmor %vm3300_vm0, %vm3301_vm14 }
 0x4dc   : > { %v3297_v51 = vsub.f32 1.0, %v3296_v26  ;;  %5639 = vrcp.f32 %v7386_v32  ;;  %v3384_v60 = vmul.f32 %v3383_v6, %v3025_v2  ;;  %v3416_v57 = vmul.f32 %v7440_v62, %v7370_v55 }
 0x4dd   : > { %v3283_v40 = vmul.f32 %v7405_v16, %v3282_v7  ;;  %5641 = vrcp.f32 %v7360_v23  ;;  %v3306_v2 = vand.u32 2147483648, %v7390_v35  ;;  %v3492_v17 = vsub.f32 1.0, %v3491_v54  ;;  %v7507_v54 = vpop.xlane.xlu1 %2756 }
 0x4de   : > { %v3298_v19 = vmul.f32 %v7407_v12, %v3297_v51  ;;  %v5476_v3 = vpack.i.bf16 %v3399_v37, %v3384_v60  ;;  %v3417_v9 = vsub.f32 1.0, %v3416_v57  ;;  %v3411_v29 = vand.u32 2147483648, %v7410_v4  ;;  %v2947_v60 = vpop.f32.mrf.mxu1 }
 0x4df   : > { %v3284_v53 = vadd.f32 %v7405_v16, %v3283_v40  ;;  %v3307_v61 = vor.u32 1.1754944e-38, %v3306_v2  ;;  %v3493_v51 = vmul.f32 %v7434_v33, %v3492_v17  ;;  %vm3421_vm6 = vweird.f32 %v7440_v62  ;;  %v3032_v17 = vpop.f32.mrf.mxu2 }
 0x4e0   : > { %v3299_v0 = vadd.f32 %v7407_v12, %v3298_v19  ;;  %5477 = vrot.lane.b32.xlu2 %v5476_v3, %s5791_s25  ;;  %v3418_v7 = vmul.f32 %v7440_v62, %v3417_v9  ;;  %v3426_v19 = vand.u32 2147483648, %v7370_v55  ;;  %v3409_v57 = vand.u32 2147483647, %v7410_v4  ;;  %vm3422_vm13 = vmor %vm3420_vm8, %vm3421_vm6 }
 0x4e1   : > { %v7444_v63 = vpop.eup %5637  ;;  %v3288_v15 = vsel %vm3287_vm1, %v7405_v16, %v3284_v53  ;;  %v7498_v6 = vpop.xlane.xlu0 %2753  ;;  %vm3405_vm7 = vweird.f32 %v7410_v4  ;;  %v3494_v38 = vadd.f32 %v7434_v33, %v3493_v51  ;;  %vm3496_vm12 = vweird.f32 %v7434_v33 }
 0x4e2   : > { %v3401_v41 = vmul.f32 %v7444_v63, %v7410_v4  ;;  %v7459_v56 = vpop.xlane.xlu2 %2744  ;;  %v7461_v46 = vpop.eup %5639  ;;  %v3293_v5 = vsel %vm3290_vm3, %v3292_v20, %v3288_v15  ;;  %v3303_v35 = vsel %vm7481_vm2, %v7407_v12, %v3299_v0  ;;  %vm3406_vm5 = vweird.f32 %v7444_v63 }
 0x4e3   : > { %5643 = vrcp.f32 %v7459_v56  ;;  %v3506_v26 = vmul.f32 %v7461_v46, %v7386_v32  ;;  %v7486_v50 = vpop.eup %5641  ;;  %v3294_v10 = vmul.f32 %v3293_v5, %v2945_v25  ;;  %v3308_v40 = vsel %vm3305_vm4, %v3307_v61, %v3303_v35  ;;  %vm3407_vm11 = vmor %vm3405_vm7, %vm3406_vm5 }
 0x4e4   : > { %v3402_v27 = vsub.f32 1.0, %v3401_v41  ;;  %v7500_v41 = vpop.f32.mrf.mxu3  ;;  %v3424_v12 = vand.u32 2147483647, %v7370_v55  ;;  %v3419_v42 = vadd.f32 %v7440_v62, %v3418_v7  ;;  %v3309_v37 = vmul.f32 %v3308_v40, %v2947_v60 }
 0x4e5   : > { %v3507_v49 = vsub.f32 1.0, %v3506_v26  ;;  %v3521_v2 = vmul.f32 %v7486_v50, %v7360_v23  ;;  %5645 = vrcp.f32 %v7374_v36  ;;  %v3427_v3 = vor.u32 1.1754944e-38, %v3426_v19  ;;  %v7552_v60 = vpop.xlane.xlu1 %2702 }
 0x4e6   : > { %v3403_v8 = vmul.f32 %v7444_v63, %v3402_v27  ;;  %v3412_v27 = vor.u32 1.1754944e-38, %v3411_v29  ;;  %v5481_v53 = vpack.i.bf16 %v3309_v37, %v3294_v10  ;;  %vm3410_vm14 = vcmp.eq.f32.partialorder %v3409_v57, 8.507059e+37 }
 0x4e7   : > { %v3508_v11 = vmul.f32 %v7461_v46, %v3507_v49  ;;  %vm3425_vm15 = vcmp.eq.f32.partialorder %v3424_v12, 8.507059e+37  ;;  %v3423_v9 = vsel %vm3422_vm13, %v7440_v62, %v3419_v42  ;;  %v3522_v22 = vsub.f32 1.0, %v3521_v2 }
 0x4e8   : > { %v3404_v16 = vadd.f32 %v7444_v63, %v3403_v8  ;;  %5482 = vrot.lane.b32.xlu0 %v5481_v53, %s5790_s22  ;;  %v3428_v20 = vsel %vm3425_vm15, %v3427_v3, %v3423_v9  ;;  %vm3511_vm0 = vweird.f32 %v7461_v46  ;;  %vm3495_vm1 = vweird.f32 %v7354_v44 }
 0x4e9   : > { %v7494_v28 = vpop.eup %5643  ;;  %v3509_v8 = vadd.f32 %v7461_v46, %v3508_v11  ;;  %v3429_v61 = vmul.f32 %v3428_v20, %v3032_v17  ;;  %v3501_v62 = vand.u32 2147483648, %v7354_v44  ;;  %vm7538_vm2 = vmor %vm3495_vm1, %vm3496_vm12  ;;  %v3499_v5 = vand.u32 2147483647, %v7354_v44  ;;  %v7545_v51 = vpop.xlane.xlu0 %2699 }
 0x4ea   : > { %v3536_v25 = vmul.f32 %v7494_v28, %v7459_v56  ;;  %v3408_v4 = vsel %vm3407_vm11, %v7444_v63, %v3404_v16  ;;  %v3516_v63 = vand.u32 2147483648, %v7386_v32  ;;  %v7530_v15 = vpop.xlane.xlu2 %2723  ;;  %vm3510_vm3 = vweird.f32 %v7386_v32 }
 0x4eb   : > { %v3413_v0 = vsel %vm3410_vm14, %v3412_v27, %v3408_v4  ;;  %v7532_v7 = vpop.eup %5645  ;;  %v3523_v16 = vmul.f32 %v7486_v50, %v3522_v22  ;;  %vm3512_vm4 = vmor %vm3510_vm3, %vm3511_vm0  ;;  %vm3515_vm5 = vcmp.eq.f32.partialorder %v3514_v48, 8.507059e+37  ;;  %v3498_v44 = vsel %vm7538_vm2, %v7434_v33, %v3494_v38 }
 0x4ec   : > { %v3537_v55 = vsub.f32 1.0, %v3536_v25  ;;  %v3414_v26 = vmul.f32 %v3413_v0, %v3030_v34  ;;  %v3115_v29 = vpop.f32.mrf.mxu3  ;;  %v3517_v10 = vor.u32 1.1754944e-38, %v3516_v63  ;;  %v3551_v40 = vmul.f32 %v7532_v7, %v7374_v36 }
 0x4ed   : > { %v3513_v32 = vsel %vm3512_vm4, %v7461_v46, %v3509_v8  ;;  %v3502_v12 = vor.u32 1.1754944e-38, %v3501_v62  ;;  %5647 = vrcp.f32 %v7545_v51  ;;  %vm3500_vm6 = vcmp.eq.f32.partialorder %v3499_v5, 8.507059e+37 }
 0x4ee   : > { %v3538_v35 = vmul.f32 %v7494_v28, %v3537_v55  ;;  %v5486_v49 = vpack.i.bf16 %v3429_v61, %v3414_v26  ;;  %v3518_v19 = vsel %vm3515_vm5, %v3517_v10, %v3513_v32  ;;  %vm3526_vm7 = vweird.f32 %v7486_v50 }
 0x4ef   : > { %vm3541_vm8 = vweird.f32 %v7494_v28  ;;  %v3524_v42 = vadd.f32 %v7486_v50, %v3523_v16  ;;  %5649 = vrcp.f32 %v7552_v60  ;;  %v3546_v33 = vand.u32 2147483648, %v7459_v56 }
 0x4f0   : > { %v3539_v57 = vadd.f32 %v7494_v28, %v3538_v35  ;;  %5487 = vrot.lane.b32.xlu0 %v5486_v49, %s5791_s25  ;;  %v3503_v46 = vsel %vm3500_vm6, %v3502_v12, %v3498_v44  ;;  %v3552_v25 = vsub.f32 1.0, %v3551_v40  ;;  %vm3540_vm11 = vweird.f32 %v7459_v56 }
 0x4f1   : > { %v3544_v37 = vand.u32 2147483647, %v7459_v56  ;;  %v3519_v2 = vmul.f32 %v3518_v19, %v7500_v41  ;;  %vm3525_vm12 = vweird.f32 %v7360_v23  ;;  %v3531_v11 = vand.u32 2147483648, %v7360_v23  ;;  %vm7571_vm13 = vmor %vm3540_vm11, %vm3541_vm8 }
 0x4f2   : > { %v3529_v53 = vand.u32 2147483647, %v7360_v23  ;;  %5651 = vrcp.f32 %v7465_v31  ;;  %v7577_v4 = vpop.xlane.xlu2 %2750  ;;  %v3504_v38 = vmul.f32 %v3503_v46, %v7450_v45  ;;  %v3543_v56 = vsel %vm7571_vm13, %v7494_v28, %v3539_v57  ;;  %vm7587_vm14 = vmor %vm3525_vm12, %vm3526_vm7 }
 0x4f3   : > { %v7583_v41 = vpop.eup %5647  ;;  %v3547_v55 = vor.u32 1.1754944e-38, %v3546_v33  ;;  %v3528_v23 = vsel %vm7587_vm14, %v7486_v50, %v3524_v42  ;;  %v3553_v0 = vmul.f32 %v7532_v7, %v3552_v25  ;;  %vm3545_vm15 = vcmp.eq.f32.partialorder %v3544_v37, 8.507059e+37 }
 0x4f4   : > { %v5491_v45 = vpack.i.bf16 %v3519_v2, %v3504_v38  ;;  %v3532_v28 = vor.u32 1.1754944e-38, %v3531_v11  ;;  %v3117_v17 = vpop.f32.mrf.mxu3  ;;  %5653 = vrcp.f32 %v7577_v4  ;;  %vm3530_vm0 = vcmp.eq.f32.partialorder %v3529_v53, 8.507059e+37  ;;  %v7645_v2 = vpop.f32.mrf.mxu2 }
 0x4f5   : > { %v7595_v9 = vpop.eup %5649  ;;  %v3548_v22 = vsel %vm3545_vm15, %v3547_v55, %v3543_v56  ;;  %v3311_v63 = vmul.f32 %v7583_v41, %v7545_v51  ;;  %vm3556_vm1 = vweird.f32 %v7532_v7  ;;  %5655 = vrcp.f32 %v7530_v15  ;;  %v2950_v55 = vpop.f32.mrf.mxu1 }
 0x4f6   : > { %v3533_v26 = vsel %vm3530_vm0, %v3532_v28, %v3528_v23  ;;  %v2677_v50 = vsel %vm2469_vm10, %v7309_v59, 0.0  ;;  %v3554_v8 = vadd.f32 %v7532_v7, %v3553_v0  ;;  %5657 = vrcp.f32 %v7455_v52 }
 0x4f7   : > { %v3326_v48 = vmul.f32 %v7595_v9, %v7552_v60  ;;  %v3549_v61 = vmul.f32 %v3548_v22, %v3117_v17  ;;  %v3561_v62 = vand.u32 2147483648, %v7374_v36  ;;  %v3534_v34 = vmul.f32 %v3533_v26, %v3115_v29 }
 0x4f8   : > { %5492 = vrot.lane.b32.xlu0 %v5491_v45, %s5792_s24  ;;  %v7605_v20 = vpop.eup %5651  ;;  %vm3555_vm2 = vweird.f32 %v7374_v36  ;;  %v3559_v5 = vand.u32 2147483647, %v7374_v36  ;;  %v3312_v35 = vsub.f32 1.0, %v3311_v63  ;;  %5659 = vrcp.f32 %v7507_v54 }
 0x4f9   : > { %vm7618_vm3 = vmor %vm3555_vm2, %vm3556_vm1  ;;  %v3461_v16 = vmul.f32 %v7605_v20, %v7465_v31  ;;  %v3327_v10 = vsub.f32 1.0, %v3326_v48  ;;  %5661 = vrcp.f32 %v7498_v6  ;;  %v5496_v40 = vpack.i.bf16 %v3549_v61, %v3534_v34 }
 0x4fa   : > { %v7614_v59 = vpop.eup %5653  ;;  %v3558_v29 = vsel %vm7618_vm3, %v7532_v7, %v3554_v8  ;;  %v7629_v36 = vpop.xlane.xlu2 %2732  ;;  %v3562_v32 = vor.u32 1.1754944e-38, %v3561_v62  ;;  %vm3560_vm4 = vcmp.eq.f32.partialorder %v3559_v5, 8.507059e+37  ;;  %v3313_v19 = vmul.f32 %v7583_v41, %v3312_v35 }
 0x4fb   : > { %v7631_v44 = vpop.eup %5655  ;;  %v3566_v57 = vmul.f32 %v7614_v59, %v7577_v4  ;;  %v3462_v33 = vsub.f32 1.0, %v3461_v16  ;;  %5663 = vrcp.f32 %v7629_v36  ;;  %v3328_v46 = vmul.f32 %v7595_v9, %v3327_v10 }
 0x4fc   : > { %v7633_v12 = vpop.eup %5657  ;;  %v3120_v7 = vpop.f32.mrf.mxu3  ;;  %v3563_v42 = vsel %vm3560_vm4, %v3562_v32, %v3558_v29  ;;  %v3431_v25 = vmul.f32 %v7631_v44, %v7530_v15  ;;  %v2683_v27 = vsel %vm2469_vm10, %v7147_v47, 0.0  ;;  %v3314_v56 = vadd.f32 %v7583_v41, %v3313_v19 }
 0x4fd   : > { %v3446_v11 = vmul.f32 %v7633_v12, %v7455_v52  ;;  %v7653_v38 = vmul.f32 %v3563_v42, %v3120_v7  ;;  %vm3316_vm5 = vweird.f32 %v7583_v41  ;;  %v3567_v3 = vsub.f32 1.0, %v3566_v57 }
 0x4fe   : > { %v7643_v37 = vpop.eup %5659  ;;  %v3463_v23 = vmul.f32 %v7605_v20, %v3462_v33  ;;  %v3469_v0 = vand.u32 2147483647, %v7465_v31  ;;  %vm3331_vm6 = vweird.f32 %v7595_v9  ;;  %v3321_v45 = vand.u32 2147483648, %v7545_v51  ;;  %v7704_v33 = vpop.f32.mrf.mxu2 }
 0x4ff   : > { %v7651_v53 = vpop.eup %5661  ;;  %v3329_v47 = vadd.f32 %v7595_v9, %v3328_v46  ;;  %vm3315_vm7 = vweird.f32 %v7545_v51  ;;  %v3319_v28 = vand.u32 2147483647, %v7545_v51  ;;  %v3432_v17 = vsub.f32 1.0, %v3431_v25 }
 0x500   : > { %5497 = vrot.lane.b32.xlu0 %v5496_v40, %s5792_s24  ;;  %v3596_v63 = vmul.f32 %v7643_v37, %v7507_v54  ;;  %v3447_v26 = vsub.f32 1.0, %v3446_v11  ;;  %v3581_v8 = vmul.f32 %v7651_v53, %v7498_v6  ;;  %vm7673_vm8 = vmor %vm3315_vm7, %vm3316_vm5  ;;  %vm3330_vm11 = vweird.f32 %v7552_v60 }
 0x501   : > { %2678 = vadd.xlane.f32.xlu1 %v2677_v50  ;;  %v7664_v22 = vpop.eup %5663  ;;  %v3336_v50 = vand.u32 2147483648, %v7552_v60  ;;  %v3334_v51 = vand.u32 2147483647, %v7552_v60  ;;  %v3568_v61 = vmul.f32 %v7614_v59, %v3567_v3  ;;  %v3318_v62 = vsel %vm7673_vm8, %v7583_v41, %v3314_v56  ;;  %vm7690_vm12 = vmor %vm3330_vm11, %vm3331_vm6  ;;  %v2952_v3 = vpop.f32.mrf.mxu1 }
 0x502   : > { %v7684_v34 = vadd.f32 %v7605_v20, %v3463_v23  ;;  %v3454_v5 = vand.u32 2147483647, %v7455_v52  ;;  %v3456_v35 = vand.u32 2147483648, %v7455_v52  ;;  %v3322_v60 = vor.u32 1.1754944e-38, %v3321_v45 }
 0x503   : > { %vm3450_vm13 = vweird.f32 %v7455_v52  ;;  %vm3320_vm14 = vcmp.eq.f32.partialorder %v3319_v28, 8.507059e+37  ;;  %v3433_v16 = vmul.f32 %v7631_v44, %v3432_v17  ;;  %v3476_v41 = vmul.f32 %v7664_v22, %v7629_v36 }
 0x504   : > { %v3333_v29 = vsel %vm7690_vm12, %v7595_v9, %v3329_v47  ;;  %v3122_v10 = vpop.f32.mrf.mxu3  ;;  %v3448_v40 = vmul.f32 %v7633_v12, %v3447_v26  ;;  %v3337_v32 = vor.u32 1.1754944e-38, %v3336_v50  ;;  %v3582_v19 = vsub.f32 1.0, %v3581_v8 }
 0x505   : > { %v3323_v57 = vsel %vm3320_vm14, %v3322_v60, %v3318_v62  ;;  %v3597_v7 = vsub.f32 1.0, %v3596_v63  ;;  %vm3335_vm15 = vcmp.eq.f32.partialorder %v3334_v51, 8.507059e+37  ;;  %v3569_v42 = vadd.f32 %v7614_v59, %v3568_v61 }
 0x506   : > { %vm3571_vm0 = vweird.f32 %v7614_v59  ;;  %vm3436_vm1 = vweird.f32 %v7631_v44  ;;  %vm3570_vm2 = vweird.f32 %v7577_v4  ;;  %v3576_v9 = vand.u32 2147483648, %v7577_v4 }
 0x507   : > { %v3338_v46 = vsel %vm3335_vm15, %v3337_v32, %v3333_v29  ;;  %v3434_v25 = vadd.f32 %v7631_v44, %v3433_v16  ;;  %v3574_v11 = vand.u32 2147483647, %v7577_v4  ;;  %v3324_v56 = vmul.f32 %v3323_v57, %v2950_v55  ;;  %vm7717_vm4 = vmor %vm3570_vm2, %vm3571_vm0  ;;  %v7765_v32 = vpop.xlane.xlu2 %2705 }
 0x508   : > { %v3449_v23 = vadd.f32 %v7633_v12, %v3448_v40  ;;  %vm3451_vm3 = vweird.f32 %v7633_v12  ;;  %v3583_v45 = vmul.f32 %v7651_v53, %v3582_v19  ;;  %v3441_v47 = vand.u32 2147483648, %v7530_v15 }
 0x509   : > { %2684 = vadd.xlane.f32.xlu2 %v2683_v27  ;;  %v3477_v27 = vsub.f32 1.0, %v3476_v41  ;;  %vm3466_vm5 = vweird.f32 %v7605_v20  ;;  %vm3435_vm6 = vweird.f32 %v7530_v15  ;;  %v3439_v4 = vand.u32 2147483647, %v7530_v15  ;;  %vm7747_vm14 = vmor %vm3450_vm13, %vm3451_vm3 }
 0x50a   : > { %v3339_v55 = vmul.f32 %v3338_v46, %v2952_v3  ;;  %v3573_v17 = vsel %vm7717_vm4, %v7614_v59, %v3569_v42  ;;  %vm7727_vm7 = vcmp.eq.f32.partialorder %v3454_v5, 8.507059e+37  ;;  %v3457_v26 = vor.u32 1.1754944e-38, %v3456_v35  ;;  %vm7734_vm8 = vmor %vm3435_vm6, %vm3436_vm1 }
 0x50b   : > { %v3598_v50 = vmul.f32 %v7643_v37, %v3597_v7  ;;  %v3577_v48 = vor.u32 1.1754944e-38, %v3576_v9  ;;  %vm3465_vm11 = vweird.f32 %v7465_v31  ;;  %vm3575_vm12 = vcmp.eq.f32.partialorder %v3574_v11, 8.507059e+37  ;;  %v7786_v9 = vpop.xlane.xlu0 %2708 }
 0x50c   : > { %v3478_v15 = vmul.f32 %v7664_v22, %v3477_v27  ;;  %v5501_v59 = vpack.i.bf16 %v3339_v55, %v3324_v56  ;;  %v3438_v51 = vsel %vm7734_vm8, %v7631_v44, %v3434_v25  ;;  %vm3600_vm15 = vweird.f32 %v7507_v54  ;;  %v3040_v44 = vpop.f32.mrf.mxu2  ;;  %v3125_v49 = vpop.f32.mrf.mxu3 }
 0x50d   : > { %vm3601_vm0 = vweird.f32 %v7643_v37  ;;  %v3442_v62 = vor.u32 1.1754944e-38, %v3441_v47  ;;  %v3578_v5 = vsel %vm3575_vm12, %v3577_v48, %v3573_v17  ;;  %v3584_v35 = vadd.f32 %v7651_v53, %v3583_v45 }
 0x50e   : > { %vm3586_vm1 = vweird.f32 %v7651_v53  ;;  %vm3440_vm2 = vcmp.eq.f32.partialorder %v3439_v4, 8.507059e+37  ;;  %v3453_v52 = vsel %vm7747_vm14, %v7633_v12, %v3449_v23  ;;  %v3599_v60 = vadd.f32 %v7643_v37, %v3598_v50  ;;  %vm7782_vm6 = vmor %vm3600_vm15, %vm3601_vm0 }
 0x50f   : > { %vm3585_vm13 = vweird.f32 %v7498_v6  ;;  %v3591_v16 = vand.u32 2147483648, %v7498_v6  ;;  %v3443_v41 = vsel %vm3440_vm2, %v3442_v62, %v3438_v51  ;;  %v3589_v29 = vand.u32 2147483647, %v7498_v6  ;;  %vm7814_vm14 = vmor %vm3465_vm11, %vm3466_vm5 }
 0x510   : > { %v3479_v40 = vadd.f32 %v7664_v22, %v3478_v15  ;;  %vm3481_vm3 = vweird.f32 %v7664_v22  ;;  %v3579_v19 = vmul.f32 %v3578_v5, %v3122_v10  ;;  %v3604_v12 = vand.u32 2147483647, %v7507_v54  ;;  %vm7771_vm4 = vmor %vm3585_vm13, %vm3586_vm1  ;;  %v5375_v5 = vld [vmem:[%s8394_s5 + $0x30] sm:$0xff] }
 0x511   : > { %v3606_v57 = vand.u32 2147483648, %v7507_v54  ;;  %v3486_v42 = vand.u32 2147483648, %v7629_v36  ;;  %v3458_v6 = vsel %vm7727_vm7, %v3457_v26, %v3453_v52  ;;  %vm3480_vm8 = vweird.f32 %v7629_v36 }
 0x512   : > { %v3484_v46 = vand.u32 2147483647, %v7629_v36  ;;  %v3444_v25 = vmul.f32 %v3443_v41, %v7645_v2  ;;  %v3588_v11 = vsel %vm7771_vm4, %v7651_v53, %v3584_v35  ;;  %v3471_v27 = vand.u32 2147483648, %v7465_v31  ;;  %vm7800_vm7 = vmor %vm3480_vm8, %vm3481_vm3 }
 0x513   : > { %v3603_v54 = vsel %vm7782_vm6, %v7643_v37, %v3599_v60  ;;  %v3592_v56 = vor.u32 1.1754944e-38, %v3591_v16  ;;  %5665 = vrcp.f32 %v7765_v32  ;;  %vm3590_vm12 = vcmp.eq.f32.partialorder %v3589_v29, 8.507059e+37 }
 0x514   : > { %v3459_v36 = vmul.f32 %v3458_v6, %v7704_v33  ;;  %v5511_v2 = vpack.i.bf16 %v3579_v19, %v7653_v38  ;;  %v3483_v53 = vsel %vm7800_vm7, %v7664_v22, %v3479_v40  ;;  %v3607_v23 = vor.u32 1.1754944e-38, %v3606_v57  ;;  %v3042_v63 = vpop.f32.mrf.mxu2  ;;  %v3127_v26 = vpop.f32.mrf.mxu3 }
 0x515   : > { %5667 = vrcp.f32 %v7786_v9  ;;  %v3487_v45 = vor.u32 1.1754944e-38, %v3486_v42  ;;  %v3593_v47 = vsel %vm3590_vm12, %v3592_v56, %v3588_v11  ;;  %vm3605_vm15 = vcmp.eq.f32.partialorder %v3604_v12, 8.507059e+37  ;;  %v5371_v11 = vld [vmem:[%s8394_s5 + $0x10] sm:$0xff]  ;;  %v2855_v56 = vpop.f32.mrf.mxu0 }
 0x516   : > { %vm3485_vm0 = vcmp.eq.f32.partialorder %v3484_v46, 8.507059e+37  ;;  %v5506_v38 = vpack.i.bf16 %v3459_v36, %v3444_v25  ;;  %v3468_v22 = vsel %vm7814_vm14, %v7605_v20, %v7684_v34  ;;  %v3472_v33 = vor.u32 1.1754944e-38, %v3471_v27  ;;  %v5373_v25 = vld [vmem:[%s8394_s5 + $0x20] sm:$0xff] }
 0x517   : > { %v3608_v28 = vsel %vm3605_vm15, %v3607_v23, %v3603_v54  ;;  %v3488_v4 = vsel %vm3485_vm0, %v3487_v45, %v3483_v53  ;;  %vm3470_vm5 = vcmp.eq.f32.partialorder %v3469_v0, 8.507059e+37  ;;  %v3594_v55 = vmul.f32 %v3593_v47, %v3125_v49  ;;  %v5376_v0 = vld [vmem:[%s8394_s5 + $0x38] sm:$0xff]  ;;  %v5374_v49 = vld [vmem:[%s8394_s5 + $0x28] sm:$0xff] }
 0x518   : > { %v3473_v50 = vsel %vm3470_vm5, %v3472_v33, %v3468_v22  ;;  %v3609_v8 = vmul.f32 %v3608_v28, %v3127_v26  ;;  %v3489_v48 = vmul.f32 %v3488_v4, %v3042_v63  ;;  %3803 = vmatpush.bf16.msrb.mxu0 %v5376_v0  ;;  %v2680_v35 = vsel %vm2469_vm10, %v7141_v21, 0.0 }
 0x519   : > { %v5666_v17 = vpop.eup %5665  ;;  %v3474_v51 = vmul.f32 %v3473_v50, %v3040_v44  ;;  %v3351_v16 = vand.u32 2147483648, %v7765_v32  ;;  %vm3345_vm2 = vweird.f32 %v7765_v32  ;;  %v3349_v29 = vand.u32 2147483647, %v7765_v32 }
 0x51a   : > { %5502 = vrot.lane.b32.xlu1 %v5501_v59, %s5790_s22  ;;  %v3341_v59 = vmul.f32 %v5666_v17, %v7765_v32  ;;  %v5526_v20 = vpack.i.bf16 %v3609_v8, %v3594_v55  ;;  %vm3346_vm11 = vweird.f32 %v5666_v17  ;;  %v3366_v21 = vand.u32 2147483648, %v7786_v9 }
 0x51b   : > { %v5668_v15 = vpop.eup %5667  ;;  %v5521_v61 = vpack.i.bf16 %v3489_v48, %v3474_v51  ;;  %vm3347_vm13 = vmor %vm3345_vm2, %vm3346_vm11  ;;  %vm3360_vm3 = vweird.f32 %v7786_v9  ;;  %v3364_v40 = vand.u32 2147483647, %v7786_v9  ;;  %v3352_v12 = vor.u32 1.1754944e-38, %v3351_v16 }
 0x51c   : > { %v3356_v34 = vmul.f32 %v5668_v15, %v7786_v9  ;;  %v3342_v31 = vsub.f32 1.0, %v3341_v59  ;;  %3804 = vmatpush.bf16.msrb.mxu0 %v5375_v5  ;;  %vm3361_vm1 = vweird.f32 %v5668_v15  ;;  %vm3350_vm6 = vcmp.eq.f32.partialorder %v3349_v29, 8.507059e+37  ;;  %v5372_v9 = vld [vmem:[%s8394_s5 + $0x18] sm:$0xff] }
 0x51d   : > { %vm3362_vm4 = vmor %vm3360_vm3, %vm3361_vm1  ;;  %v3367_v7 = vor.u32 1.1754944e-38, %v3366_v21  ;;  %vm3365_vm8 = vcmp.eq.f32.partialorder %v3364_v40, 8.507059e+37  ;;  %5669 = vrcp.f32 %v7356_v39  ;;  %v2857_v45 = vpop.f32.mrf.mxu0  ;;  %vm3135_vm12 = vweird.f32 %v7356_v39 }
 0x51e   : > { %v3357_v62 = vsub.f32 1.0, %v3356_v34  ;;  %v3343_v52 = vmul.f32 %v5666_v17, %v3342_v31  ;;  %5671 = vrcp.f32 %v7352_v1  ;;  %v3139_v63 = vand.u32 2147483647, %v7356_v39 }
 0x51f   : > { %5673 = vrcp.f32 %v7362_v13  ;;  %v3141_v26 = vand.u32 2147483648, %v7356_v39  ;;  %v3156_v50 = vand.u32 2147483648, %v7352_v1  ;;  %vm3150_vm0 = vweird.f32 %v7352_v1 }
 0x520   : > { %v3358_v44 = vmul.f32 %v5668_v15, %v3357_v62  ;;  %v3344_v60 = vadd.f32 %v5666_v17, %v3343_v52  ;;  %3805 = vmatpush.bf16.msrb.mxu0 %v5374_v49  ;;  %5675 = vrcp.f32 %v7358_v24  ;;  %vm3140_vm11 = vcmp.eq.f32.partialorder %v3139_v63, 8.507059e+37 }
 0x521   : > { %5507 = vrot.lane.b32.xlu2 %v5506_v38, %s5791_s25  ;;  %v3157_v31 = vor.u32 1.1754944e-38, %v3156_v50  ;;  %vm3165_vm2 = vweird.f32 %v7362_v13  ;;  %v3169_v29 = vand.u32 2147483647, %v7362_v13  ;;  %v3171_v21 = vand.u32 2147483648, %v7362_v13 }
 0x522   : > { %5512 = vrot.lane.b32.xlu1 %v5511_v2, %s5792_s24  ;;  %v3359_v41 = vadd.f32 %v5668_v15, %v3358_v44  ;;  %v3348_v19 = vsel %vm3347_vm13, %v5666_v17, %v3344_v60  ;;  %5677 = vrcp.f32 %v7366_v58 }
 0x523   : > { %v3353_v42 = vsel %vm3350_vm6, %v3352_v12, %v3348_v19  ;;  %v5670_v27 = vpop.eup %5669 }
 0x524   : > { %v3363_v57 = vsel %vm3362_vm4, %v5668_v15, %v3359_v41  ;;  %v3354_v10 = vmul.f32 %v3353_v42, %v7388_v30  ;;  %3806 = vmatpush.bf16.msrb.mxu0 %v5373_v25  ;;  %v5370_v30 = vld [vmem:[%s8394_s5 + $0x8] sm:$0xff]  ;;  %v5672_v54 = vpop.eup %5671  ;;  %v3131_v3 = vmul.f32 %v5670_v27, %v7356_v39  ;;  %vm3136_vm7 = vweird.f32 %v5670_v27 }
 0x525   : > { %v3368_v6 = vsel %vm3365_vm8, %v3367_v7, %v3363_v57  ;;  %v3146_v36 = vmul.f32 %v5672_v54, %v7352_v1  ;;  %v7872_v37 = vpop.eup %5673  ;;  %vm3151_vm14 = vweird.f32 %v5672_v54  ;;  %vm7886_vm15 = vmor %vm3135_vm12, %vm3136_vm7  ;;  %v3154_v15 = vand.u32 2147483647, %v7352_v1  ;;  %v2860_v0 = vpop.f32.mrf.mxu0 }
 0x526   : > { %v3369_v32 = vmul.f32 %v3368_v6, %v7412_v14  ;;  %v5369_v14 = vld [vmem:[%s8394_s5] sm:$0xff]  ;;  %v3132_v2 = vsub.f32 1.0, %v3131_v3  ;;  %v7874_v23 = vpop.eup %5675  ;;  %v3161_v33 = vmul.f32 %v7872_v37, %v7362_v13  ;;  %vm7892_vm5 = vmor %vm3150_vm0, %vm3151_vm14  ;;  %vm3166_vm13 = vweird.f32 %v7872_v37 }
 0x527   : > { %v3147_v53 = vsub.f32 1.0, %v3146_v36  ;;  %v3176_v28 = vmul.f32 %v7874_v23, %v7358_v24  ;;  %vm3155_vm1 = vcmp.eq.f32.partialorder %v3154_v15, 8.507059e+37  ;;  %vm3181_vm3 = vweird.f32 %v7874_v23  ;;  %vm7916_vm6 = vmor %vm3165_vm2, %vm3166_vm13 }
 0x528   : > { %v5516_v46 = vpack.i.bf16 %v3369_v32, %v3354_v10  ;;  %3807 = vmatpush.bf16.msrb.mxu0 %v5372_v9  ;;  %v3133_v38 = vmul.f32 %v5670_v27, %v3132_v2  ;;  %v3162_v17 = vsub.f32 1.0, %v3161_v33  ;;  %v3186_v57 = vand.u32 2147483648, %v7358_v24 }
 0x529   : > { %5522 = vrot.lane.b32.xlu2 %v5521_v61, %s5791_s25  ;;  %v3148_v22 = vmul.f32 %v5672_v54, %v3147_v53  ;;  %v3177_v48 = vsub.f32 1.0, %v3176_v28  ;;  %v3142_v61 = vor.u32 1.1754944e-38, %v3141_v26  ;;  %vm3722_vm4 = vcmask 785408   ;;  %s5270_s25 = sshll.u32 %s8503_s16, 3 }
 0x52a   : > { %5527 = vrot.lane.b32.xlu1 %v5526_v20, %s5792_s24  ;;  %2681 = vadd.xlane.f32.xlu0 %v2680_v35  ;;  %v3134_v4 = vadd.f32 %v5670_v27, %v3133_v38  ;;  %v3163_v62 = vmul.f32 %v7872_v37, %v3162_v17  ;;  %vm3180_vm8 = vweird.f32 %v7358_v24  ;;  %v3184_v32 = vand.u32 2147483647, %v7358_v24  ;;  %s4613_s26 = scalar_lea.hbm %s8404_s15, %s5270_s25  ;;  %s5745_s24 = scalar_lea.hbm %s8404_s15, 128 }
 0x52b   : > { %v3149_v55 = vadd.f32 %v5672_v54, %v3148_v22  ;;  %v3178_v1 = vmul.f32 %v7874_v23, %v3177_v48  ;;  %vm7923_vm7 = vmor %vm3180_vm8, %vm3181_vm3  ;;  %vm3170_vm12 = vcmp.eq.f32.partialorder %v3169_v29, 8.507059e+37  ;;  %v3187_v3 = vor.u32 1.1754944e-38, %v3186_v57 }
 0x52c   : > { %3808 = vmatpush.bf16.msrb.mxu0 %v5371_v11  ;;  %v3138_v39 = vsel %vm7886_vm15, %v5670_v27, %v3134_v4  ;;  %v3164_v41 = vadd.f32 %v7872_v37, %v3163_v62  ;;  %vm3185_vm14 = vcmp.eq.f32.partialorder %v3184_v32, 8.507059e+37  ;;  %v5678_v4 = vpop.eup %5677 }
 0x52d   : > { %v3153_v34 = vsel %vm7892_vm5, %v5672_v54, %v3149_v55  ;;  %v3143_v52 = vsel %vm3140_vm11, %v3142_v61, %v3138_v39  ;;  %v3179_v40 = vadd.f32 %v7874_v23, %v3178_v1  ;;  %v3172_v54 = vor.u32 1.1754944e-38, %v3171_v21 }
 0x52e   : > { %v3158_v44 = vsel %vm3155_vm1, %v3157_v31, %v3153_v34  ;;  %v3144_v49 = vmul.f32 %v3143_v52, %v2855_v56  ;;  %v2862_v56 = vpop.f32.mrf.mxu0  ;;  %v3191_v15 = vmul.f32 %v5678_v4, %v7366_v58  ;;  %vm3196_vm15 = vweird.f32 %v5678_v4 }
 0x52f   : > { %v3159_v60 = vmul.f32 %v3158_v44, %v2857_v45  ;;  %v3183_v24 = vsel %vm7923_vm7, %v7874_v23, %v3179_v40  ;;  %vm3195_vm5 = vweird.f32 %v7366_v58  ;;  %v3201_v52 = vand.u32 2147483648, %v7366_v58 }
 0x530   : > { %3809 = vmatpush.bf16.msrb.mxu0 %v5370_v30  ;;  %v3168_v30 = vsel %vm7916_vm6, %v7872_v37, %v3164_v41  ;;  %v3188_v38 = vsel %vm3185_vm14, %v3187_v3, %v3183_v24  ;;  %v3192_v34 = vsub.f32 1.0, %v3191_v15  ;;  %vm3197_vm11 = vmor %vm3195_vm5, %vm3196_vm15 }
 0x531   : > { %v3173_v37 = vsel %vm3170_vm12, %v3172_v54, %v3168_v30  ;;  %v3189_v28 = vmul.f32 %v3188_v38, %v2862_v56  ;;  %v3202_v29 = vor.u32 1.1754944e-38, %v3201_v52 }
 0x532   : > { %v3174_v33 = vmul.f32 %v3173_v37, %v2860_v0  ;;  %v3193_v31 = vmul.f32 %v5678_v4, %v3192_v34 }
 0x534   : > { %3810 = vmatpush.bf16.msrb.mxu0 %v5369_v14  ;;  %v3194_v1 = vadd.f32 %v5678_v4, %v3193_v31 }
 0x536   : > { %v2865_v62 = vpop.f32.mrf.mxu0 }
 0x53a   : > { %v5478_v16 = vpop.permute.xlu2 %5477 }
 0x53b   : > { %v5480_v7 = vunpack.i.h.bf16 %v5478_v16  ;;  %v5479_v42 = vunpack.i.l.bf16 %v5478_v16  ;;  %v3198_v16 = vsel %vm3197_vm11, %v5678_v4, %v3194_v1 }
 0x53e   : > { %5517 = vrot.lane.b32.xlu0 %v5516_v46, %s5790_s22 }
 0x549   : > { %v5473_v51 = vpop.permute.xlu1 %5472 }
 0x54a   : > { %v5475_v5 = vunpack.i.h.bf16 %v5473_v51  ;;  %v5474_v35 = vunpack.i.l.bf16 %v5473_v51 }
 0x54c   : > { %v3707_v19 = vsel %vm2136_vm9, %v3159_v60, %v5475_v5  ;;  %v3706_v12 = vsel %vm2136_vm9, %v3144_v49, %v5474_v35  ;;  %v3199_v49 = vand.u32 2147483647, %v7366_v58 }
 0x54d   : > { %v3714_v11 = vsel %vm2469_vm10, %v3706_v12, %v5479_v42  ;;  %v3715_v13 = vsel %vm2469_vm10, %v3707_v19, %v5480_v7  ;;  %v2867_v42 = vpop.f32.mrf.mxu0 }
 0x54e   : > { %vm3200_vm13 = vcmp.eq.f32.partialorder %v3199_v49, 8.507059e+37 }
 0x54f   : > { %v3203_v19 = vsel %vm3200_vm13, %v3202_v29, %v3198_v16 }
 0x55a   : > { %v7876_v47 = vpop.permute.xlu0 %5482 }
 0x55b   : > { %v5485_v53 = vunpack.i.h.bf16 %v7876_v47  ;;  %v5484_v45 = vunpack.i.l.bf16 %v7876_v47 }
 0x55d   : > { %v3708_v17 = vsel %vm2136_vm9, %v3174_v33, %v5484_v45  ;;  %v3709_v63 = vsel %vm2136_vm9, %v3189_v28, %v5485_v53 }
 0x562   : > { %v7896_v20 = vpop.permute.xlu0 %5487 }
 0x563   : > { %v5490_v23 = vunpack.i.h.bf16 %v7896_v20  ;;  %v5489_v22 = vunpack.i.l.bf16 %v7896_v20 }
 0x565   : > { %v3717_v47 = vsel %vm2469_vm10, %v3709_v63, %v5490_v23  ;;  %v3716_v8 = vsel %vm2469_vm10, %v3708_v17, %v5489_v22 }
 0x56a   : > { %v5493_v6 = vpop.permute.xlu0 %5492 }
 0x56b   : > { %v5495_v46 = vunpack.i.h.bf16 %v5493_v6  ;;  %v5494_v25 = vunpack.i.l.bf16 %v5493_v6  ;;  %v3204_v6 = vmul.f32 %v3203_v19, %v2865_v62 }
 0x56d   : > { %v3723_v14 = vsel %vm3722_vm4, %v3714_v11, %v5494_v25  ;;  %v3724_v27 = vsel %vm3722_vm4, %v3715_v13, %v5495_v46 }
 0x56e   : > { %v3731_v36 = vpack.c.bf16 %v3724_v27, %v3723_v14 }
 0x570   : > { %3811 = vmatmul.bf16.vlgmr.msrb.gmra.mxu0 %v3731_v36 }
 0x572   : > { %v5498_v55 = vpop.permute.xlu0 %5497 }
 0x573   : > { %v5500_v26 = vunpack.i.h.bf16 %v5498_v55  ;;  %v5499_v50 = vunpack.i.l.bf16 %v5498_v55 }
 0x574   : > { %v2679_v2 = vpop.xlane.xlu1 %2678 }
 0x575   : > { %5679 = vrcp.f32 %v2679_v2  ;;  %v3725_v59 = vsel %vm3722_vm4, %v3716_v8, %v5499_v50  ;;  %v3726_v51 = vsel %vm3722_vm4, %v3717_v47, %v5500_v26  ;;  %v3216_v44 = vand.u32 2147483648, %v2679_v2 }
 0x576   : > { %v3732_v39 = vpack.c.bf16 %v3726_v51, %v3725_v59  ;;  %vm3210_vm1 = vweird.f32 %v2679_v2  ;;  %v3214_v60 = vand.u32 2147483647, %v2679_v2 }
 0x577   : > { %v3217_v21 = vor.u32 1.1754944e-38, %v3216_v44 }
 0x578   : > { %vm3215_vm3 = vcmp.eq.f32.partialorder %v3214_v60, 8.507059e+37 }
 0x57b   : > { %v5680_v48 = vpop.eup %5679 }
 0x57c   : > { %v3206_v20 = vmul.f32 %v5680_v48, %v2679_v2  ;;  %vm3211_vm0 = vweird.f32 %v5680_v48  ;;  %v7948_v35 = vpop.xlane.xlu2 %2684 }
 0x57d   : > { %vm3212_vm2 = vmor %vm3210_vm1, %vm3211_vm0  ;;  %5681 = vrcp.f32 %v7948_v35  ;;  %vm3240_vm8 = vweird.f32 %v7948_v35  ;;  %v3246_v33 = vand.u32 2147483648, %v7948_v35  ;;  %v3244_v4 = vand.u32 2147483647, %v7948_v35 }
 0x57e   : > { %v3207_v61 = vsub.f32 1.0, %v3206_v20 }
 0x57f   : > { %v3247_v50 = vor.u32 1.1754944e-38, %v3246_v33  ;;  %vm3245_vm0 = vcmp.eq.f32.partialorder %v3244_v4, 8.507059e+37 }
 0x580   : > { %v3208_v0 = vmul.f32 %v5680_v48, %v3207_v61  ;;  %3816 = vmatmul.bf16.gmra.mxu0 %v3732_v39 }
 0x582   : > { %v3209_v5 = vadd.f32 %v5680_v48, %v3208_v0 }
 0x583   : > { %v5682_v3 = vpop.eup %5681 }
 0x584   : > { %v3213_v41 = vsel %vm3212_vm2, %v5680_v48, %v3209_v5  ;;  %v5508_v10 = vpop.permute.xlu2 %5507  ;;  %v3236_v36 = vmul.f32 %v5682_v3, %v7948_v35  ;;  %vm3241_vm6 = vweird.f32 %v5682_v3 }
 0x585   : > { %v3218_v12 = vsel %vm3215_vm3, %v3217_v21, %v3213_v41  ;;  %v5510_v25 = vunpack.i.h.bf16 %v5508_v10  ;;  %v5509_v9 = vunpack.i.l.bf16 %v5508_v10  ;;  %vm3242_vm12 = vmor %vm3240_vm8, %vm3241_vm6 }
 0x586   : > { %v3219_v32 = vmul.f32 %v3218_v12, %v2867_v42  ;;  %v3237_v53 = vsub.f32 1.0, %v3236_v36 }
 0x588   : > { %v3238_v45 = vmul.f32 %v5682_v3, %v3237_v53 }
 0x58a   : > { %v3239_v23 = vadd.f32 %v5682_v3, %v3238_v45 }
 0x58c   : > { %v5503_v40 = vpop.permute.xlu1 %5502  ;;  %v3243_v63 = vsel %vm3242_vm12, %v5682_v3, %v3239_v23  ;;  %v5523_v59 = vpop.permute.xlu2 %5522 }
 0x58d   : > { %v5505_v57 = vunpack.i.h.bf16 %v5503_v40  ;;  %v5504_v7 = vunpack.i.l.bf16 %v5503_v40  ;;  %v3248_v48 = vsel %vm3245_vm0, %v3247_v50, %v3243_v63  ;;  %v5525_v0 = vunpack.i.h.bf16 %v5523_v59 }
 0x58e   : > { %v3249_v31 = vmul.f32 %v3248_v48, %v7378_v43  ;;  %v5524_v62 = vunpack.i.l.bf16 %v5523_v59  ;;  %v5533_v43 = vld [vmem:[%s8395_s6] ss:$0 sm:$0xff] }
 0x58f   : > { %v3711_v58 = vsel %vm2136_vm9, %v3219_v32, %v5505_v57  ;;  %v3710_v46 = vsel %vm2136_vm9, %v3204_v6, %v5504_v7 }
 0x590   : > { %v3718_v24 = vsel %vm2469_vm10, %v3710_v46, %v5509_v9  ;;  %v3719_v14 = vsel %vm2469_vm10, %v3711_v58, %v5510_v25  ;;  %v8502_v9 = vld [vmem:[#allocation10_spill] sm:$0xff] }
 0x594   : > { %v5513_v11 = vpop.permute.xlu1 %5512 }
 0x595   : > { %v5515_v13 = vunpack.i.h.bf16 %v5513_v11  ;;  %v5514_v30 = vunpack.i.l.bf16 %v5513_v11 }
 0x597   : > { %v3727_v27 = vsel %vm3722_vm4, %v3718_v24, %v5514_v30  ;;  %v3728_v54 = vsel %vm3722_vm4, %v3719_v14, %v5515_v13 }
 0x598   : > { %v3733_v56 = vpack.c.bf16 %v3728_v54, %v3727_v27 }
 0x59a   : > { %3821 = vmatmul.bf16.gmra.mxu0 %v3733_v56 }
 0x59c   : > { %v5528_v51 = vpop.permute.xlu1 %5527 }
 0x59d   : > { %v2682_v2 = vpop.xlane.xlu0 %2681  ;;  %v5530_v1 = vunpack.i.h.bf16 %v5528_v51  ;;  %v5529_v5 = vunpack.i.l.bf16 %v5528_v51 }
 0x59e   : > { %5683 = vrcp.f32 %v2682_v2  ;;  %v3231_v28 = vand.u32 2147483648, %v2682_v2  ;;  %v3229_v17 = vand.u32 2147483647, %v2682_v2  ;;  %vm3225_vm14 = vweird.f32 %v2682_v2 }
 0x5a0   : > { %v3232_v47 = vor.u32 1.1754944e-38, %v3231_v28  ;;  %vm3230_vm5 = vcmp.eq.f32.partialorder %v3229_v17, 8.507059e+37 }
 0x5a4   : > { %v5684_v37 = vpop.eup %5683 }
 0x5a5   : > { %v3221_v38 = vmul.f32 %v5684_v37, %v2682_v2  ;;  %vm3226_vm7 = vweird.f32 %v5684_v37 }
 0x5a6   : > { %vm3227_vm15 = vmor %vm3225_vm14, %vm3226_vm7 }
 0x5a7   : > { %v3222_v22 = vsub.f32 1.0, %v3221_v38 }
 0x5a9   : > { %v3223_v55 = vmul.f32 %v5684_v37, %v3222_v22 }
 0x5ab   : > { %v3224_v26 = vadd.f32 %v5684_v37, %v3223_v55 }
 0x5ad   : > { %v3228_v8 = vsel %vm3227_vm15, %v5684_v37, %v3224_v26 }
 0x5ae   : > { %v3233_v15 = vsel %vm3230_vm5, %v3232_v47, %v3228_v8 }
 0x5af   : > { %v3234_v39 = vmul.f32 %v3233_v15, %v7368_v18 }
 0x5b0   : > { %v5518_v20 = vpop.permute.xlu0 %5517 }
 0x5b1   : > { %v5520_v34 = vunpack.i.h.bf16 %v5518_v20  ;;  %v5519_v61 = vunpack.i.l.bf16 %v5518_v20 }
 0x5b3   : > { %v3712_v35 = vsel %vm2136_vm9, %v3234_v39, %v5519_v61  ;;  %v3713_v52 = vsel %vm2136_vm9, %v3249_v31, %v5520_v34 }
 0x5b4   : > { %v3720_v44 = vsel %vm2469_vm10, %v3712_v35, %v5524_v62  ;;  %v3721_v49 = vsel %vm2469_vm10, %v3713_v52, %v5525_v0 }
 0x5b5   : > { %v3729_v60 = vsel %vm3722_vm4, %v3720_v44, %v5529_v5  ;;  %v3730_v18 = vsel %vm3722_vm4, %v3721_v49, %v5530_v1 }
 0x5b6   : > { %v3734_v16 = vpack.c.bf16 %v3730_v18, %v3729_v60 }
 0x5b8   : > { %3826 = vmatmul.bf16.gmra.mxu0 %v3734_v16 }
 0x5ed   : > { %v3812_v41 = vpop.f32.mrf.mxu0 }
 0x5ee   : > { %v3813_v29 = vadd.f32 %v5533_v43, %v3812_v41 }
 0x5f0   : > { %3834 = vadd.xlane.f32.xlu2 %v3813_v29 }
 0x5f5   : > { %v3814_v21 = vpop.f32.mrf.mxu0 }
 0x5f6   : > { %v3815_v40 = vadd.f32 %v5533_v43, %v3814_v21  ;;  %v8021_v21 = vld [vmem:[%s8396_s7] ss:$0 sm:$0xff] }
 0x5f8   : > { %3836 = vadd.xlane.f32.xlu1 %v3815_v40 }
 0x5fd   : > { %v3817_v19 = vpop.f32.mrf.mxu0 }
 0x5fe   : > { %v3818_v12 = vadd.f32 %v5533_v43, %v3817_v19 }
 0x600   : > { %3838 = vadd.xlane.f32.xlu0 %v3818_v12 }
 0x605   : > { %v3819_v57 = vpop.f32.mrf.mxu0 }
 0x606   : > { %v3820_v7 = vadd.f32 %v5533_v43, %v3819_v57  ;;  %v8027_v57 = vld [vmem:[%s8397_s8] ss:$0 sm:$0xff] }
 0x608   : > { %3840 = vadd.xlane.f32.xlu2 %v3820_v7 }
 0x617   : > { %v3822_v42 = vpop.f32.mrf.mxu0 }
 0x618   : > { %v3823_v6 = vadd.f32 %v5533_v43, %v3822_v42 }
 0x61a   : > { %3842 = vadd.xlane.f32.xlu1 %v3823_v6 }
 0x61f   : > { %v3824_v10 = vpop.f32.mrf.mxu0 }
 0x620   : > { %v3825_v32 = vadd.f32 %v5533_v43, %v3824_v10 }
 0x622   : > { %3844 = vadd.xlane.f32.xlu2 %v3825_v32 }
 0x635   : > { %v3827_v58 = vpop.f32.mrf.mxu0 }
 0x636   : > { %v3828_v46 = vadd.f32 %v5533_v43, %v3827_v58 }
 0x638   : > { %3846 = vadd.xlane.f32.xlu2 %v3828_v46 }
 0x63d   : > { %v3829_v27 = vpop.f32.mrf.mxu0 }
 0x63e   : > { %v3830_v56 = vadd.f32 %v5533_v43, %v3829_v27 }
 0x663   : > { %v3835_v25 = vpop.xlane.xlu2 %3834 }
 0x664   : > { %v3850_v11 = vmul.f32 %v3835_v25, %v8502_v9 }
 0x666   : > { %v7976_v13 = vsub.f32 %v3813_v29, %v3850_v11 }
 0x668   : > { %v3866_v30 = vmul.f32 %v7976_v13, %v7976_v13 }
 0x66a   : > { %3874 = vadd.xlane.f32.xlu0 %v3866_v30  ;;  %v5717_v30 = vld [vmem:[%s5938_s17] sm:$0xff] }
 0x66b   : > { %v3837_v24 = vpop.xlane.xlu1 %3836 }
 0x66c   : > { %v3851_v14 = vmul.f32 %v3837_v24, %v8502_v9 }
 0x66e   : > { %v7981_v54 = vsub.f32 %v3815_v40, %v3851_v14 }
 0x670   : > { %v3867_v3 = vmul.f32 %v7981_v54, %v7981_v54 }
 0x672   : > { %3876 = vadd.xlane.f32.xlu1 %v3867_v3  ;;  %3848 = vadd.xlane.f32.xlu0 %v3830_v56 }
 0x673   : > { %v3839_v36 = vpop.xlane.xlu0 %3838 }
 0x674   : > { %v3852_v2 = vmul.f32 %v3839_v36, %v8502_v9 }
 0x676   : > { %v7986_v53 = vsub.f32 %v3818_v12, %v3852_v2 }
 0x678   : > { %v3868_v45 = vmul.f32 %v7986_v53, %v7986_v53 }
 0x67a   : > { %3878 = vadd.xlane.f32.xlu1 %v3868_v45 }
 0x67b   : > { %v3841_v37 = vpop.xlane.xlu2 %3840 }
 0x67c   : > { %v3853_v38 = vmul.f32 %v3841_v37, %v8502_v9 }
 0x67e   : > { %v7991_v23 = vsub.f32 %v3820_v7, %v3853_v38 }
 0x680   : > { %v3869_v22 = vmul.f32 %v7991_v23, %v7991_v23 }
 0x682   : > { %3880 = vadd.xlane.f32.xlu2 %v3869_v22 }
 0x68d   : > { %v3843_v33 = vpop.xlane.xlu1 %3842 }
 0x68e   : > { %v3854_v28 = vmul.f32 %v3843_v33, %v8502_v9 }
 0x690   : > { %v7996_v4 = vsub.f32 %v3823_v6, %v3854_v28  ;;  %v5718_v28 = vld [vmem:[%s5938_s17 + $0x8] sm:$0xff] }
 0x692   : > { %v3870_v55 = vmul.f32 %v7996_v4, %v7996_v4 }
 0x694   : > { %3882 = vadd.xlane.f32.xlu0 %v3870_v55 }
 0x695   : > { %v3845_v17 = vpop.xlane.xlu2 %3844 }
 0x696   : > { %v3855_v63 = vmul.f32 %v3845_v17, %v8502_v9 }
 0x698   : > { %v8001_v26 = vsub.f32 %v3825_v32, %v3855_v63 }
 0x69a   : > { %v3871_v50 = vmul.f32 %v8001_v26, %v8001_v26 }
 0x69c   : > { %3884 = vadd.xlane.f32.xlu1 %v3871_v50 }
 0x6ab   : > { %v3847_v47 = vpop.xlane.xlu2 %3846 }
 0x6ac   : > { %v3856_v8 = vmul.f32 %v3847_v47, %v8502_v9 }
 0x6ae   : > { %v8006_v48 = vsub.f32 %v3828_v46, %v3856_v8 }
 0x6b0   : > { %v3872_v15 = vmul.f32 %v8006_v48, %v8006_v48 }
 0x6b2   : > { %3886 = vadd.xlane.f32.xlu2 %v3872_v15 }
 0x6dd   : > { %v3875_v59 = vpop.xlane.xlu0 %3874 }
 0x6de   : > { %v3890_v51 = vmul.f32 %v3875_v59, %v8502_v9 }
 0x6e0   : > { %v3898_v20 = vadd.f32 1e-05, %v3890_v51 }
 0x6e2   : > { %5685 = vrsqrt.f32 %v3898_v20  ;;  %vm3912_vm10 = vweird.f32 %v3898_v20 }
 0x6e5   : > { %v3877_v39 = vpop.xlane.xlu1 %3876  ;;  %v3849_v34 = vpop.xlane.xlu0 %3848 }
 0x6e6   : > { %v3891_v61 = vmul.f32 %v3877_v39, %v8502_v9  ;;  %v3857_v31 = vmul.f32 %v3849_v34, %v8502_v9  ;;  %v5719_v34 = vld [vmem:[%s5938_s17 + $0x10] sm:$0xff] }
 0x6e8   : > { %v5686_v0 = vpop.eup %5685  ;;  %v3899_v62 = vadd.f32 1e-05, %v3891_v61  ;;  %v8013_v1 = vsub.f32 %v3830_v56, %v3857_v31 }
 0x6e9   : > { %v3907_v5 = vmul.f32 %v5686_v0, %v3898_v20  ;;  %vm3913_vm9 = vweird.f32 %v5686_v0 }
 0x6ea   : > { %5687 = vrsqrt.f32 %v3899_v62  ;;  %v3873_v35 = vmul.f32 %v8013_v1, %v8013_v1  ;;  %vm3914_vm4 = vmor %vm3912_vm10, %vm3913_vm9  ;;  %vm3922_vm1 = vweird.f32 %v3899_v62 }
 0x6eb   : > { %v3908_v52 = vmul.f32 %v5686_v0, %v3907_v5 }
 0x6ec   : > { %3888 = vadd.xlane.f32.xlu0 %v3873_v35 }
 0x6ed   : > { %v3909_v44 = vmul.f32 0.5, %v3908_v52  ;;  %v3879_v49 = vpop.xlane.xlu1 %3878 }
 0x6ee   : > { %v3892_v60 = vmul.f32 %v3879_v49, %v8502_v9 }
 0x6ef   : > { %v3910_v18 = vsub.f32 1.5, %v3909_v44 }
 0x6f0   : > { %v5688_v16 = vpop.eup %5687  ;;  %v3900_v43 = vadd.f32 1e-05, %v3892_v60 }
 0x6f1   : > { %v3911_v41 = vmul.f32 %v5686_v0, %v3910_v18  ;;  %v3917_v29 = vmul.f32 %v5688_v16, %v3899_v62  ;;  %vm3923_vm11 = vweird.f32 %v5688_v16  ;;  %v5720_v18 = vld [vmem:[%s5938_s17 + $0x18] sm:$0xff] }
 0x6f2   : > { %5689 = vrsqrt.f32 %v3900_v43  ;;  %vm3924_vm2 = vmor %vm3922_vm1, %vm3923_vm11  ;;  %vm3932_vm3 = vweird.f32 %v3900_v43 }
 0x6f3   : > { %v3915_v40 = vsel %vm3914_vm4, %v5686_v0, %v3911_v41  ;;  %v3918_v19 = vmul.f32 %v5688_v16, %v3917_v29 }
 0x6f4   : > { %v3986_v12 = vmul.f32 %v3915_v40, %v7976_v13 }
 0x6f5   : > { %v3919_v7 = vmul.f32 0.5, %v3918_v19  ;;  %v3881_v42 = vpop.xlane.xlu2 %3880 }
 0x6f6   : > { %v3893_v6 = vmul.f32 %v3881_v42, %v8502_v9  ;;  %v3997_v10 = vmul.f32 %v8021_v21, %v3986_v12 }
 0x6f7   : > { %v3920_v32 = vsub.f32 1.5, %v3919_v7 }
 0x6f8   : > { %v5690_v58 = vpop.eup %5689  ;;  %v3901_v46 = vadd.f32 1e-05, %v3893_v6  ;;  %v4008_v25 = vadd.f32 %v8027_v57, %v3997_v10 }
 0x6f9   : > { %v3921_v11 = vmul.f32 %v5688_v16, %v3920_v32  ;;  %v3927_v13 = vmul.f32 %v5690_v58, %v3900_v43  ;;  %vm3933_vm13 = vweird.f32 %v5690_v58 }
 0x6fa   : > { %5691 = vrsqrt.f32 %v3901_v46  ;;  %v8033_v24 = vadd.f32 %v5717_v30, %v4008_v25  ;;  %vm3934_vm6 = vmor %vm3932_vm3, %vm3933_vm13  ;;  %vm3942_vm7 = vweird.f32 %v3901_v46 }
 0x6fb   : > { %v3925_v14 = vsel %vm3924_vm2, %v5688_v16, %v3921_v11  ;;  %v3928_v27 = vmul.f32 %v5690_v58, %v3927_v13 }
 0x6fc   : > { %v3987_v56 = vmul.f32 %v3925_v14, %v7981_v54  ;;  %4026 = vadd.xlane.f32.xlu1 %v8033_v24 }
 0x6fd   : > { %v3929_v3 = vmul.f32 0.5, %v3928_v27  ;;  %v5722_v27 = vld [vmem:[%s5938_s17 + $0x28] sm:$0xff] }
 0x6fe   : > { %v3998_v36 = vmul.f32 %v8021_v21, %v3987_v56 }
 0x6ff   : > { %v3930_v2 = vsub.f32 1.5, %v3929_v3 }
 0x700   : > { %v5692_v45 = vpop.eup %5691  ;;  %v4009_v37 = vadd.f32 %v8027_v57, %v3998_v36 }
 0x701   : > { %v3931_v38 = vmul.f32 %v5690_v58, %v3930_v2  ;;  %v3937_v22 = vmul.f32 %v5692_v45, %v3901_v46  ;;  %vm3943_vm8 = vweird.f32 %v5692_v45 }
 0x702   : > { %v8040_v55 = vadd.f32 %v5718_v28, %v4009_v37  ;;  %vm3944_vm12 = vmor %vm3942_vm7, %vm3943_vm8 }
 0x703   : > { %v3935_v17 = vsel %vm3934_vm6, %v5690_v58, %v3931_v38  ;;  %v3938_v63 = vmul.f32 %v5692_v45, %v3937_v22  ;;  %v5721_v58 = vld [vmem:[%s5938_s17 + $0x20] sm:$0xff] }
 0x704   : > { %v3988_v50 = vmul.f32 %v3935_v17, %v7986_v53  ;;  %4028 = vadd.xlane.f32.xlu2 %v8040_v55  ;;  %v5723_v17 = vld [vmem:[%s5938_s17 + $0x30] sm:$0xff] }
 0x705   : > { %v3939_v8 = vmul.f32 0.5, %v3938_v63 }
 0x706   : > { %v3999_v15 = vmul.f32 %v8021_v21, %v3988_v50 }
 0x707   : > { %v3883_v33 = vpop.xlane.xlu0 %3882  ;;  %v3940_v59 = vsub.f32 1.5, %v3939_v8 }
 0x708   : > { %v3894_v54 = vmul.f32 %v3883_v33, %v8502_v9  ;;  %v4010_v51 = vadd.f32 %v8027_v57, %v3999_v15 }
 0x709   : > { %v3941_v20 = vmul.f32 %v5692_v45, %v3940_v59 }
 0x70a   : > { %v3902_v47 = vadd.f32 1e-05, %v3894_v54  ;;  %v8048_v61 = vadd.f32 %v5719_v34, %v4010_v51 }
 0x70b   : > { %v3945_v31 = vsel %vm3944_vm12, %v5692_v45, %v3941_v20 }
 0x70c   : > { %5693 = vrsqrt.f32 %v3902_v47  ;;  %v3989_v62 = vmul.f32 %v3945_v31, %v7991_v23  ;;  %4030 = vadd.xlane.f32.xlu0 %v8048_v61  ;;  %vm3952_vm15 = vweird.f32 %v3902_v47 }
 0x70e   : > { %v4000_v52 = vmul.f32 %v8021_v21, %v3989_v62 }
 0x70f   : > { %v3885_v39 = vpop.xlane.xlu1 %3884 }
 0x710   : > { %v3895_v53 = vmul.f32 %v3885_v39, %v8502_v9  ;;  %v4011_v49 = vadd.f32 %v8027_v57, %v4000_v52 }
 0x712   : > { %v5694_v0 = vpop.eup %5693  ;;  %v3903_v5 = vadd.f32 1e-05, %v3895_v53  ;;  %v8056_v16 = vadd.f32 %v5720_v18, %v4011_v49  ;;  %v5724_v18 = vld [vmem:[%s5938_s17 + $0x38] sm:$0xff]  ;;  %s4616_s17 = sshll.u32 %s4613_s26, 4  ;;  %s4617_s17 = int_to_ptr.hbm [resolvable:$true] %s4616_s17 }
 0x713   : > { %v3947_v35 = vmul.f32 %v5694_v0, %v3902_v47  ;;  %vm3953_vm14 = vweird.f32 %v5694_v0  ;;  %s5739_s22 = sshra.s32 %s4617_s17, 4  ;;  %s5740_s22 = int_to_ptr.hbm [resolvable:$true] %s5739_s22 }
 0x714   : > { %5695 = vrsqrt.f32 %v3903_v5  ;;  %4032 = vadd.xlane.f32.xlu1 %v8056_v16  ;;  %vm3954_vm0 = vmor %vm3952_vm15, %vm3953_vm14  ;;  %vm3962_vm9 = vweird.f32 %v3903_v5  ;;  %s5741_s27 = scalar_lea.hbm %s5740_s22, 64  ;;  %p5746_p2 = scmp.lt.s32.totalorder %s5740_s22, %s8404_s15 }
 0x715   : > { %v3948_v44 = vmul.f32 %v5694_v0, %v3947_v35  ;;  %p5742_p13 = scmp.ne.s32.totalorder %s5740_s22, %s5741_s27  ;;  %p5747_p3 = scmp.lt.s32.totalorder %s5745_s24, %s5741_s27 }
 0x717   : > { %v3949_v60 = vmul.f32 0.5, %v3948_v44  ;;  %p5743_p0 = pnand %p5742_p13, %p5914_p6  ;;  %p5748_p4 = por %p5747_p3, %p5746_p2 }
 0x719   : > { %v3950_v43 = vsub.f32 1.5, %v3949_v60  ;;  %p5744_p1 = pneg %p5743_p0 }
 0x71a   : > { %v5696_v41 = vpop.eup %5695 }
 0x71b   : > { %v3951_v23 = vmul.f32 %v5694_v0, %v3950_v43  ;;  %v3957_v29 = vmul.f32 %v5696_v41, %v3903_v5  ;;  %vm3963_vm5 = vweird.f32 %v5696_v41  ;;  %p5749_p5 = pnand %p5748_p4, %p5744_p1 }
 0x71c   : > { %vm3964_vm10 = vmor %vm3962_vm9, %vm3963_vm5 }
 0x71d   : > { %v3955_v40 = vsel %vm3954_vm0, %v5694_v0, %v3951_v23  ;;  %v3958_v19 = vmul.f32 %v5696_v41, %v3957_v29 }
 0x71e   : > { %v3990_v12 = vmul.f32 %v3955_v40, %v7996_v4 }
 0x71f   : > { %v3959_v7 = vmul.f32 0.5, %v3958_v19 }
 0x720   : > { %v4001_v42 = vmul.f32 %v8021_v21, %v3990_v12 }
 0x721   : > { %v3960_v6 = vsub.f32 1.5, %v3959_v7 }
 0x722   : > { %v4012_v10 = vadd.f32 %v8027_v57, %v4001_v42 }
 0x723   : > { %v3961_v32 = vmul.f32 %v5696_v41, %v3960_v6 }
 0x724   : > { %v8063_v46 = vadd.f32 %v5721_v58, %v4012_v10 }
 0x725   : > { %v3965_v25 = vsel %vm3964_vm10, %v5696_v41, %v3961_v32  ;;  %v3887_v30 = vpop.xlane.xlu2 %3886 }
 0x726   : > { %v3991_v11 = vmul.f32 %v3965_v25, %v8001_v26  ;;  %4034 = vadd.xlane.f32.xlu2 %v8063_v46  ;;  %v3896_v14 = vmul.f32 %v3887_v30, %v8502_v9 }
 0x728   : > { %v4002_v4 = vmul.f32 %v8021_v21, %v3991_v11  ;;  %v3904_v3 = vadd.f32 1e-05, %v3896_v14 }
 0x72a   : > { %v4013_v13 = vadd.f32 %v8027_v57, %v4002_v4  ;;  %5697 = vrsqrt.f32 %v3904_v3  ;;  %vm3972_vm11 = vweird.f32 %v3904_v3 }
 0x72c   : > { %v8071_v56 = vadd.f32 %v5722_v27, %v4013_v13  ;;  %v5199_v27 = vld [vmem:[%s8400_s11 + $0x70] sm:$0xf] }
 0x72e   : > { %4036 = vadd.xlane.f32.xlu0 %v8071_v56 }
 0x730   : > { %v5698_v36 = vpop.eup %5697 }
 0x731   : > { %v3967_v2 = vmul.f32 %v5698_v36, %v3904_v3  ;;  %vm3973_vm4 = vweird.f32 %v5698_v36  ;;  %v5392_v3 = vld [vmem:[%s8400_s11 + $0x74] sm:$0xf0] }
 0x732   : > { %vm3974_vm1 = vmor %vm3972_vm11, %vm3973_vm4 }
 0x733   : > { %v3968_v26 = vmul.f32 %v5698_v36, %v3967_v2  ;;  %v5200_v2 = vor.u32 %v5392_v3, %v5199_v27  ;;  %v5161_v3 = vld [vmem:[%s8400_s11 + $0x28] sm:$0xf0] }
 0x735   : > { %v3969_v45 = vmul.f32 0.5, %v3968_v26  ;;  %v5201_v26 = vld [vmem:[%s8400_s11 + $0x78] sm:$0xf0]  ;;  %4314 = vmatpush.bf16.msra.mxu1 %v5200_v2 }
 0x737   : > { %v3970_v37 = vsub.f32 1.5, %v3969_v45 }
 0x739   : > { %v3971_v38 = vmul.f32 %v5698_v36, %v3970_v37 }
 0x73b   : > { %v3975_v22 = vsel %vm3974_vm1, %v5698_v36, %v3971_v38  ;;  %v5391_v36 = vld [vmem:[%s8400_s11 + $0x74] sm:$0xf] }
 0x73c   : > { %v3992_v33 = vmul.f32 %v3975_v22, %v8006_v48  ;;  %v5204_v45 = vor.u32 %v5391_v36, %v5201_v26  ;;  %v5191_v22 = vld [vmem:[%s8400_s11 + $0x60] sm:$0xf]  ;;  %v5151_v26 = vld [vmem:[%s8400_s11 + $0x10] sm:$0xf] }
 0x73e   : > { %v4003_v28 = vmul.f32 %v8021_v21, %v3992_v33  ;;  %4343 = vmatpush.bf16.msra.mxu2 %v5204_v45  ;;  %v5390_v33 = vld [vmem:[%s8400_s11 + $0x64] sm:$0xf0]  ;;  %v5380_v45 = vld [vmem:[%s8400_s11 + $0x14] sm:$0xf0] }
 0x740   : > { %v4014_v54 = vadd.f32 %v8027_v57, %v4003_v28  ;;  %v5389_v28 = vld [vmem:[%s8400_s11 + $0x64] sm:$0xf] }
 0x742   : > { %v8078_v63 = vadd.f32 %v5723_v17, %v4014_v54  ;;  %v5192_v54 = vor.u32 %v5390_v33, %v5191_v22  ;;  %v5193_v17 = vld [vmem:[%s8400_s11 + $0x68] sm:$0xf0]  ;;  %v5153_v22 = vld [vmem:[%s8400_s11 + $0x18] sm:$0xf0] }
 0x744   : > { %4038 = vadd.xlane.f32.xlu0 %v8078_v63  ;;  %4315 = vmatpush.bf16.msra.mxu1 %v5192_v54 }
 0x75f   : > { %v3889_v50 = vpop.xlane.xlu0 %3888 }
 0x760   : > { %v3897_v47 = vmul.f32 %v3889_v50, %v8502_v9 }
 0x762   : > { %v3905_v8 = vadd.f32 1e-05, %v3897_v47  ;;  %v5196_v47 = vor.u32 %v5389_v28, %v5193_v17 }
 0x764   : > { %5699 = vrsqrt.f32 %v3905_v8  ;;  %vm3982_vm13 = vweird.f32 %v3905_v8  ;;  %4344 = vmatpush.bf16.msra.mxu2 %v5196_v47  ;;  %v5152_v47 = vor.u32 %v5380_v45, %v5151_v26 }
 0x76a   : > { %v5700_v15 = vpop.eup %5699 }
 0x76b   : > { %v3977_v59 = vmul.f32 %v5700_v15, %v3905_v8  ;;  %vm3983_vm2 = vweird.f32 %v5700_v15  ;;  %v5183_v8 = vld [vmem:[%s8400_s11 + $0x50] sm:$0xf] }
 0x76c   : > { %vm3984_vm3 = vmor %vm3982_vm13, %vm3983_vm2 }
 0x76d   : > { %v3978_v51 = vmul.f32 %v5700_v15, %v3977_v59 }
 0x76f   : > { %v3979_v20 = vmul.f32 0.5, %v3978_v51  ;;  %v4027_v39 = vpop.xlane.xlu1 %4026  ;;  %v5387_v51 = vld [vmem:[%s8400_s11 + $0x54] sm:$0xf] }
 0x770   : > { %v4042_v48 = vmul.f32 %v4027_v39, %v8502_v9 }
 0x771   : > { %v3980_v34 = vsub.f32 1.5, %v3979_v20  ;;  %v5185_v20 = vld [vmem:[%s8400_s11 + $0x58] sm:$0xf0] }
 0x772   : > { %v8084_v53 = vsub.f32 %v8033_v24, %v4042_v48  ;;  %v5188_v39 = vor.u32 %v5387_v51, %v5185_v20  ;;  %v5175_v48 = vld [vmem:[%s8400_s11 + $0x40] sm:$0xf]  ;;  %v5377_v20 = vld [vmem:[%s8400_s11 + $0x4] sm:$0xf] }
 0x773   : > { %v3981_v31 = vmul.f32 %v5700_v15, %v3980_v34  ;;  %v5386_v34 = vld [vmem:[%s8400_s11 + $0x44] sm:$0xf0] }
 0x774   : > { %v4058_v0 = vmul.f32 %v8084_v53, %v8084_v53  ;;  %4345 = vmatpush.bf16.msra.mxu2 %v5188_v39  ;;  %v5145_v39 = vld [vmem:[%s8400_s11 + $0x8] sm:$0xf0] }
 0x775   : > { %v3985_v62 = vsel %vm3984_vm3, %v5700_v15, %v3981_v31  ;;  %v5388_v15 = vld [vmem:[%s8400_s11 + $0x54] sm:$0xf0]  ;;  %v5385_v31 = vld [vmem:[%s8400_s11 + $0x44] sm:$0xf] }
 0x776   : > { %v3993_v5 = vmul.f32 %v3985_v62, %v8013_v1  ;;  %4066 = vadd.xlane.f32.xlu1 %v4058_v0  ;;  %v5184_v59 = vor.u32 %v5388_v15, %v5183_v8  ;;  %v5143_v15 = vld [vmem:[%s8400_s11] sm:$0xf] }
 0x777   : > { %v4029_v35 = vpop.xlane.xlu2 %4028 }
 0x778   : > { %v4043_v52 = vmul.f32 %v4029_v35, %v8502_v9  ;;  %v4004_v44 = vmul.f32 %v8021_v21, %v3993_v5  ;;  %4316 = vmatpush.bf16.msra.mxu1 %v5184_v59  ;;  %v5176_v5 = vor.u32 %v5386_v34, %v5175_v48  ;;  %v5177_v35 = vld [vmem:[%s8400_s11 + $0x48] sm:$0xf0]  ;;  %v5378_v59 = vld [vmem:[%s8400_s11 + $0x4] sm:$0xf0] }
 0x77a   : > { %v8092_v49 = vsub.f32 %v8040_v55, %v4043_v52  ;;  %v4015_v60 = vadd.f32 %v8027_v57, %v4004_v44 }
 0x77c   : > { %v8096_v43 = vadd.f32 %v5724_v18, %v4015_v60  ;;  %v4059_v41 = vmul.f32 %v8092_v49, %v8092_v49  ;;  %v5180_v60 = vor.u32 %v5385_v31, %v5177_v35  ;;  %v5167_v18 = vld [vmem:[%s8400_s11 + $0x30] sm:$0xf]  ;;  %4317 = vmatpush.bf16.msra.mxu1 %v5176_v5  ;;  %v5148_v5 = vor.u32 %v5377_v20, %v5145_v39 }
 0x77e   : > { %4040 = vadd.xlane.f32.xlu1 %v8096_v43  ;;  %4068 = vadd.xlane.f32.xlu2 %v4059_v41  ;;  %v5384_v41 = vld [vmem:[%s8400_s11 + $0x34] sm:$0xf0] }
 0x77f   : > { %v4031_v1 = vpop.xlane.xlu0 %4030  ;;  %4346 = vmatpush.bf16.msra.mxu2 %v5180_v60 }
 0x780   : > { %v4044_v23 = vmul.f32 %v4031_v1, %v8502_v9  ;;  %v5383_v1 = vld [vmem:[%s8400_s11 + $0x34] sm:$0xf] }
 0x782   : > { %v8103_v29 = vsub.f32 %v8048_v61, %v4044_v23  ;;  %v5169_v23 = vld [vmem:[%s8400_s11 + $0x38] sm:$0xf0] }
 0x784   : > { %v4060_v21 = vmul.f32 %v8103_v29, %v8103_v29 }
 0x786   : > { %4070 = vadd.xlane.f32.xlu2 %v4060_v21 }
 0x787   : > { %v4033_v57 = vpop.xlane.xlu1 %4032 }
 0x788   : > { %v4045_v40 = vmul.f32 %v4033_v57, %v8502_v9 }
 0x78a   : > { %v8109_v19 = vsub.f32 %v8056_v16, %v4045_v40 }
 0x78c   : > { %v4061_v12 = vmul.f32 %v8109_v19, %v8109_v19 }
 0x78e   : > { %4072 = vadd.xlane.f32.xlu0 %v4061_v12 }
 0x799   : > { %v4035_v7 = vpop.xlane.xlu2 %4034 }
 0x79a   : > { %v4046_v42 = vmul.f32 %v4035_v7, %v8502_v9  ;;  %v5168_v7 = vor.u32 %v5384_v41, %v5167_v18 }
 0x79c   : > { %v8115_v6 = vsub.f32 %v8063_v46, %v4046_v42  ;;  %4318 = vmatpush.bf16.msra.mxu1 %v5168_v7 }
 0x79e   : > { %v4062_v10 = vmul.f32 %v8115_v6, %v8115_v6 }
 0x7a0   : > { %4074 = vadd.xlane.f32.xlu1 %v4062_v10  ;;  %v5172_v10 = vor.u32 %v5383_v1, %v5169_v23 }
 0x7a1   : > { %v4037_v32 = vpop.xlane.xlu0 %4036 }
 0x7a2   : > { %v4047_v58 = vmul.f32 %v4037_v32, %v8502_v9  ;;  %4347 = vmatpush.bf16.msra.mxu2 %v5172_v10 }
 0x7a4   : > { %v8121_v25 = vsub.f32 %v8071_v56, %v4047_v58  ;;  %v5159_v58 = vld [vmem:[%s8400_s11 + $0x20] sm:$0xf] }
 0x7a6   : > { %v4063_v11 = vmul.f32 %v8121_v25, %v8121_v25 }
 0x7a8   : > { %4076 = vadd.xlane.f32.xlu2 %v4063_v11  ;;  %v5382_v11 = vld [vmem:[%s8400_s11 + $0x24] sm:$0xf0] }
 0x7a9   : > { %v5160_v27 = vor.u32 %v5382_v11, %v5159_v58 }
 0x7ab   : > { %4319 = vmatpush.bf16.msra.mxu1 %v5160_v27 }
 0x7af   : > { %4320 = vmatpush.bf16.msra.mxu1 %v5152_v47 }
 0x7b7   : > { %v4039_v4 = vpop.xlane.xlu0 %4038 }
 0x7b8   : > { %v4048_v13 = vmul.f32 %v4039_v4, %v8502_v9  ;;  %v5381_v4 = vld [vmem:[%s8400_s11 + $0x24] sm:$0xf] }
 0x7b9   : > { %v5164_v2 = vor.u32 %v5381_v4, %v5161_v3 }
 0x7ba   : > { %v8127_v30 = vsub.f32 %v8078_v63, %v4048_v13 }
 0x7bb   : > { %4348 = vmatpush.bf16.msra.mxu2 %v5164_v2 }
 0x7bc   : > { %v4064_v14 = vmul.f32 %v8127_v30, %v8127_v30 }
 0x7be   : > { %4078 = vadd.xlane.f32.xlu0 %v4064_v14 }
 0x7e9   : > { %v4067_v37 = vpop.xlane.xlu1 %4066 }
 0x7ea   : > { %v4082_v38 = vmul.f32 %v4067_v37, %v8502_v9 }
 0x7ec   : > { %v8156_v50 = vadd.f32 1e-05, %v4082_v38  ;;  %v5379_v38 = vld [vmem:[%s8400_s11 + $0x14] sm:$0xf] }
 0x7ed   : > { %v5156_v8 = vor.u32 %v5379_v38, %v5153_v22 }
 0x7ee   : > { %5701 = vrsqrt.f32 %v8156_v50  ;;  %vm4104_vm8 = vweird.f32 %v8156_v50 }
 0x7ef   : > { %4349 = vmatpush.bf16.msra.mxu2 %v5156_v8 }
 0x7f1   : > { %v4041_v0 = vpop.xlane.xlu1 %4040  ;;  %v4069_v62 = vpop.xlane.xlu2 %4068 }
 0x7f2   : > { %v4049_v52 = vmul.f32 %v4041_v0, %v8502_v9  ;;  %v4083_v44 = vmul.f32 %v4069_v62, %v8502_v9  ;;  %v5144_v0 = vor.u32 %v5378_v59, %v5143_v15 }
 0x7f3   : > { %4350 = vmatpush.bf16.msra.mxu2 %v5148_v5 }
 0x7f4   : > { %v5702_v21 = vpop.eup %5701  ;;  %v8198_v57 = vsub.f32 %v8096_v43, %v4049_v52  ;;  %v4091_v40 = vadd.f32 1e-05, %v4083_v44  ;;  %v8245_v52 = vld [vmem:[%s8398_s9] ss:$0 sm:$0xff]  ;;  %4321 = vmatpush.bf16.msra.mxu1 %v5144_v0 }
 0x7f5   : > { %v4099_v12 = vmul.f32 %v5702_v21, %v8156_v50  ;;  %vm4105_vm6 = vweird.f32 %v5702_v21 }
 0x7f6   : > { %5703 = vrsqrt.f32 %v4091_v40  ;;  %v4065_v42 = vmul.f32 %v8198_v57, %v8198_v57  ;;  %vm4106_vm7 = vmor %vm4104_vm8, %vm4105_vm6  ;;  %vm4114_vm14 = vweird.f32 %v4091_v40 }
 0x7f7   : > { %v4100_v32 = vmul.f32 %v5702_v21, %v4099_v12 }
 0x7f8   : > { %4080 = vadd.xlane.f32.xlu1 %v4065_v42 }
 0x7f9   : > { %v4101_v13 = vmul.f32 0.5, %v4100_v32  ;;  %v4071_v14 = vpop.xlane.xlu2 %4070 }
 0x7fa   : > { %v4084_v36 = vmul.f32 %v4071_v14, %v8502_v9 }
 0x7fb   : > { %v4102_v37 = vsub.f32 1.5, %v4101_v13 }
 0x7fc   : > { %v5704_v33 = vpop.eup %5703  ;;  %v4092_v28 = vadd.f32 1e-05, %v4084_v36 }
 0x7fd   : > { %v4103_v54 = vmul.f32 %v5702_v21, %v4102_v37  ;;  %v4109_v17 = vmul.f32 %v5704_v33, %v4091_v40  ;;  %vm4115_vm12 = vweird.f32 %v5704_v33 }
 0x7fe   : > { %5705 = vrsqrt.f32 %v4092_v28  ;;  %vm4116_vm15 = vmor %vm4114_vm14, %vm4115_vm12  ;;  %vm4124_vm5 = vweird.f32 %v4092_v28 }
 0x7ff   : > { %v4110_v51 = vmul.f32 %v5704_v33, %v4109_v17  ;;  %v4107_v48 = vsel %vm4106_vm7, %v5702_v21, %v4103_v54  ;;  %v8251_v21 = vld [vmem:[%s8399_s10] ss:$0 sm:$0xff] }
 0x800   : > { %v4178_v44 = vmul.f32 %v4107_v48, %v8084_v53 }
 0x801   : > { %v4111_v34 = vmul.f32 0.5, %v4110_v51  ;;  %v4073_v31 = vpop.xlane.xlu0 %4072 }
 0x802   : > { %v4085_v62 = vmul.f32 %v4073_v31, %v8502_v9  ;;  %v4189_v12 = vmul.f32 %v8245_v52, %v4178_v44 }
 0x803   : > { %v4112_v50 = vsub.f32 1.5, %v4111_v34 }
 0x804   : > { %v5706_v35 = vpop.eup %5705  ;;  %v4093_v60 = vadd.f32 1e-05, %v4085_v62  ;;  %v4200_v32 = vadd.f32 %v8251_v21, %v4189_v12 }
 0x805   : > { %v4113_v18 = vmul.f32 %v5704_v33, %v4112_v50  ;;  %v4119_v41 = vmul.f32 %v5706_v35, %v4092_v28  ;;  %vm4125_vm0 = vweird.f32 %v5706_v35 }
 0x806   : > { %5707 = vrsqrt.f32 %v4093_v60  ;;  %vm4126_vm9 = vmor %vm4124_vm5, %vm4125_vm0  ;;  %vm4134_vm4 = vweird.f32 %v4093_v60 }
 0x807   : > { %v4117_v1 = vsel %vm4116_vm15, %v5704_v33, %v4113_v18  ;;  %v4120_v23 = vmul.f32 %v5706_v35, %v4119_v41 }
 0x808   : > { %v4179_v7 = vmul.f32 %v4117_v1, %v8092_v49 }
 0x809   : > { %v4121_v53 = vmul.f32 0.5, %v4120_v23 }
 0x80a   : > { %v4190_v42 = vmul.f32 %v8245_v52, %v4179_v7 }
 0x80b   : > { %v4122_v40 = vsub.f32 1.5, %v4121_v53 }
 0x80c   : > { %v5708_v10 = vpop.eup %5707  ;;  %v4201_v58 = vadd.f32 %v8251_v21, %v4190_v42 }
 0x80d   : > { %v4123_v11 = vmul.f32 %v5706_v35, %v4122_v40  ;;  %v4129_v4 = vmul.f32 %v5708_v10, %v4093_v60  ;;  %vm4135_vm10 = vweird.f32 %v5708_v10  ;;  %v5408_v40 = vld [vmem:[%s8402_s13 + $0x78] sm:$0xff] }
 0x80e   : > { %v4208_v14 = vpack.c.bf16 %v4201_v58, %v4200_v32  ;;  %vm4136_vm11 = vmor %vm4134_vm4, %vm4135_vm10  ;;  %v5399_v32 = vld [vmem:[%s8402_s13 + $0x30] sm:$0xff]  ;;  %4557 = vmatpush.bf16.msra.mxu0 %v5408_v40 }
 0x80f   : > { %v4130_v3 = vmul.f32 %v5708_v10, %v4129_v4  ;;  %v4127_v36 = vsel %vm4126_vm9, %v5706_v35, %v4123_v11  ;;  %v5407_v58 = vld [vmem:[%s8402_s13 + $0x70] sm:$0xff]  ;;  %v5398_v4 = vld [vmem:[%s8402_s13 + $0x28] sm:$0xff] }
 0x810   : > { %4322 = vmatmul.bf16.vlgmr.msra.gmra.mxu1 %v4208_v14  ;;  %4351 = vmatmul.bf16.vlgmr.msra.gmra.mxu2 %v4208_v14  ;;  %v4180_v45 = vmul.f32 %v4127_v36, %v8103_v29 }
 0x811   : > { %v4131_v2 = vmul.f32 0.5, %v4130_v3 }
 0x812   : > { %v4191_v47 = vmul.f32 %v8245_v52, %v4180_v45  ;;  %4558 = vmatpush.bf16.msra.mxu0 %v5407_v58  ;;  %v5405_v45 = vld [vmem:[%s8402_s13 + $0x60] sm:$0xff] }
 0x813   : > { %v4075_v13 = vpop.xlane.xlu1 %4074  ;;  %v4132_v26 = vsub.f32 1.5, %v4131_v2 }
 0x814   : > { %v4086_v27 = vmul.f32 %v4075_v13, %v8502_v9  ;;  %v4202_v29 = vadd.f32 %v8251_v21, %v4191_v47  ;;  %v5406_v13 = vld [vmem:[%s8402_s13 + $0x68] sm:$0xff]  ;;  %v5403_v47 = vld [vmem:[%s8402_s13 + $0x50] sm:$0xff] }
 0x815   : > { %v4133_v37 = vmul.f32 %v5708_v10, %v4132_v26  ;;  %v5396_v26 = vld [vmem:[%s8402_s13 + $0x18] sm:$0xff] }
 0x816   : > { %v4094_v49 = vadd.f32 1e-05, %v4086_v27  ;;  %4559 = vmatpush.bf16.msra.mxu0 %v5406_v13 }
 0x817   : > { %v4137_v33 = vsel %vm4136_vm11, %v5708_v10, %v4133_v37  ;;  %v5395_v37 = vld [vmem:[%s8402_s13 + $0x10] sm:$0xff] }
 0x818   : > { %5709 = vrsqrt.f32 %v4094_v49  ;;  %v4181_v54 = vmul.f32 %v4137_v33, %v8109_v19  ;;  %vm4144_vm2 = vweird.f32 %v4094_v49 }
 0x81a   : > { %v4192_v15 = vmul.f32 %v8245_v52, %v4181_v54  ;;  %4560 = vmatpush.bf16.msra.mxu0 %v5405_v45 }
 0x81b   : > { %v4077_v38 = vpop.xlane.xlu2 %4076 }
 0x81c   : > { %v4087_v22 = vmul.f32 %v4077_v38, %v8502_v9  ;;  %v4203_v51 = vadd.f32 %v8251_v21, %v4192_v15 }
 0x81e   : > { %v5710_v28 = vpop.eup %5709  ;;  %v4095_v17 = vadd.f32 1e-05, %v4087_v22  ;;  %v4209_v39 = vpack.c.bf16 %v4203_v51, %v4202_v29  ;;  %v5404_v22 = vld [vmem:[%s8402_s13 + $0x58] sm:$0xff] }
 0x81f   : > { %v4139_v8 = vmul.f32 %v5710_v28, %v4094_v49  ;;  %vm4145_vm1 = vweird.f32 %v5710_v28  ;;  %v5397_v49 = vld [vmem:[%s8402_s13 + $0x20] sm:$0xff]  ;;  %4561 = vmatpush.bf16.msra.mxu0 %v5404_v22 }
 0x820   : > { %5711 = vrsqrt.f32 %v4095_v17  ;;  %4327 = vmatmul.bf16.gmra.mxu1 %v4209_v39  ;;  %4356 = vmatmul.bf16.gmra.mxu2 %v4209_v39  ;;  %vm4146_vm13 = vmor %vm4144_vm2, %vm4145_vm1  ;;  %vm4154_vm6 = vweird.f32 %v4095_v17  ;;  %v5402_v39 = vld [vmem:[%s8402_s13 + $0x48] sm:$0xff] }
 0x821   : > { %v4140_v59 = vmul.f32 %v5710_v28, %v4139_v8 }
 0x823   : > { %v4141_v20 = vmul.f32 0.5, %v4140_v59  ;;  %4562 = vmatpush.bf16.msra.mxu0 %v5403_v47  ;;  %v5393_v59 = vld [vmem:[%s8402_s13] sm:$0xff] }
 0x825   : > { %v4142_v48 = vsub.f32 1.5, %v4141_v20 }
 0x826   : > { %v5712_v34 = vpop.eup %5711 }
 0x827   : > { %v4143_v31 = vmul.f32 %v5710_v28, %v4142_v48  ;;  %v4149_v19 = vmul.f32 %v5712_v34, %v4095_v17  ;;  %vm4155_vm3 = vweird.f32 %v5712_v34  ;;  %v5394_v17 = vld [vmem:[%s8402_s13 + $0x8] sm:$0xff]  ;;  %4563 = vmatpush.bf16.msra.mxu0 %v5402_v39 }
 0x828   : > { %vm4156_vm8 = vmor %vm4154_vm6, %vm4155_vm3 }
 0x829   : > { %v4150_v0 = vmul.f32 %v5712_v34, %v4149_v19  ;;  %v4147_v62 = vsel %vm4146_vm13, %v5710_v28, %v4143_v31  ;;  %v5401_v19 = vld [vmem:[%s8402_s13 + $0x40] sm:$0xff] }
 0x82a   : > { %v4182_v35 = vmul.f32 %v4147_v62, %v8115_v6 }
 0x82b   : > { %v4151_v5 = vmul.f32 0.5, %v4150_v0  ;;  %4564 = vmatpush.bf16.msra.mxu0 %v5401_v19 }
 0x82c   : > { %v4193_v41 = vmul.f32 %v8245_v52, %v4182_v35 }
 0x82d   : > { %v4152_v50 = vsub.f32 1.5, %v4151_v5 }
 0x82e   : > { %v4204_v23 = vadd.f32 %v8251_v21, %v4193_v41 }
 0x82f   : > { %v4153_v44 = vmul.f32 %v5712_v34, %v4152_v50 }
 0x831   : > { %v4157_v60 = vsel %vm4156_vm8, %v5712_v34, %v4153_v44  ;;  %v4079_v53 = vpop.xlane.xlu0 %4078 }
 0x832   : > { %v4183_v18 = vmul.f32 %v4157_v60, %v8121_v25  ;;  %v4088_v6 = vmul.f32 %v4079_v53, %v8502_v9  ;;  %v5400_v25 = vld [vmem:[%s8402_s13 + $0x38] sm:$0xff] }
 0x833   : > { %4528 = vmatpush.bf16.msra.mxu3 %v5400_v25 }
 0x834   : > { %v4194_v1 = vmul.f32 %v8245_v52, %v4183_v18  ;;  %v4096_v42 = vadd.f32 1e-05, %v4088_v6 }
 0x836   : > { %v4205_v12 = vadd.f32 %v8251_v21, %v4194_v1  ;;  %5713 = vrsqrt.f32 %v4096_v42  ;;  %vm4164_vm12 = vweird.f32 %v4096_v42 }
 0x837   : > { %4529 = vmatpush.bf16.msra.mxu3 %v5399_v32 }
 0x838   : > { %v4210_v7 = vpack.c.bf16 %v4205_v12, %v4204_v23 }
 0x83a   : > { %4332 = vmatmul.bf16.gmra.mxu1 %v4210_v7  ;;  %4361 = vmatmul.bf16.gmra.mxu2 %v4210_v7 }
 0x83b   : > { %4530 = vmatpush.bf16.msra.mxu3 %v5398_v4 }
 0x83c   : > { %v5714_v10 = vpop.eup %5713 }
 0x83d   : > { %v4159_v11 = vmul.f32 %v5714_v10, %v4096_v42  ;;  %vm4165_vm7 = vweird.f32 %v5714_v10 }
 0x83e   : > { %vm4166_vm14 = vmor %vm4164_vm12, %vm4165_vm7 }
 0x83f   : > { %v4160_v14 = vmul.f32 %v5714_v10, %v4159_v11  ;;  %4531 = vmatpush.bf16.msra.mxu3 %v5397_v49 }
 0x841   : > { %v4161_v2 = vmul.f32 0.5, %v4160_v14 }
 0x843   : > { %4532 = vmatpush.bf16.msra.mxu3 %v5396_v26 }
 0x847   : > { %4533 = vmatpush.bf16.msra.mxu3 %v5395_v37 }
 0x84b   : > { %4534 = vmatpush.bf16.msra.mxu3 %v5394_v17 }
 0x84f   : > { %4535 = vmatpush.bf16.msra.mxu3 %v5393_v59 }
 0x86b   : > { %v4081_v27 = vpop.xlane.xlu1 %4080 }
 0x86c   : > { %v4089_v3 = vmul.f32 %v4081_v27, %v8502_v9  ;;  %v4162_v9 = vsub.f32 1.5, %v4161_v2 }
 0x86e   : > { %v4097_v36 = vadd.f32 1e-05, %v4089_v3  ;;  %v4163_v33 = vmul.f32 %v5714_v10, %v4162_v9 }
 0x870   : > { %5715 = vrsqrt.f32 %v4097_v36  ;;  %v4167_v8 = vsel %vm4166_vm14, %v5714_v10, %v4163_v33  ;;  %vm4174_vm0 = vweird.f32 %v4097_v36 }
 0x871   : > { %v4184_v51 = vmul.f32 %v4167_v8, %v8127_v30 }
 0x873   : > { %v4195_v31 = vmul.f32 %v8245_v52, %v4184_v51 }
 0x875   : > { %v4206_v0 = vadd.f32 %v8251_v21, %v4195_v31 }
 0x876   : > { %v5716_v38 = vpop.eup %5715 }
 0x877   : > { %v4169_v28 = vmul.f32 %v5716_v38, %v4097_v36  ;;  %vm4175_vm15 = vweird.f32 %v5716_v38 }
 0x878   : > { %vm4176_vm5 = vmor %vm4174_vm0, %vm4175_vm15 }
 0x879   : > { %v4170_v54 = vmul.f32 %v5716_v38, %v4169_v28 }
 0x87b   : > { %v4171_v15 = vmul.f32 0.5, %v4170_v54 }
 0x87d   : > { %v4172_v29 = vsub.f32 1.5, %v4171_v15 }
 0x87f   : > { %v4173_v20 = vmul.f32 %v5716_v38, %v4172_v29 }
 0x881   : > { %v4177_v48 = vsel %vm4176_vm5, %v5716_v38, %v4173_v20 }
 0x882   : > { %v4185_v34 = vmul.f32 %v4177_v48, %v8198_v57  ;;  %v4228_v57 = vld [vmem:[%s8401_s12] sm:$0x3] }
 0x883   : > { %v4230_v35 = vperm.slane %v4228_v57, 0  ;;  %v4231_v41 = vperm.slane %v4228_v57, 1 }
 0x884   : > { %v4196_v30 = vmul.f32 %v8245_v52, %v4185_v34 }
 0x886   : > { %v4207_v62 = vadd.f32 %v8251_v21, %v4196_v30 }
 0x888   : > { %v4211_v5 = vpack.c.bf16 %v4207_v62, %v4206_v0 }
 0x88a   : > { %4337 = vmatmul.bf16.gmra.mxu1 %v4211_v5  ;;  %4366 = vmatmul.bf16.gmra.mxu2 %v4211_v5 }
 0x88d   : > { %v4323_v50 = vpop.f32.mrf.mxu1 }
 0x88e   : > { %v4324_v60 = vadd.f32 %v4323_v50, %v4230_v35 }
 0x890   : > { %v4372_v52 = vmax.f32 %v4324_v60, 0.0  ;;  %v5538_v60 = vld [vmem:[%s8403_s14] ss:$0 sm:$0xff] }
 0x893   : > { %v4352_v44 = vpop.f32.mrf.mxu2 }
 0x894   : > { %v4353_v12 = vadd.f32 %v4352_v44, %v4231_v41 }
 0x895   : > { %v4325_v18 = vpop.f32.mrf.mxu1 }
 0x896   : > { %v4326_v1 = vadd.f32 %v4325_v18, %v4230_v35  ;;  %v4373_v42 = vmax.f32 %v4353_v12, 0.0 }
 0x898   : > { %v4374_v23 = vmax.f32 %v4326_v1, 0.0 }
 0x89a   : > { %v4388_v7 = vpack.c.bf16 %v4374_v23, %v4372_v52 }
 0x89b   : > { %v4354_v21 = vpop.f32.mrf.mxu2 }
 0x89c   : > { %v4355_v53 = vadd.f32 %v4354_v21, %v4231_v41  ;;  %4536 = vmatmul.bf16.vlgmr.msra.gmra.mxu3 %v4388_v7 }
 0x89d   : > { %v4328_v6 = vpop.f32.mrf.mxu1 }
 0x89e   : > { %v4375_v25 = vmax.f32 %v4355_v53, 0.0  ;;  %v4329_v32 = vadd.f32 %v4328_v6, %v4230_v35 }
 0x8a0   : > { %v4389_v40 = vpack.c.bf16 %v4375_v25, %v4373_v42  ;;  %v4376_v4 = vmax.f32 %v4329_v32, 0.0 }
 0x8a2   : > { %4565 = vmatmul.bf16.vlgmr.msra.gmra.mxu0 %v4389_v40 }
 0x8a3   : > { %v4357_v10 = vpop.f32.mrf.mxu2 }
 0x8a4   : > { %v4358_v14 = vadd.f32 %v4357_v10, %v4231_v41 }
 0x8a5   : > { %v4330_v58 = vpop.f32.mrf.mxu1 }
 0x8a6   : > { %v4331_v11 = vadd.f32 %v4330_v58, %v4230_v35  ;;  %v4377_v36 = vmax.f32 %v4358_v14, 0.0 }
 0x8a8   : > { %v4378_v13 = vmax.f32 %v4331_v11, 0.0 }
 0x8aa   : > { %v4390_v27 = vpack.c.bf16 %v4378_v13, %v4376_v4 }
 0x8ab   : > { %v4359_v3 = vpop.f32.mrf.mxu2 }
 0x8ac   : > { %v4360_v49 = vadd.f32 %v4359_v3, %v4231_v41  ;;  %4541 = vmatmul.bf16.gmra.mxu3 %v4390_v27 }
 0x8ae   : > { %v4379_v2 = vmax.f32 %v4360_v49, 0.0 }
 0x8b0   : > { %v4391_v26 = vpack.c.bf16 %v4379_v2, %v4377_v36 }
 0x8b2   : > { %4570 = vmatmul.bf16.gmra.mxu0 %v4391_v26 }
 0x8b7   : > { %v4333_v45 = vpop.f32.mrf.mxu1 }
 0x8b8   : > { %v4334_v37 = vadd.f32 %v4333_v45, %v4230_v35 }
 0x8ba   : > { %v4380_v33 = vmax.f32 %v4334_v37, 0.0 }
 0x8bd   : > { %v4362_v9 = vpop.f32.mrf.mxu2 }
 0x8be   : > { %v4363_v54 = vadd.f32 %v4362_v9, %v4231_v41 }
 0x8bf   : > { %v4335_v38 = vpop.f32.mrf.mxu1 }
 0x8c0   : > { %v4336_v22 = vadd.f32 %v4335_v38, %v4230_v35  ;;  %v4381_v15 = vmax.f32 %v4363_v54, 0.0 }
 0x8c2   : > { %v4382_v28 = vmax.f32 %v4336_v22, 0.0 }
 0x8c4   : > { %v4392_v17 = vpack.c.bf16 %v4382_v28, %v4380_v33 }
 0x8c5   : > { %v4364_v47 = vpop.f32.mrf.mxu2 }
 0x8c6   : > { %v4365_v8 = vadd.f32 %v4364_v47, %v4231_v41  ;;  %4546 = vmatmul.bf16.gmra.mxu3 %v4392_v17 }
 0x8c8   : > { %v4383_v59 = vmax.f32 %v4365_v8, 0.0 }
 0x8ca   : > { %v4393_v29 = vpack.c.bf16 %v4383_v59, %v4381_v15 }
 0x8cc   : > { %4575 = vmatmul.bf16.gmra.mxu0 %v4393_v29 }
 0x907   : > { %v4338_v51 = vpop.f32.mrf.mxu1 }
 0x908   : > { %v4339_v39 = vadd.f32 %v4338_v51, %v4230_v35 }
 0x90a   : > { %v4384_v31 = vmax.f32 %v4339_v39, 0.0 }
 0x90d   : > { %v4367_v20 = vpop.f32.mrf.mxu2 }
 0x90e   : > { %v4368_v30 = vadd.f32 %v4367_v20, %v4231_v41 }
 0x90f   : > { %v4340_v48 = vpop.f32.mrf.mxu1 }
 0x910   : > { %v4341_v34 = vadd.f32 %v4340_v48, %v4230_v35  ;;  %v4385_v57 = vmax.f32 %v4368_v30, 0.0 }
 0x912   : > { %v4386_v19 = vmax.f32 %v4341_v34, 0.0 }
 0x914   : > { %v4394_v0 = vpack.c.bf16 %v4386_v19, %v4384_v31 }
 0x915   : > { %v4369_v62 = vpop.f32.mrf.mxu2 }
 0x916   : > { %v4370_v5 = vadd.f32 %v4369_v62, %v4231_v41  ;;  %4551 = vmatmul.bf16.gmra.mxu3 %v4394_v0 }
 0x918   : > { %v4387_v50 = vmax.f32 %v4370_v5, 0.0 }
 0x91a   : > { %v4395_v44 = vpack.c.bf16 %v4387_v50, %v4385_v57 }
 0x91c   : > { %4580 = vmatmul.bf16.gmra.mxu0 %v4395_v44 }
 0x91f   : > { %v4537_v18 = vpop.f32.mrf.mxu3  ;;  %v4566_v1 = vpop.f32.mrf.mxu0 }
 0x920   : > { %v4538_v52 = vadd.f32 %v5538_v60, %v4537_v18 }
 0x922   : > { %v4567_v35 = vadd.f32 %v4566_v1, %v4538_v52 }
 0x924   : > { %v4586_v23 = vadd.f32 %v4567_v35, %v8033_v24 }
 0x926   : > { %4594 = vst [vmem:[%s8336_s30] sm:$0xff] %v4586_v23 }
 0x927   : > { %v4539_v41 = vpop.f32.mrf.mxu3  ;;  %v4568_v12 = vpop.f32.mrf.mxu0 }
 0x928   : > { %v4540_v7 = vadd.f32 %v5538_v60, %v4539_v41 }
 0x92a   : > { %v4569_v21 = vadd.f32 %v4568_v12, %v4540_v7 }
 0x92c   : > { %v4587_v53 = vadd.f32 %v4569_v21, %v8040_v55 }
 0x92e   : > { %4595 = vst [vmem:[%s8336_s30 + $0x8] sm:$0xff] %v4587_v53 }
 0x92f   : > { %v4542_v6 = vpop.f32.mrf.mxu3  ;;  %v4571_v42 = vpop.f32.mrf.mxu0 }
 0x930   : > { %v4543_v25 = vadd.f32 %v5538_v60, %v4542_v6 }
 0x932   : > { %v4572_v40 = vadd.f32 %v4571_v42, %v4543_v25 }
 0x934   : > { %v4588_v24 = vadd.f32 %v4572_v40, %v8048_v61 }
 0x936   : > { %4596 = vst [vmem:[%s8336_s30 + $0x10] sm:$0xff] %v4588_v24 }
 0x937   : > { %v4544_v10 = vpop.f32.mrf.mxu3  ;;  %v4573_v58 = vpop.f32.mrf.mxu0 }
 0x938   : > { %v4545_v32 = vadd.f32 %v5538_v60, %v4544_v10 }
 0x93a   : > { %v4574_v11 = vadd.f32 %v4573_v58, %v4545_v32 }
 0x93c   : > { %v4589_v4 = vadd.f32 %v4574_v11, %v8056_v16 }
 0x93e   : > { %4597 = vst [vmem:[%s8336_s30 + $0x18] sm:$0xff] %v4589_v4 }
 0x949   : > { %v4547_v13 = vpop.f32.mrf.mxu3  ;;  %v4576_v55 = vpop.f32.mrf.mxu0 }
 0x94a   : > { %v4548_v14 = vadd.f32 %v5538_v60, %v4547_v13 }
 0x94c   : > { %v4577_v27 = vadd.f32 %v4576_v55, %v4548_v14 }
 0x94e   : > { %v4590_v3 = vadd.f32 %v4577_v27, %v8063_v46 }
 0x950   : > { %4598 = vst [vmem:[%s8336_s30 + $0x20] sm:$0xff] %v4590_v3 }
 0x951   : > { %v4549_v61 = vpop.f32.mrf.mxu3  ;;  %v4578_v36 = vpop.f32.mrf.mxu0 }
 0x952   : > { %v4550_v49 = vadd.f32 %v5538_v60, %v4549_v61 }
 0x954   : > { %v4579_v2 = vadd.f32 %v4578_v36, %v4550_v49 }
 0x956   : > { %v4591_v26 = vadd.f32 %v4579_v2, %v8071_v56 }
 0x958   : > { %4599 = vst [vmem:[%s8336_s30 + $0x28] sm:$0xff] %v4591_v26 }
 0x999   : > { %v4552_v45 = vpop.f32.mrf.mxu3  ;;  %v4581_v16 = vpop.f32.mrf.mxu0 }
 0x99a   : > { %v4553_v9 = vadd.f32 %v5538_v60, %v4552_v45 }
 0x99c   : > { %v4582_v37 = vadd.f32 %v4581_v16, %v4553_v9 }
 0x99e   : > { %v4592_v38 = vadd.f32 %v4582_v37, %v8078_v63 }
 0x9a0   : > { %4600 = vst [vmem:[%s8336_s30 + $0x30] sm:$0xff] %v4592_v38 }
 0x9a1   : > { %v4554_v46 = vpop.f32.mrf.mxu3  ;;  %v4583_v22 = vpop.f32.mrf.mxu0 }
 0x9a2   : > { %v4555_v56 = vadd.f32 %v5538_v60, %v4554_v46 }
 0x9a4   : > { %v4584_v33 = vadd.f32 %v4583_v22, %v4555_v56 }
 0x9a6   : > { %v4593_v28 = vadd.f32 %v4584_v33, %v8096_v43 }
 0x9a8   : > { %4601 = vst [vmem:[%s8336_s30 + $0x38] sm:$0xff] %v4593_v28 }
 0x9a9   : > { %5752 = shalt.err (!%p5749_p5)
}
 0x9aa   : > { %s5793_s30 = smov 128   ;;  %s5794_s0 = smov 256  }
 0x9ab   : > { %s5795_s1 = smov 8  }
 0x9ac   : > { %5425 = dma.vmem_to_hbm [thread:$0]  (%p5914_p6), %s4615_s23, 1024, %s4617_s17, %s4603_s20, %s5793_s30, %s5794_s0, %s5795_s1  }
 0x9ad PF: > { %s4631_s16 = sand.u32 1, %s5775_s18   ;;  %p5428_p7 = pnand %p4687_p9, %p5918_p8 }
 0x9ae   : > { %s4632_s22 = scalar_lea.sflag [#allocation4], %s4631_s16 }
 0x9af   : > { %p5429_p10 = pneg %p5428_p7 }
 0x9b1   : > { %5770 = dma.done.wait (%p5429_p10), %s4632_s22, 1024  }
 0x9b2   : > { %5772 = vsyncadd (%p5429_p10), %s4632_s22, 4294966272  ;;  %s8506_s21 = sld [smem:[#allocation7_spill]]  ;;  %s8509_s18 = smov %s5779_s19 }
 0x9b3   : > { %s8507_s27 = sld [smem:[#allocation6_spill]] }
 0x9b4   : > { %s8508_s20 = sld [smem:[#allocation8_spill]] }
 0x9b8   : > { %p25_p11 = scmp.ge.s32.totalorder %s8506_s21, 4  }
 0x9b9   : > { %s8510_s19 = smov %s8507_s27 }
 0x9ba   :  { %27 = sbr.rel (!%p25_p11) target bundleno = 7 (0x7), region = 158 }
 0x9bf   :  { %4638 = vsyncpa [#allocation4], 1 }
 0x9c0   :  { %4640 = vsyncpa [#allocation4 + $0x1], 1 }

</bundles_post_ra>
